<compile_context>
chip_gen: v5e
topology: v5e:2x2
jax: 0.10.0
libtpu: 0.0.40
codegen_flags: <defaults>
</compile_context>

<pallas_src>
import functools

import jax
import jax.numpy as jnp
from jax.experimental import pallas as pl
from jax.experimental.pallas import tpu as pltpu


# ----------------------------------------------------------------------------
# Tiled matmul + bias (+ optional ReLU)
# ----------------------------------------------------------------------------
def _round_up(x, m):
    return (x + m - 1) // m * m


def _fit(dim, pref, align):
    """Pick a tile size and the padded extent for one matmul dimension."""
    if dim <= pref:
        return dim, dim                      # full-extent block, no padding
    tile = max(align, (pref // align) * align)
    return tile, _round_up(dim, tile)


def _matmul_bias_kernel(a_ref, w_ref, b_ref, o_ref, acc_ref, *, activation):
    @pl.when(pl.program_id(2) == 0)
    def _():
        acc_ref[...] = jnp.zeros_like(acc_ref)

    acc_ref[...] += jnp.dot(a_ref[...], w_ref[...],
                            preferred_element_type=jnp.float32)

    @pl.when(pl.program_id(2) == pl.num_programs(2) - 1)
    def _():
        r = acc_ref[...] + b_ref[...]
        if activation == "relu":
            r = jnp.maximum(r, 0.0)
        o_ref[...] = r.astype(o_ref.dtype)


def matmul_bias(a, w, b, activation="none", *, tm=256, tn=256, tk=256):
    """a: (M, K), w: (K, N), b: (N,) -> (M, N), optionally ReLU, f32 accumulation."""
    M, K = a.shape
    K2, N = w.shape
    assert K == K2
    tm, Mp = _fit(M, tm, 8)       # sublane dim
    tk, Kp = _fit(K, tk, 128)     # lane dim of `a`, sublane of `w`
    tn, Np = _fit(N, tn, 128)     # lane dim of `w` / output

    a_p = a if (Mp == M and Kp == K) else jnp.pad(a, ((0, Mp - M), (0, Kp - K)))
    w_p = w if (Kp == K and Np == N) else jnp.pad(w, ((0, Kp - K), (0, Np - N)))
    b_p = b if Np == N else jnp.pad(b, ((0, Np - N),))

    out = pl.pallas_call(
        functools.partial(_matmul_bias_kernel, activation=activation),
        out_shape=jax.ShapeDtypeStruct((Mp, Np), a.dtype),
        grid_spec=pltpu.PrefetchScalarGridSpec(
            num_scalar_prefetch=0,
            grid=(Mp // tm, Np // tn, Kp // tk),
            in_specs=[
                pl.BlockSpec((tm, tk), lambda i, j, k: (i, k)),
                pl.BlockSpec((tk, tn), lambda i, j, k: (k, j)),
                pl.BlockSpec((1, tn), lambda i, j, k: (0, j)),
            ],
            out_specs=pl.BlockSpec((tm, tn), lambda i, j, k: (i, j)),
            scratch_shapes=[pltpu.VMEM((tm, tn), jnp.float32)],
        ),
        compiler_params=pltpu.CompilerParams(
            dimension_semantics=("parallel", "parallel", "arbitrary")),
    )(a_p, w_p, b_p.reshape(1, Np))
    if Mp != M or Np != N:
        out = out[:M, :N]
    return out


# ----------------------------------------------------------------------------
# Fused Conv2d(3x3, pad=1) + ReLU, NHWC, no im2col materialization
# ----------------------------------------------------------------------------
def _conv3x3_relu_kernel(x_ref, w_ref, b_ref, o_ref, *, H, Wp, Cout):
    # x_ref: (1, (H+3)*Wp, Cin) flattened, spatially padded image for one batch.
    # For each of the 9 taps the needed pixels are a *contiguous* row range of the
    # flattened image (we also compute 2 junk columns per row, discarded later),
    # so the whole conv is 9 accumulated matmuls with K = Cin on lanes.
    n = H * Wp
    Cin = x_ref.shape[-1]
    acc = jnp.zeros((n, Cout), jnp.float32)
    for dy in range(3):
        for dx in range(3):
            off = dy * Wp + dx
            xs = x_ref[0, off:off + n, :]                       # (n, Cin)
            wt = w_ref[dy * 3 + dx]                             # (Cin, Cout)
            if Cin == 1:
                # K=1 contraction: a broadcasted outer product on the VPU is
                # cheaper than an MXU call with contraction depth 1.
                acc = acc + xs * wt
            else:
                acc = acc + jnp.dot(xs, wt, preferred_element_type=jnp.float32)
    acc = jnp.maximum(acc + b_ref[...], 0.0)
    o_ref[0] = acc.astype(o_ref.dtype)


def conv3x3_relu_nhwc(x, w, b):
    """x: (B, H, W, Cin) NHWC; w: (Cout, Cin, 3, 3) (PyTorch layout); b: (Cout,).

    Returns (B, H, W+2, Cout): the last two columns of each row are junk
    (padded-width outputs) and are ignored by the downstream maxpool kernel.
    """
    B, H, W, Cin = x.shape
    Cout = w.shape[0]
    Wp = W + 2
    # taps layout (9, Cin, Cout); tap t = dy*3 + dx.
    wt = jnp.transpose(w, (2, 3, 1, 0)).reshape(9, Cin, Cout)
    # pad: 1 row top, 2 rows bottom (1 real pad + 1 overrun row for the dy=dx=2
    # tap's junk columns), 1 col left/right; then flatten spatial dims.
    xp = jnp.pad(x, ((0, 0), (1, 2), (1, 1), (0, 0)))
    xf = xp.reshape(B, (H + 3) * Wp, Cin)
    n = H * Wp

    out = pl.pallas_call(
        functools.partial(_conv3x3_relu_kernel, H=H, Wp=Wp, Cout=Cout),
        out_shape=jax.ShapeDtypeStruct((B, n, Cout), x.dtype),
        grid_spec=pltpu.PrefetchScalarGridSpec(
            num_scalar_prefetch=0,
            grid=(B,),
            in_specs=[
                pl.BlockSpec((1, (H + 3) * Wp, Cin), lambda bi: (bi, 0, 0)),
                pl.BlockSpec((9, Cin, Cout), lambda bi: (0, 0, 0)),
                pl.BlockSpec((1, Cout), lambda bi: (0, 0)),
            ],
            out_specs=pl.BlockSpec((1, n, Cout), lambda bi: (bi, 0, 0)),
        ),
        compiler_params=pltpu.CompilerParams(dimension_semantics=("parallel",)),
    )(xf, wt, b.reshape(1, Cout))
    return out.reshape(B, H, Wp, Cout)


# ----------------------------------------------------------------------------
# 2x2 MaxPool (stride 2), NHWC, single read of the un-sliced tensor
# ----------------------------------------------------------------------------
def _maxpool2x2_kernel(x_ref, o_ref, *, Wh, C):
    # x_ref: (1, 2, Wp//2, 2C) -- two image rows, horizontal neighbours packed
    # side-by-side on lanes by a free JAX reshape.
    v = jnp.maximum(x_ref[0, 0], x_ref[0, 1])                   # vertical max
    o_ref[0, 0] = jnp.maximum(v[:Wh, :C], v[:Wh, C:2 * C])       # horizontal max


def maxpool2x2_nhwc(x, valid_w):
    """x: (B, H, Wp, C) with junk columns at w >= valid_w -> (B, H//2, valid_w//2, C)."""
    B, H, Wp, C = x.shape
    assert H % 2 == 0 and Wp % 2 == 0 and valid_w % 2 == 0
    xr = x.reshape(B, H, Wp // 2, 2 * C)     # free reshape: pairs (2j, 2j+1) on lanes
    Wh = valid_w // 2
    return pl.pallas_call(
        functools.partial(_maxpool2x2_kernel, Wh=Wh, C=C),
        out_shape=jax.ShapeDtypeStruct((B, H // 2, Wh, C), x.dtype),
        grid_spec=pltpu.PrefetchScalarGridSpec(
            num_scalar_prefetch=0,
            grid=(B, H // 2),
            in_specs=[pl.BlockSpec((1, 2, Wp // 2, 2 * C),
                                   lambda bi, i: (bi, i, 0, 0))],
            out_specs=pl.BlockSpec((1, 1, Wh, C), lambda bi, i: (bi, i, 0, 0)),
        ),
        compiler_params=pltpu.CompilerParams(
            dimension_semantics=("parallel", "parallel")),
    )(xr)


# ----------------------------------------------------------------------------
# Transformer encoder layer (post-norm, batch_first), gridded over batch
# ----------------------------------------------------------------------------
def _encoder_layer_kernel(
    x_ref,
    wq_ref, bq_ref, wk_ref, bk_ref, wv_ref, bv_ref, wo_ref, bo_ref,
    g1_ref, be1_ref,
    w1_ref, b1_ref, w2_ref, b2_ref,
    g2_ref, be2_ref,
    o_ref,
    *, num_heads, eps, compute_dtype,
):
    # One batch element per grid step: x is (S, D).  Dense projections use the
    # full contraction depth D; per-head attention avoids the lane concatenate by
    # accumulating each head straight into the output projection.
    x = x_ref[...].astype(jnp.float32)                  # (S, D)
    S, D = x.shape
    dh = D // num_heads
    scale = 1.0 / (dh ** 0.5)

    def mm(a, w):
        return jnp.dot(a.astype(compute_dtype), w.astype(compute_dtype),
                       preferred_element_type=jnp.float32)

    q = mm(x, wq_ref[...]) + bq_ref[...]
    k = mm(x, wk_ref[...]) + bk_ref[...]
    v = mm(x, wv_ref[...]) + bv_ref[...]

    attn = jnp.zeros((S, D), jnp.float32)
    # TODO(synk): for long sequences, tile this over S-query blocks (flash style)
    # instead of holding the full (S, S) score matrix per head.
    for h in range(num_heads):
        sl = slice(h * dh, (h + 1) * dh)
        qh = q[:, sl] * scale
        kh = k[:, sl]
        vh = v[:, sl]
        s = jax.lax.dot_general(
            qh.astype(compute_dtype), kh.astype(compute_dtype),
            (((1,), (1,)), ((), ())), preferred_element_type=jnp.float32)  # (S, S)
        s = s - jnp.max(s, axis=-1, keepdims=True)
        p = jnp.exp(s)
        p = p * pl.reciprocal(jnp.sum(p, axis=-1, keepdims=True), approx=True)
        ctx = mm(p, vh)                                   # (S, dh)
        attn = attn + mm(ctx, wo_ref[sl, :])              # accumulate head output proj
    attn = attn + bo_ref[...]

    # residual + LayerNorm 1 (f32)
    y = x + attn
    mu = jnp.mean(y, axis=-1, keepdims=True)
    var = jnp.mean((y - mu) ** 2, axis=-1, keepdims=True)
    y = (y - mu) * jax.lax.rsqrt(var + eps) * g1_ref[...] + be1_ref[...]

    # feed-forward (ReLU)
    h1 = jnp.maximum(mm(y, w1_ref[...]) + b1_ref[...], 0.0)
    ff = mm(h1, w2_ref[...]) + b2_ref[...]

    # residual + LayerNorm 2 (f32)
    z = y + ff
    mu2 = jnp.mean(z, axis=-1, keepdims=True)
    var2 = jnp.mean((z - mu2) ** 2, axis=-1, keepdims=True)
    z = (z - mu2) * jax.lax.rsqrt(var2 + eps) * g2_ref[...] + be2_ref[...]

    o_ref[...] = z.astype(o_ref.dtype)


def encoder_layer(x2, p, *, batch, num_heads, eps=1e-5, compute_dtype=jnp.float32):
    """x2: (B*S, D) activations; one grid step per batch element ('parallel')."""
    BS, D = x2.shape
    S = BS // batch
    assert S * batch == BS

    def row(v):
        return v.reshape(1, -1)

    weights = [
        p["wq"], row(p["bq"]), p["wk"], row(p["bk"]), p["wv"], row(p["bv"]),
        p["wo"], row(p["bo"]),
        row(p["ln1_g"]), row(p["ln1_b"]),
        p["w1"], row(p["b1"]), p["w2"], row(p["b2"]),
        row(p["ln2_g"]), row(p["ln2_b"]),
    ]
    # Weights use whole-array blocks with a constant index map -> DMA'd once,
    # stay resident in VMEM across the batch grid.
    w_specs = [pl.BlockSpec(w.shape, lambda b: (0, 0)) for w in weights]

    return pl.pallas_call(
        functools.partial(_encoder_layer_kernel, num_heads=num_heads, eps=eps,
                          compute_dtype=compute_dtype),
        out_shape=jax.ShapeDtypeStruct((BS, D), x2.dtype),
        grid_spec=pltpu.PrefetchScalarGridSpec(
            num_scalar_prefetch=0,
            grid=(batch,),
            in_specs=[pl.BlockSpec((S, D), lambda b: (b, 0))] + w_specs,
            out_specs=pl.BlockSpec((S, D), lambda b: (b, 0)),
        ),
        compiler_params=pltpu.CompilerParams(dimension_semantics=("parallel",)),
    )(x2, *weights)


# ----------------------------------------------------------------------------
# Mean over sequence (AdaptiveAvgPool1d(1))
# ----------------------------------------------------------------------------
def _mean_pool_kernel(x_ref, o_ref):
    o_ref[...] = jnp.mean(x_ref[...].astype(jnp.float32), axis=1).astype(o_ref.dtype)


def mean_pool_seq(x):
    # TODO(synk): could be fused into the last encoder layer's epilogue; kept
    # separate because it is a single small read of (B, S, D).
    B, S, D = x.shape
    return pl.pallas_call(
        _mean_pool_kernel,
        out_shape=jax.ShapeDtypeStruct((B, D), x.dtype),
    )(x)


# ----------------------------------------------------------------------------
# Full forward pass
# ----------------------------------------------------------------------------
def cnn_transformer_forward(x, params, *, num_heads, compute_dtype=jnp.float32):
    # Mirror the PyTorch dim handling (HW / CHW / NCHW inputs).
    if x.ndim == 2:
        x = x[None, None]
    elif x.ndim == 3:
        x = x[:, None]

    # NCHW -> NHWC once; everything downstream is channels-last.
    x = jnp.transpose(x, (0, 2, 3, 1))
    B, H, W, _ = x.shape

    y = conv3x3_relu_nhwc(x, params["conv1_w"], params["conv1_b"])   # (B, H, W+2, C)
    y = maxpool2x2_nhwc(y, valid_w=W)                                 # (B, H/2, W/2, C)
    H2, W2 = H // 2, W // 2
    y = conv3x3_relu_nhwc(y, params["conv2_w"], params["conv2_b"])    # (B, H2, W2+2, C)
    y = maxpool2x2_nhwc(y, valid_w=W2)                                # (B, H/4, W/4, C)

    Bq, H4, W4, C = y.shape
    S = H4 * W4
    # flatten(2).transpose(1,2) is a free reshape in NHWC: (B, S, C) row-major.
    x2 = y.reshape(B * S, C)

    # Linear projection C -> D (tiled matmul kernel).
    D = params["proj_w"].shape[1]
    x2 = matmul_bias(x2, params["proj_w"], params["proj_b"])          # (B*S, D)

    # Transformer encoder layers (post-norm, batch_first, dropout == identity).
    for lyr in params["layers"]:
        x2 = encoder_layer(x2, lyr, batch=B, num_heads=num_heads,
                           compute_dtype=compute_dtype)

    # transpose(1,2) + AdaptiveAvgPool1d(1) + squeeze == mean over sequence.
    return mean_pool_seq(x2.reshape(B, S, D))


# ----------------------------------------------------------------------------
# Deterministic parameter initialization (synthetic weights, not a checkpoint)
# ----------------------------------------------------------------------------
def init_params(key, *, img_channels, cnn_out, embed_dim, ffn_dim, num_layers):
    def nrm(k, shape, scale=0.02):
        return (scale * jax.random.normal(k, shape)).astype(jnp.float32)

    keys = iter(jax.random.split(key, 64))
    params = {
        "conv1_w": nrm(next(keys), (cnn_out, img_channels, 3, 3), 0.1),
        "conv1_b": nrm(next(keys), (cnn_out,), 0.1),
        "conv2_w": nrm(next(keys), (cnn_out, cnn_out, 3, 3), 0.1),
        "conv2_b": nrm(next(keys), (cnn_out,), 0.1),
        "proj_w": nrm(next(keys), (cnn_out, embed_dim)),
        "proj_b": nrm(next(keys), (embed_dim,)),
        "layers": [],
    }
    for _ in range(num_layers):
        params["layers"].append({
            "wq": nrm(next(keys), (embed_dim, embed_dim)),
            "bq": jnp.zeros((embed_dim,), jnp.float32),
            "wk": nrm(next(keys), (embed_dim, embed_dim)),
            "bk": jnp.zeros((embed_dim,), jnp.float32),
            "wv": nrm(next(keys), (embed_dim, embed_dim)),
            "bv": jnp.zeros((embed_dim,), jnp.float32),
            "wo": nrm(next(keys), (embed_dim, embed_dim)),
            "bo": jnp.zeros((embed_dim,), jnp.float32),
            "ln1_g": jnp.ones((embed_dim,), jnp.float32),
            "ln1_b": jnp.zeros((embed_dim,), jnp.float32),
            "w1": nrm(next(keys), (embed_dim, ffn_dim)),
            "b1": jnp.zeros((ffn_dim,), jnp.float32),
            "w2": nrm(next(keys), (ffn_dim, embed_dim)),
            "b2": jnp.zeros((embed_dim,), jnp.float32),
            "ln2_g": jnp.ones((embed_dim,), jnp.float32),
            "ln2_b": jnp.zeros((embed_dim,), jnp.float32),
        })
    return params


if __name__ == "__main__":
    # Small, module-consistent sizes:
    #   batch=2, img_channels=1, 16x16 images, cnn_out=8, embed_dim=32,
    #   4 heads, ffn=64, 2 transformer layers.  After two MaxPool2d(2): 4x4 -> seq=16.
    B, CIN, HW = 2, 1, 16
    CNN_OUT, EMBED, HEADS, FFN, LAYERS = 8, 32, 4, 64, 2

    key = jax.random.PRNGKey(0)
    x_key, p_key = jax.random.split(key)
    x = jax.random.normal(x_key, (B, CIN, HW, HW), dtype=jnp.float32)

    params = init_params(
        p_key,
        img_channels=CIN, cnn_out=CNN_OUT, embed_dim=EMBED,
        ffn_dim=FFN, num_layers=LAYERS,
    )

    fwd = jax.jit(functools.partial(cnn_transformer_forward, num_heads=HEADS))
    out = fwd(x, params)
    jax.block_until_ready(out)

    assert out.shape == (B, EMBED), out.shape
    assert jnp.all(jnp.isfinite(out))
    print("KERNEL_OK")
</pallas_src>

<mosaic_0001>
module attributes {stable_mosaic.version = 11 : i64} {
  func.func @_conv3x3_relu_kernel(%arg0: i32, %arg1: memref<1x342x1xf32, #tpu.memory_space<vmem>>, %arg2: memref<9x1x8xf32, #tpu.memory_space<vmem>>, %arg3: memref<1x8xf32, #tpu.memory_space<vmem>>, %arg4: memref<1x288x8xf32, #tpu.memory_space<vmem>>) attributes {dimension_semantics = [#tpu.dimension_semantics<parallel>], iteration_bounds = array<i64: 2>, scalar_prefetch = 0 : i64, scratch_operands = 0 : i64, tpu.core_type = #tpu.core_type<tc>, window_params = [{transform_indices = @transform_0, window_bounds = array<i64: 1, 342, 1>}, {pipeline_mode = #tpu.pipeline_mode<synchronous>, transform_indices = @transform_1, window_bounds = array<i64: 9, 1, 8>}, {pipeline_mode = #tpu.pipeline_mode<synchronous>, transform_indices = @transform_2, window_bounds = array<i64: 1, 8>}, {transform_indices = @transform_3, window_bounds = array<i64: 1, 288, 8>}]} {
    %cst = arith.constant 0.000000e+00 : f32
    %0 = vector.broadcast %cst : f32 to vector<288x8xf32>
    %c0 = arith.constant 0 : index
    %c0_0 = arith.constant 0 : index
    %c0_1 = arith.constant 0 : index
    %1 = vector.load %arg1[%c0, %c0_0, %c0_1] : memref<1x342x1xf32, #tpu.memory_space<vmem>>, vector<1x288x1xf32>
    %2 = vector.shape_cast %1 : vector<1x288x1xf32> to vector<288x1xf32>
    %c0_2 = arith.constant 0 : index
    %c0_3 = arith.constant 0 : index
    %c0_4 = arith.constant 0 : index
    %3 = vector.load %arg2[%c0_2, %c0_3, %c0_4] : memref<9x1x8xf32, #tpu.memory_space<vmem>>, vector<1x1x8xf32>
    %4 = vector.shape_cast %3 : vector<1x1x8xf32> to vector<1x8xf32>
    %5 = vector.broadcast %2 : vector<288x1xf32> to vector<288x8xf32>
    %6 = vector.broadcast %4 : vector<1x8xf32> to vector<288x8xf32>
    %7 = arith.mulf %5, %6 : vector<288x8xf32>
    %8 = arith.addf %0, %7 : vector<288x8xf32>
    %c0_5 = arith.constant 0 : index
    %c1 = arith.constant 1 : index
    %c0_6 = arith.constant 0 : index
    %9 = vector.load %arg1[%c0_5, %c1, %c0_6] : memref<1x342x1xf32, #tpu.memory_space<vmem>>, vector<1x288x1xf32>
    %10 = vector.shape_cast %9 : vector<1x288x1xf32> to vector<288x1xf32>
    %c1_7 = arith.constant 1 : index
    %c0_8 = arith.constant 0 : index
    %c0_9 = arith.constant 0 : index
    %11 = vector.load %arg2[%c1_7, %c0_8, %c0_9] : memref<9x1x8xf32, #tpu.memory_space<vmem>>, vector<1x1x8xf32>
    %12 = vector.shape_cast %11 : vector<1x1x8xf32> to vector<1x8xf32>
    %13 = vector.broadcast %10 : vector<288x1xf32> to vector<288x8xf32>
    %14 = vector.broadcast %12 : vector<1x8xf32> to vector<288x8xf32>
    %15 = arith.mulf %13, %14 : vector<288x8xf32>
    %16 = arith.addf %8, %15 : vector<288x8xf32>
    %c0_10 = arith.constant 0 : index
    %c2 = arith.constant 2 : index
    %c0_11 = arith.constant 0 : index
    %17 = vector.load %arg1[%c0_10, %c2, %c0_11] : memref<1x342x1xf32, #tpu.memory_space<vmem>>, vector<1x288x1xf32>
    %18 = vector.shape_cast %17 : vector<1x288x1xf32> to vector<288x1xf32>
    %c2_12 = arith.constant 2 : index
    %c0_13 = arith.constant 0 : index
    %c0_14 = arith.constant 0 : index
    %19 = vector.load %arg2[%c2_12, %c0_13, %c0_14] : memref<9x1x8xf32, #tpu.memory_space<vmem>>, vector<1x1x8xf32>
    %20 = vector.shape_cast %19 : vector<1x1x8xf32> to vector<1x8xf32>
    %21 = vector.broadcast %18 : vector<288x1xf32> to vector<288x8xf32>
    %22 = vector.broadcast %20 : vector<1x8xf32> to vector<288x8xf32>
    %23 = arith.mulf %21, %22 : vector<288x8xf32>
    %24 = arith.addf %16, %23 : vector<288x8xf32>
    %c0_15 = arith.constant 0 : index
    %c18 = arith.constant 18 : index
    %c0_16 = arith.constant 0 : index
    %25 = vector.load %arg1[%c0_15, %c18, %c0_16] : memref<1x342x1xf32, #tpu.memory_space<vmem>>, vector<1x288x1xf32>
    %26 = vector.shape_cast %25 : vector<1x288x1xf32> to vector<288x1xf32>
    %c3 = arith.constant 3 : index
    %c0_17 = arith.constant 0 : index
    %c0_18 = arith.constant 0 : index
    %27 = vector.load %arg2[%c3, %c0_17, %c0_18] : memref<9x1x8xf32, #tpu.memory_space<vmem>>, vector<1x1x8xf32>
    %28 = vector.shape_cast %27 : vector<1x1x8xf32> to vector<1x8xf32>
    %29 = vector.broadcast %26 : vector<288x1xf32> to vector<288x8xf32>
    %30 = vector.broadcast %28 : vector<1x8xf32> to vector<288x8xf32>
    %31 = arith.mulf %29, %30 : vector<288x8xf32>
    %32 = arith.addf %24, %31 : vector<288x8xf32>
    %c0_19 = arith.constant 0 : index
    %c19 = arith.constant 19 : index
    %c0_20 = arith.constant 0 : index
    %33 = vector.load %arg1[%c0_19, %c19, %c0_20] : memref<1x342x1xf32, #tpu.memory_space<vmem>>, vector<1x288x1xf32>
    %34 = vector.shape_cast %33 : vector<1x288x1xf32> to vector<288x1xf32>
    %c4 = arith.constant 4 : index
    %c0_21 = arith.constant 0 : index
    %c0_22 = arith.constant 0 : index
    %35 = vector.load %arg2[%c4, %c0_21, %c0_22] : memref<9x1x8xf32, #tpu.memory_space<vmem>>, vector<1x1x8xf32>
    %36 = vector.shape_cast %35 : vector<1x1x8xf32> to vector<1x8xf32>
    %37 = vector.broadcast %34 : vector<288x1xf32> to vector<288x8xf32>
    %38 = vector.broadcast %36 : vector<1x8xf32> to vector<288x8xf32>
    %39 = arith.mulf %37, %38 : vector<288x8xf32>
    %40 = arith.addf %32, %39 : vector<288x8xf32>
    %c0_23 = arith.constant 0 : index
    %c20 = arith.constant 20 : index
    %c0_24 = arith.constant 0 : index
    %41 = vector.load %arg1[%c0_23, %c20, %c0_24] : memref<1x342x1xf32, #tpu.memory_space<vmem>>, vector<1x288x1xf32>
    %42 = vector.shape_cast %41 : vector<1x288x1xf32> to vector<288x1xf32>
    %c5 = arith.constant 5 : index
    %c0_25 = arith.constant 0 : index
    %c0_26 = arith.constant 0 : index
    %43 = vector.load %arg2[%c5, %c0_25, %c0_26] : memref<9x1x8xf32, #tpu.memory_space<vmem>>, vector<1x1x8xf32>
    %44 = vector.shape_cast %43 : vector<1x1x8xf32> to vector<1x8xf32>
    %45 = vector.broadcast %42 : vector<288x1xf32> to vector<288x8xf32>
    %46 = vector.broadcast %44 : vector<1x8xf32> to vector<288x8xf32>
    %47 = arith.mulf %45, %46 : vector<288x8xf32>
    %48 = arith.addf %40, %47 : vector<288x8xf32>
    %c0_27 = arith.constant 0 : index
    %c36 = arith.constant 36 : index
    %c0_28 = arith.constant 0 : index
    %49 = vector.load %arg1[%c0_27, %c36, %c0_28] : memref<1x342x1xf32, #tpu.memory_space<vmem>>, vector<1x288x1xf32>
    %50 = vector.shape_cast %49 : vector<1x288x1xf32> to vector<288x1xf32>
    %c6 = arith.constant 6 : index
    %c0_29 = arith.constant 0 : index
    %c0_30 = arith.constant 0 : index
    %51 = vector.load %arg2[%c6, %c0_29, %c0_30] : memref<9x1x8xf32, #tpu.memory_space<vmem>>, vector<1x1x8xf32>
    %52 = vector.shape_cast %51 : vector<1x1x8xf32> to vector<1x8xf32>
    %53 = vector.broadcast %50 : vector<288x1xf32> to vector<288x8xf32>
    %54 = vector.broadcast %52 : vector<1x8xf32> to vector<288x8xf32>
    %55 = arith.mulf %53, %54 : vector<288x8xf32>
    %56 = arith.addf %48, %55 : vector<288x8xf32>
    %c0_31 = arith.constant 0 : index
    %c37 = arith.constant 37 : index
    %c0_32 = arith.constant 0 : index
    %57 = vector.load %arg1[%c0_31, %c37, %c0_32] : memref<1x342x1xf32, #tpu.memory_space<vmem>>, vector<1x288x1xf32>
    %58 = vector.shape_cast %57 : vector<1x288x1xf32> to vector<288x1xf32>
    %c7 = arith.constant 7 : index
    %c0_33 = arith.constant 0 : index
    %c0_34 = arith.constant 0 : index
    %59 = vector.load %arg2[%c7, %c0_33, %c0_34] : memref<9x1x8xf32, #tpu.memory_space<vmem>>, vector<1x1x8xf32>
    %60 = vector.shape_cast %59 : vector<1x1x8xf32> to vector<1x8xf32>
    %61 = vector.broadcast %58 : vector<288x1xf32> to vector<288x8xf32>
    %62 = vector.broadcast %60 : vector<1x8xf32> to vector<288x8xf32>
    %63 = arith.mulf %61, %62 : vector<288x8xf32>
    %64 = arith.addf %56, %63 : vector<288x8xf32>
    %c0_35 = arith.constant 0 : index
    %c38 = arith.constant 38 : index
    %c0_36 = arith.constant 0 : index
    %65 = vector.load %arg1[%c0_35, %c38, %c0_36] : memref<1x342x1xf32, #tpu.memory_space<vmem>>, vector<1x288x1xf32>
    %66 = vector.shape_cast %65 : vector<1x288x1xf32> to vector<288x1xf32>
    %c8 = arith.constant 8 : index
    %c0_37 = arith.constant 0 : index
    %c0_38 = arith.constant 0 : index
    %67 = vector.load %arg2[%c8, %c0_37, %c0_38] : memref<9x1x8xf32, #tpu.memory_space<vmem>>, vector<1x1x8xf32>
    %68 = vector.shape_cast %67 : vector<1x1x8xf32> to vector<1x8xf32>
    %69 = vector.broadcast %66 : vector<288x1xf32> to vector<288x8xf32>
    %70 = vector.broadcast %68 : vector<1x8xf32> to vector<288x8xf32>
    %71 = arith.mulf %69, %70 : vector<288x8xf32>
    %72 = arith.addf %64, %71 : vector<288x8xf32>
    %c0_39 = arith.constant 0 : index
    %c0_40 = arith.constant 0 : index
    %73 = vector.load %arg3[%c0_39, %c0_40] : memref<1x8xf32, #tpu.memory_space<vmem>>, vector<1x8xf32>
    %74 = vector.broadcast %73 : vector<1x8xf32> to vector<288x8xf32>
    %75 = arith.addf %72, %74 : vector<288x8xf32>
    %cst_41 = arith.constant 0.000000e+00 : f32
    %76 = vector.broadcast %cst_41 : f32 to vector<288x8xf32>
    %77 = arith.maximumf %75, %76 : vector<288x8xf32>
    %c0_42 = arith.constant 0 : index
    %c0_43 = arith.constant 0 : index
    %c0_44 = arith.constant 0 : index
    %78 = vector.load %arg4[%c0_42, %c0_43, %c0_44] : memref<1x288x8xf32, #tpu.memory_space<vmem>>, vector<1x288x8xf32>
    %79 = vector.shape_cast %78 : vector<1x288x8xf32> to vector<288x8xf32>
    %80 = vector.shape_cast %77 : vector<288x8xf32> to vector<1x288x8xf32>
    tpu.vector_store %arg4[%c0_42, %c0_43, %c0_44], %80 {strides = array<i32>} : memref<1x288x8xf32, #tpu.memory_space<vmem>>, vector<1x288x8xf32>,
    return
  }
  func.func @transform_0(%arg0: i32) -> (i32, i32, i32) {
    %c0_i32 = arith.constant 0 : i32
    %c0_i32_0 = arith.constant 0 : i32
    %c0_i32_1 = arith.constant 0 : i32
    return %arg0, %c0_i32, %c0_i32_0 : i32, i32, i32
  }
  func.func @transform_1(%arg0: i32) -> (i32, i32, i32) {
    %c0_i32 = arith.constant 0 : i32
    %c0_i32_0 = arith.constant 0 : i32
    %c0_i32_1 = arith.constant 0 : i32
    %c0_i32_2 = arith.constant 0 : i32
    return %c0_i32, %c0_i32_0, %c0_i32_1 : i32, i32, i32
  }
  func.func @transform_2(%arg0: i32) -> (i32, i32) {
    %c0_i32 = arith.constant 0 : i32
    %c0_i32_0 = arith.constant 0 : i32
    %c0_i32_1 = arith.constant 0 : i32
    return %c0_i32, %c0_i32_0 : i32, i32
  }
  func.func @transform_3(%arg0: i32) -> (i32, i32, i32) {
    %c0_i32 = arith.constant 0 : i32
    %c0_i32_0 = arith.constant 0 : i32
    %c0_i32_1 = arith.constant 0 : i32
    return %arg0, %c0_i32, %c0_i32_0 : i32, i32, i32
  }
}

module attributes {stable_mosaic.version = 11 : i64} {
  func.func @_maxpool2x2_kernel(%arg0: i32, %arg1: i32, %arg2: memref<1x2x9x16xf32, #tpu.memory_space<vmem>>, %arg3: memref<1x1x8x8xf32, #tpu.memory_space<vmem>>) attributes {dimension_semantics = [#tpu.dimension_semantics<parallel>, #tpu.dimension_semantics<parallel>], iteration_bounds = array<i64: 2, 8>, scalar_prefetch = 0 : i64, scratch_operands = 0 : i64, tpu.core_type = #tpu.core_type<tc>, window_params = [{transform_indices = @transform_0, window_bounds = array<i64: 1, 2, 9, 16>}, {transform_indices = @transform_1, window_bounds = array<i64: 1, 1, 8, 8>}]} {
    %c0 = arith.constant 0 : index
    %c0_0 = arith.constant 0 : index
    %c0_1 = arith.constant 0 : index
    %c0_2 = arith.constant 0 : index
    %0 = vector.load %arg2[%c0, %c0_0, %c0_1, %c0_2] : memref<1x2x9x16xf32, #tpu.memory_space<vmem>>, vector<1x1x9x16xf32>
    %1 = vector.shape_cast %0 : vector<1x1x9x16xf32> to vector<9x16xf32>
    %c0_3 = arith.constant 0 : index
    %c1 = arith.constant 1 : index
    %c0_4 = arith.constant 0 : index
    %c0_5 = arith.constant 0 : index
    %2 = vector.load %arg2[%c0_3, %c1, %c0_4, %c0_5] : memref<1x2x9x16xf32, #tpu.memory_space<vmem>>, vector<1x1x9x16xf32>
    %3 = vector.shape_cast %2 : vector<1x1x9x16xf32> to vector<9x16xf32>
    %4 = arith.maximumf %1, %3 : vector<9x16xf32>
    %5 = vector.extract_strided_slice %4 {offsets = [0, 0], sizes = [8, 8], strides = [1, 1]} : vector<9x16xf32> to vector<8x8xf32>
    %6 = vector.extract_strided_slice %4 {offsets = [0, 8], sizes = [8, 8], strides = [1, 1]} : vector<9x16xf32> to vector<8x8xf32>
    %7 = arith.maximumf %5, %6 : vector<8x8xf32>
    %c0_6 = arith.constant 0 : index
    %c0_7 = arith.constant 0 : index
    %c0_8 = arith.constant 0 : index
    %c0_9 = arith.constant 0 : index
    %8 = vector.load %arg3[%c0_6, %c0_7, %c0_8, %c0_9] : memref<1x1x8x8xf32, #tpu.memory_space<vmem>>, vector<1x1x8x8xf32>
    %9 = vector.shape_cast %8 : vector<1x1x8x8xf32> to vector<8x8xf32>
    %10 = vector.shape_cast %7 : vector<8x8xf32> to vector<1x1x8x8xf32>
    tpu.vector_store %arg3[%c0_6, %c0_7, %c0_8, %c0_9], %10 {strides = array<i32>} : memref<1x1x8x8xf32, #tpu.memory_space<vmem>>, vector<1x1x8x8xf32>,
    return
  }
  func.func @transform_0(%arg0: i32, %arg1: i32) -> (i32, i32, i32, i32) {
    %c0_i32 = arith.constant 0 : i32
    %c0_i32_0 = arith.constant 0 : i32
    %c0_i32_1 = arith.constant 0 : i32
    return %arg0, %arg1, %c0_i32, %c0_i32_0 : i32, i32, i32, i32
  }
  func.func @transform_1(%arg0: i32, %arg1: i32) -> (i32, i32, i32, i32) {
    %c0_i32 = arith.constant 0 : i32
    %c0_i32_0 = arith.constant 0 : i32
    %c0_i32_1 = arith.constant 0 : i32
    return %arg0, %arg1, %c0_i32, %c0_i32_0 : i32, i32, i32, i32
  }
}

module attributes {stable_mosaic.version = 11 : i64} {
  func.func @_conv3x3_relu_kernel(%arg0: i32, %arg1: memref<1x110x8xf32, #tpu.memory_space<vmem>>, %arg2: memref<9x8x8xf32, #tpu.memory_space<vmem>>, %arg3: memref<1x8xf32, #tpu.memory_space<vmem>>, %arg4: memref<1x80x8xf32, #tpu.memory_space<vmem>>) attributes {dimension_semantics = [#tpu.dimension_semantics<parallel>], iteration_bounds = array<i64: 2>, scalar_prefetch = 0 : i64, scratch_operands = 0 : i64, tpu.core_type = #tpu.core_type<tc>, window_params = [{transform_indices = @transform_0, window_bounds = array<i64: 1, 110, 8>}, {pipeline_mode = #tpu.pipeline_mode<synchronous>, transform_indices = @transform_1, window_bounds = array<i64: 9, 8, 8>}, {pipeline_mode = #tpu.pipeline_mode<synchronous>, transform_indices = @transform_2, window_bounds = array<i64: 1, 8>}, {transform_indices = @transform_3, window_bounds = array<i64: 1, 80, 8>}]} {
    %cst = arith.constant 0.000000e+00 : f32
    %0 = vector.broadcast %cst : f32 to vector<80x8xf32>
    %c0 = arith.constant 0 : index
    %c0_0 = arith.constant 0 : index
    %c0_1 = arith.constant 0 : index
    %1 = vector.load %arg1[%c0, %c0_0, %c0_1] : memref<1x110x8xf32, #tpu.memory_space<vmem>>, vector<1x80x8xf32>
    %2 = vector.shape_cast %1 : vector<1x80x8xf32> to vector<80x8xf32>
    %c0_2 = arith.constant 0 : index
    %c0_3 = arith.constant 0 : index
    %c0_4 = arith.constant 0 : index
    %3 = vector.load %arg2[%c0_2, %c0_3, %c0_4] : memref<9x8x8xf32, #tpu.memory_space<vmem>>, vector<1x8x8xf32>
    %4 = vector.shape_cast %3 : vector<1x8x8xf32> to vector<8x8xf32>
    %cst_5 = arith.constant dense<0.000000e+00> : vector<80x8xf32>
    %5 = tpu.matmul %2, %4, %cst_5 {dimension_numbers = #tpu.dot_dimension_numbers<[1], [0], [0], [1], [0, 0, 1, 1], [], []>} : vector<80x8xf32>, vector<8x8xf32>, vector<80x8xf32> -> vector<80x8xf32>
    %6 = arith.addf %0, %5 : vector<80x8xf32>
    %c0_6 = arith.constant 0 : index
    %c1 = arith.constant 1 : index
    %c0_7 = arith.constant 0 : index
    %7 = vector.load %arg1[%c0_6, %c1, %c0_7] : memref<1x110x8xf32, #tpu.memory_space<vmem>>, vector<1x80x8xf32>
    %8 = vector.shape_cast %7 : vector<1x80x8xf32> to vector<80x8xf32>
    %c1_8 = arith.constant 1 : index
    %c0_9 = arith.constant 0 : index
    %c0_10 = arith.constant 0 : index
    %9 = vector.load %arg2[%c1_8, %c0_9, %c0_10] : memref<9x8x8xf32, #tpu.memory_space<vmem>>, vector<1x8x8xf32>
    %10 = vector.shape_cast %9 : vector<1x8x8xf32> to vector<8x8xf32>
    %cst_11 = arith.constant dense<0.000000e+00> : vector<80x8xf32>
    %11 = tpu.matmul %8, %10, %cst_11 {dimension_numbers = #tpu.dot_dimension_numbers<[1], [0], [0], [1], [0, 0, 1, 1], [], []>} : vector<80x8xf32>, vector<8x8xf32>, vector<80x8xf32> -> vector<80x8xf32>
    %12 = arith.addf %6, %11 : vector<80x8xf32>
    %c0_12 = arith.constant 0 : index
    %c2 = arith.constant 2 : index
    %c0_13 = arith.constant 0 : index
    %13 = vector.load %arg1[%c0_12, %c2, %c0_13] : memref<1x110x8xf32, #tpu.memory_space<vmem>>, vector<1x80x8xf32>
    %14 = vector.shape_cast %13 : vector<1x80x8xf32> to vector<80x8xf32>
    %c2_14 = arith.constant 2 : index
    %c0_15 = arith.constant 0 : index
    %c0_16 = arith.constant 0 : index
    %15 = vector.load %arg2[%c2_14, %c0_15, %c0_16] : memref<9x8x8xf32, #tpu.memory_space<vmem>>, vector<1x8x8xf32>
    %16 = vector.shape_cast %15 : vector<1x8x8xf32> to vector<8x8xf32>
    %cst_17 = arith.constant dense<0.000000e+00> : vector<80x8xf32>
    %17 = tpu.matmul %14, %16, %cst_17 {dimension_numbers = #tpu.dot_dimension_numbers<[1], [0], [0], [1], [0, 0, 1, 1], [], []>} : vector<80x8xf32>, vector<8x8xf32>, vector<80x8xf32> -> vector<80x8xf32>
    %18 = arith.addf %12, %17 : vector<80x8xf32>
    %c0_18 = arith.constant 0 : index
    %c10 = arith.constant 10 : index
    %c0_19 = arith.constant 0 : index
    %19 = vector.load %arg1[%c0_18, %c10, %c0_19] : memref<1x110x8xf32, #tpu.memory_space<vmem>>, vector<1x80x8xf32>
    %20 = vector.shape_cast %19 : vector<1x80x8xf32> to vector<80x8xf32>
    %c3 = arith.constant 3 : index
    %c0_20 = arith.constant 0 : index
    %c0_21 = arith.constant 0 : index
    %21 = vector.load %arg2[%c3, %c0_20, %c0_21] : memref<9x8x8xf32, #tpu.memory_space<vmem>>, vector<1x8x8xf32>
    %22 = vector.shape_cast %21 : vector<1x8x8xf32> to vector<8x8xf32>
    %cst_22 = arith.constant dense<0.000000e+00> : vector<80x8xf32>
    %23 = tpu.matmul %20, %22, %cst_22 {dimension_numbers = #tpu.dot_dimension_numbers<[1], [0], [0], [1], [0, 0, 1, 1], [], []>} : vector<80x8xf32>, vector<8x8xf32>, vector<80x8xf32> -> vector<80x8xf32>
    %24 = arith.addf %18, %23 : vector<80x8xf32>
    %c0_23 = arith.constant 0 : index
    %c11 = arith.constant 11 : index
    %c0_24 = arith.constant 0 : index
    %25 = vector.load %arg1[%c0_23, %c11, %c0_24] : memref<1x110x8xf32, #tpu.memory_space<vmem>>, vector<1x80x8xf32>
    %26 = vector.shape_cast %25 : vector<1x80x8xf32> to vector<80x8xf32>
    %c4 = arith.constant 4 : index
    %c0_25 = arith.constant 0 : index
    %c0_26 = arith.constant 0 : index
    %27 = vector.load %arg2[%c4, %c0_25, %c0_26] : memref<9x8x8xf32, #tpu.memory_space<vmem>>, vector<1x8x8xf32>
    %28 = vector.shape_cast %27 : vector<1x8x8xf32> to vector<8x8xf32>
    %cst_27 = arith.constant dense<0.000000e+00> : vector<80x8xf32>
    %29 = tpu.matmul %26, %28, %cst_27 {dimension_numbers = #tpu.dot_dimension_numbers<[1], [0], [0], [1], [0, 0, 1, 1], [], []>} : vector<80x8xf32>, vector<8x8xf32>, vector<80x8xf32> -> vector<80x8xf32>
    %30 = arith.addf %24, %29 : vector<80x8xf32>
    %c0_28 = arith.constant 0 : index
    %c12 = arith.constant 12 : index
    %c0_29 = arith.constant 0 : index
    %31 = vector.load %arg1[%c0_28, %c12, %c0_29] : memref<1x110x8xf32, #tpu.memory_space<vmem>>, vector<1x80x8xf32>
    %32 = vector.shape_cast %31 : vector<1x80x8xf32> to vector<80x8xf32>
    %c5 = arith.constant 5 : index
    %c0_30 = arith.constant 0 : index
    %c0_31 = arith.constant 0 : index
    %33 = vector.load %arg2[%c5, %c0_30, %c0_31] : memref<9x8x8xf32, #tpu.memory_space<vmem>>, vector<1x8x8xf32>
    %34 = vector.shape_cast %33 : vector<1x8x8xf32> to vector<8x8xf32>
    %cst_32 = arith.constant dense<0.000000e+00> : vector<80x8xf32>
    %35 = tpu.matmul %32, %34, %cst_32 {dimension_numbers = #tpu.dot_dimension_numbers<[1], [0], [0], [1], [0, 0, 1, 1], [], []>} : vector<80x8xf32>, vector<8x8xf32>, vector<80x8xf32> -> vector<80x8xf32>
    %36 = arith.addf %30, %35 : vector<80x8xf32>
    %c0_33 = arith.constant 0 : index
    %c20 = arith.constant 20 : index
    %c0_34 = arith.constant 0 : index
    %37 = vector.load %arg1[%c0_33, %c20, %c0_34] : memref<1x110x8xf32, #tpu.memory_space<vmem>>, vector<1x80x8xf32>
    %38 = vector.shape_cast %37 : vector<1x80x8xf32> to vector<80x8xf32>
    %c6 = arith.constant 6 : index
    %c0_35 = arith.constant 0 : index
    %c0_36 = arith.constant 0 : index
    %39 = vector.load %arg2[%c6, %c0_35, %c0_36] : memref<9x8x8xf32, #tpu.memory_space<vmem>>, vector<1x8x8xf32>
    %40 = vector.shape_cast %39 : vector<1x8x8xf32> to vector<8x8xf32>
    %cst_37 = arith.constant dense<0.000000e+00> : vector<80x8xf32>
    %41 = tpu.matmul %38, %40, %cst_37 {dimension_numbers = #tpu.dot_dimension_numbers<[1], [0], [0], [1], [0, 0, 1, 1], [], []>} : vector<80x8xf32>, vector<8x8xf32>, vector<80x8xf32> -> vector<80x8xf32>
    %42 = arith.addf %36, %41 : vector<80x8xf32>
    %c0_38 = arith.constant 0 : index
    %c21 = arith.constant 21 : index
    %c0_39 = arith.constant 0 : index
    %43 = vector.load %arg1[%c0_38, %c21, %c0_39] : memref<1x110x8xf32, #tpu.memory_space<vmem>>, vector<1x80x8xf32>
    %44 = vector.shape_cast %43 : vector<1x80x8xf32> to vector<80x8xf32>
    %c7 = arith.constant 7 : index
    %c0_40 = arith.constant 0 : index
    %c0_41 = arith.constant 0 : index
    %45 = vector.load %arg2[%c7, %c0_40, %c0_41] : memref<9x8x8xf32, #tpu.memory_space<vmem>>, vector<1x8x8xf32>
    %46 = vector.shape_cast %45 : vector<1x8x8xf32> to vector<8x8xf32>
    %cst_42 = arith.constant dense<0.000000e+00> : vector<80x8xf32>
    %47 = tpu.matmul %44, %46, %cst_42 {dimension_numbers = #tpu.dot_dimension_numbers<[1], [0], [0], [1], [0, 0, 1, 1], [], []>} : vector<80x8xf32>, vector<8x8xf32>, vector<80x8xf32> -> vector<80x8xf32>
    %48 = arith.addf %42, %47 : vector<80x8xf32>
    %c0_43 = arith.constant 0 : index
    %c22 = arith.constant 22 : index
    %c0_44 = arith.constant 0 : index
    %49 = vector.load %arg1[%c0_43, %c22, %c0_44] : memref<1x110x8xf32, #tpu.memory_space<vmem>>, vector<1x80x8xf32>
    %50 = vector.shape_cast %49 : vector<1x80x8xf32> to vector<80x8xf32>
    %c8 = arith.constant 8 : index
    %c0_45 = arith.constant 0 : index
    %c0_46 = arith.constant 0 : index
    %51 = vector.load %arg2[%c8, %c0_45, %c0_46] : memref<9x8x8xf32, #tpu.memory_space<vmem>>, vector<1x8x8xf32>
    %52 = vector.shape_cast %51 : vector<1x8x8xf32> to vector<8x8xf32>
    %cst_47 = arith.constant dense<0.000000e+00> : vector<80x8xf32>
    %53 = tpu.matmul %50, %52, %cst_47 {dimension_numbers = #tpu.dot_dimension_numbers<[1], [0], [0], [1], [0, 0, 1, 1], [], []>} : vector<80x8xf32>, vector<8x8xf32>, vector<80x8xf32> -> vector<80x8xf32>
    %54 = arith.addf %48, %53 : vector<80x8xf32>
    %c0_48 = arith.constant 0 : index
    %c0_49 = arith.constant 0 : index
    %55 = vector.load %arg3[%c0_48, %c0_49] : memref<1x8xf32, #tpu.memory_space<vmem>>, vector<1x8xf32>
    %56 = vector.broadcast %55 : vector<1x8xf32> to vector<80x8xf32>
    %57 = arith.addf %54, %56 : vector<80x8xf32>
    %cst_50 = arith.constant 0.000000e+00 : f32
    %58 = vector.broadcast %cst_50 : f32 to vector<80x8xf32>
    %59 = arith.maximumf %57, %58 : vector<80x8xf32>
    %c0_51 = arith.constant 0 : index
    %c0_52 = arith.constant 0 : index
    %c0_53 = arith.constant 0 : index
    %60 = vector.load %arg4[%c0_51, %c0_52, %c0_53] : memref<1x80x8xf32, #tpu.memory_space<vmem>>, vector<1x80x8xf32>
    %61 = vector.shape_cast %60 : vector<1x80x8xf32> to vector<80x8xf32>
    %62 = vector.shape_cast %59 : vector<80x8xf32> to vector<1x80x8xf32>
    tpu.vector_store %arg4[%c0_51, %c0_52, %c0_53], %62 {strides = array<i32>} : memref<1x80x8xf32, #tpu.memory_space<vmem>>, vector<1x80x8xf32>,
    return
  }
  func.func @transform_0(%arg0: i32) -> (i32, i32, i32) {
    %c0_i32 = arith.constant 0 : i32
    %c0_i32_0 = arith.constant 0 : i32
    %c0_i32_1 = arith.constant 0 : i32
    return %arg0, %c0_i32, %c0_i32_0 : i32, i32, i32
  }
  func.func @transform_1(%arg0: i32) -> (i32, i32, i32) {
    %c0_i32 = arith.constant 0 : i32
    %c0_i32_0 = arith.constant 0 : i32
    %c0_i32_1 = arith.constant 0 : i32
    %c0_i32_2 = arith.constant 0 : i32
    return %c0_i32, %c0_i32_0, %c0_i32_1 : i32, i32, i32
  }
  func.func @transform_2(%arg0: i32) -> (i32, i32) {
    %c0_i32 = arith.constant 0 : i32
    %c0_i32_0 = arith.constant 0 : i32
    %c0_i32_1 = arith.constant 0 : i32
    return %c0_i32, %c0_i32_0 : i32, i32
  }
  func.func @transform_3(%arg0: i32) -> (i32, i32, i32) {
    %c0_i32 = arith.constant 0 : i32
    %c0_i32_0 = arith.constant 0 : i32
    %c0_i32_1 = arith.constant 0 : i32
    return %arg0, %c0_i32, %c0_i32_0 : i32, i32, i32
  }
}

module attributes {stable_mosaic.version = 11 : i64} {
  func.func @_maxpool2x2_kernel(%arg0: i32, %arg1: i32, %arg2: memref<1x2x5x16xf32, #tpu.memory_space<vmem>>, %arg3: memref<1x1x4x8xf32, #tpu.memory_space<vmem>>) attributes {dimension_semantics = [#tpu.dimension_semantics<parallel>, #tpu.dimension_semantics<parallel>], iteration_bounds = array<i64: 2, 4>, scalar_prefetch = 0 : i64, scratch_operands = 0 : i64, tpu.core_type = #tpu.core_type<tc>, window_params = [{transform_indices = @transform_0, window_bounds = array<i64: 1, 2, 5, 16>}, {transform_indices = @transform_1, window_bounds = array<i64: 1, 1, 4, 8>}]} {
    %c0 = arith.constant 0 : index
    %c0_0 = arith.constant 0 : index
    %c0_1 = arith.constant 0 : index
    %c0_2 = arith.constant 0 : index
    %0 = vector.load %arg2[%c0, %c0_0, %c0_1, %c0_2] : memref<1x2x5x16xf32, #tpu.memory_space<vmem>>, vector<1x1x5x16xf32>
    %1 = vector.shape_cast %0 : vector<1x1x5x16xf32> to vector<5x16xf32>
    %c0_3 = arith.constant 0 : index
    %c1 = arith.constant 1 : index
    %c0_4 = arith.constant 0 : index
    %c0_5 = arith.constant 0 : index
    %2 = vector.load %arg2[%c0_3, %c1, %c0_4, %c0_5] : memref<1x2x5x16xf32, #tpu.memory_space<vmem>>, vector<1x1x5x16xf32>
    %3 = vector.shape_cast %2 : vector<1x1x5x16xf32> to vector<5x16xf32>
    %4 = arith.maximumf %1, %3 : vector<5x16xf32>
    %5 = vector.extract_strided_slice %4 {offsets = [0, 0], sizes = [4, 8], strides = [1, 1]} : vector<5x16xf32> to vector<4x8xf32>
    %6 = vector.extract_strided_slice %4 {offsets = [0, 8], sizes = [4, 8], strides = [1, 1]} : vector<5x16xf32> to vector<4x8xf32>
    %7 = arith.maximumf %5, %6 : vector<4x8xf32>
    %c0_6 = arith.constant 0 : index
    %c0_7 = arith.constant 0 : index
    %c0_8 = arith.constant 0 : index
    %c0_9 = arith.constant 0 : index
    %8 = vector.load %arg3[%c0_6, %c0_7, %c0_8, %c0_9] : memref<1x1x4x8xf32, #tpu.memory_space<vmem>>, vector<1x1x4x8xf32>
    %9 = vector.shape_cast %8 : vector<1x1x4x8xf32> to vector<4x8xf32>
    %10 = vector.shape_cast %7 : vector<4x8xf32> to vector<1x1x4x8xf32>
    tpu.vector_store %arg3[%c0_6, %c0_7, %c0_8, %c0_9], %10 {strides = array<i32>} : memref<1x1x4x8xf32, #tpu.memory_space<vmem>>, vector<1x1x4x8xf32>,
    return
  }
  func.func @transform_0(%arg0: i32, %arg1: i32) -> (i32, i32, i32, i32) {
    %c0_i32 = arith.constant 0 : i32
    %c0_i32_0 = arith.constant 0 : i32
    %c0_i32_1 = arith.constant 0 : i32
    return %arg0, %arg1, %c0_i32, %c0_i32_0 : i32, i32, i32, i32
  }
  func.func @transform_1(%arg0: i32, %arg1: i32) -> (i32, i32, i32, i32) {
    %c0_i32 = arith.constant 0 : i32
    %c0_i32_0 = arith.constant 0 : i32
    %c0_i32_1 = arith.constant 0 : i32
    return %arg0, %arg1, %c0_i32, %c0_i32_0 : i32, i32, i32, i32
  }
}

module attributes {stable_mosaic.version = 11 : i64} {
  func.func @_matmul_bias_kernel(%arg0: i32, %arg1: i32, %arg2: i32, %arg3: memref<32x8xf32, #tpu.memory_space<vmem>>, %arg4: memref<8x32xf32, #tpu.memory_space<vmem>>, %arg5: memref<1x32xf32, #tpu.memory_space<vmem>>, %arg6: memref<32x32xf32, #tpu.memory_space<vmem>>, %arg7: memref<32x32xf32, #tpu.memory_space<vmem>>) attributes {dimension_semantics = [#tpu.dimension_semantics<parallel>, #tpu.dimension_semantics<parallel>, #tpu.dimension_semantics<arbitrary>], iteration_bounds = array<i64: 1, 1, 1>, scalar_prefetch = 0 : i64, scratch_operands = 1 : i64, tpu.core_type = #tpu.core_type<tc>, window_params = [{transform_indices = @transform_0, window_bounds = array<i64: 32, 8>}, {transform_indices = @transform_1, window_bounds = array<i64: 8, 32>}, {transform_indices = @transform_2, window_bounds = array<i64: 1, 32>}, {transform_indices = @transform_3, window_bounds = array<i64: 32, 32>}]} {
    %c0_i32 = arith.constant 0 : i32
    %0 = arith.cmpi eq, %arg2, %c0_i32 : i32
    %1 = arith.extui %0 : i1 to i32
    %c0_i32_0 = arith.constant 0 : i32
    %2 = arith.cmpi ne, %1, %c0_i32_0 : i32
    scf.if %2 {
      %cst_10 = arith.constant 0.000000e+00 : f32
      %12 = vector.broadcast %cst_10 : f32 to vector<32x32xf32>
      %c0_11 = arith.constant 0 : index
      %c0_12 = arith.constant 0 : index
      %13 = vector.load %arg7[%c0_11, %c0_12] : memref<32x32xf32, #tpu.memory_space<vmem>>, vector<32x32xf32>
      tpu.vector_store %arg7[%c0_11, %c0_12], %12 {strides = array<i32>} : memref<32x32xf32, #tpu.memory_space<vmem>>, vector<32x32xf32>,
    } else {
    }
    %c0 = arith.constant 0 : index
    %c0_1 = arith.constant 0 : index
    %3 = vector.load %arg7[%c0, %c0_1] : memref<32x32xf32, #tpu.memory_space<vmem>>, vector<32x32xf32>
    %c0_2 = arith.constant 0 : index
    %c0_3 = arith.constant 0 : index
    %4 = vector.load %arg3[%c0_2, %c0_3] : memref<32x8xf32, #tpu.memory_space<vmem>>, vector<32x8xf32>
    %c0_4 = arith.constant 0 : index
    %c0_5 = arith.constant 0 : index
    %5 = vector.load %arg4[%c0_4, %c0_5] : memref<8x32xf32, #tpu.memory_space<vmem>>, vector<8x32xf32>
    %cst = arith.constant dense<0.000000e+00> : vector<32x32xf32>
    %6 = tpu.matmul %4, %5, %cst {dimension_numbers = #tpu.dot_dimension_numbers<[1], [0], [0], [1], [0, 0, 1, 1], [], []>} : vector<32x8xf32>, vector<8x32xf32>, vector<32x32xf32> -> vector<32x32xf32>
    %7 = arith.addf %3, %6 : vector<32x32xf32>
    %c0_6 = arith.constant 0 : index
    %c0_7 = arith.constant 0 : index
    %8 = vector.load %arg7[%c0_6, %c0_7] : memref<32x32xf32, #tpu.memory_space<vmem>>, vector<32x32xf32>
    tpu.vector_store %arg7[%c0_6, %c0_7], %7 {strides = array<i32>} : memref<32x32xf32, #tpu.memory_space<vmem>>, vector<32x32xf32>,
    %c0_i32_8 = arith.constant 0 : i32
    %9 = arith.cmpi eq, %arg2, %c0_i32_8 : i32
    %10 = arith.extui %9 : i1 to i32
    %c0_i32_9 = arith.constant 0 : i32
    %11 = arith.cmpi ne, %10, %c0_i32_9 : i32
    scf.if %11 {
      %c0_10 = arith.constant 0 : index
      %c0_11 = arith.constant 0 : index
      %12 = vector.load %arg7[%c0_10, %c0_11] : memref<32x32xf32, #tpu.memory_space<vmem>>, vector<32x32xf32>
      %c0_12 = arith.constant 0 : index
      %c0_13 = arith.constant 0 : index
      %13 = vector.load %arg5[%c0_12, %c0_13] : memref<1x32xf32, #tpu.memory_space<vmem>>, vector<1x32xf32>
      %14 = vector.broadcast %13 : vector<1x32xf32> to vector<32x32xf32>
      %15 = arith.addf %12, %14 : vector<32x32xf32>
      %c0_14 = arith.constant 0 : index
      %c0_15 = arith.constant 0 : index
      %16 = vector.load %arg6[%c0_14, %c0_15] : memref<32x32xf32, #tpu.memory_space<vmem>>, vector<32x32xf32>
      tpu.vector_store %arg6[%c0_14, %c0_15], %15 {strides = array<i32>} : memref<32x32xf32, #tpu.memory_space<vmem>>, vector<32x32xf32>,
    } else {
    }
    return
  }
  func.func @transform_0(%arg0: i32, %arg1: i32, %arg2: i32) -> (i32, i32) {
    %c0_i32 = arith.constant 0 : i32
    return %arg0, %arg2 : i32, i32
  }
  func.func @transform_1(%arg0: i32, %arg1: i32, %arg2: i32) -> (i32, i32) {
    %c0_i32 = arith.constant 0 : i32
    return %arg2, %arg1 : i32, i32
  }
  func.func @transform_2(%arg0: i32, %arg1: i32, %arg2: i32) -> (i32, i32) {
    %c0_i32 = arith.constant 0 : i32
    %c0_i32_0 = arith.constant 0 : i32
    return %c0_i32, %arg1 : i32, i32
  }
  func.func @transform_3(%arg0: i32, %arg1: i32, %arg2: i32) -> (i32, i32) {
    %c0_i32 = arith.constant 0 : i32
    return %arg0, %arg1 : i32, i32
  }
}

module attributes {stable_mosaic.version = 11 : i64} {
  func.func @_encoder_layer_kernel(%arg0: i32, %arg1: memref<16x32xf32, #tpu.memory_space<vmem>>, %arg2: memref<32x32xf32, #tpu.memory_space<vmem>>, %arg3: memref<1x32xf32, #tpu.memory_space<vmem>>, %arg4: memref<32x32xf32, #tpu.memory_space<vmem>>, %arg5: memref<1x32xf32, #tpu.memory_space<vmem>>, %arg6: memref<32x32xf32, #tpu.memory_space<vmem>>, %arg7: memref<1x32xf32, #tpu.memory_space<vmem>>, %arg8: memref<32x32xf32, #tpu.memory_space<vmem>>, %arg9: memref<1x32xf32, #tpu.memory_space<vmem>>, %arg10: memref<1x32xf32, #tpu.memory_space<vmem>>, %arg11: memref<1x32xf32, #tpu.memory_space<vmem>>, %arg12: memref<32x64xf32, #tpu.memory_space<vmem>>, %arg13: memref<1x64xf32, #tpu.memory_space<vmem>>, %arg14: memref<64x32xf32, #tpu.memory_space<vmem>>, %arg15: memref<1x32xf32, #tpu.memory_space<vmem>>, %arg16: memref<1x32xf32, #tpu.memory_space<vmem>>, %arg17: memref<1x32xf32, #tpu.memory_space<vmem>>, %arg18: memref<16x32xf32, #tpu.memory_space<vmem>>) attributes {dimension_semantics = [#tpu.dimension_semantics<parallel>], iteration_bounds = array<i64: 2>, scalar_prefetch = 0 : i64, scratch_operands = 0 : i64, tpu.core_type = #tpu.core_type<tc>, window_params = [{transform_indices = @transform_0, window_bounds = array<i64: 16, 32>}, {pipeline_mode = #tpu.pipeline_mode<synchronous>, transform_indices = @transform_1, window_bounds = array<i64: 32, 32>}, {pipeline_mode = #tpu.pipeline_mode<synchronous>, transform_indices = @transform_2, window_bounds = array<i64: 1, 32>}, {pipeline_mode = #tpu.pipeline_mode<synchronous>, transform_indices = @transform_3, window_bounds = array<i64: 32, 32>}, {pipeline_mode = #tpu.pipeline_mode<synchronous>, transform_indices = @transform_4, window_bounds = array<i64: 1, 32>}, {pipeline_mode = #tpu.pipeline_mode<synchronous>, transform_indices = @transform_5, window_bounds = array<i64: 32, 32>}, {pipeline_mode = #tpu.pipeline_mode<synchronous>, transform_indices = @transform_6, window_bounds = array<i64: 1, 32>}, {pipeline_mode = #tpu.pipeline_mode<synchronous>, transform_indices = @transform_7, window_bounds = array<i64: 32, 32>}, {pipeline_mode = #tpu.pipeline_mode<synchronous>, transform_indices = @transform_8, window_bounds = array<i64: 1, 32>}, {pipeline_mode = #tpu.pipeline_mode<synchronous>, transform_indices = @transform_9, window_bounds = array<i64: 1, 32>}, {pipeline_mode = #tpu.pipeline_mode<synchronous>, transform_indices = @transform_10, window_bounds = array<i64: 1, 32>}, {pipeline_mode = #tpu.pipeline_mode<synchronous>, transform_indices = @transform_11, window_bounds = array<i64: 32, 64>}, {pipeline_mode = #tpu.pipeline_mode<synchronous>, transform_indices = @transform_12, window_bounds = array<i64: 1, 64>}, {pipeline_mode = #tpu.pipeline_mode<synchronous>, transform_indices = @transform_13, window_bounds = array<i64: 64, 32>}, {pipeline_mode = #tpu.pipeline_mode<synchronous>, transform_indices = @transform_14, window_bounds = array<i64: 1, 32>}, {pipeline_mode = #tpu.pipeline_mode<synchronous>, transform_indices = @transform_15, window_bounds = array<i64: 1, 32>}, {pipeline_mode = #tpu.pipeline_mode<synchronous>, transform_indices = @transform_16, window_bounds = array<i64: 1, 32>}, {transform_indices = @transform_17, window_bounds = array<i64: 16, 32>}]} {
    %c0 = arith.constant 0 : index
    %c0_0 = arith.constant 0 : index
    %0 = vector.load %arg1[%c0, %c0_0] : memref<16x32xf32, #tpu.memory_space<vmem>>, vector<16x32xf32>
    %c0_1 = arith.constant 0 : index
    %c0_2 = arith.constant 0 : index
    %1 = vector.load %arg2[%c0_1, %c0_2] : memref<32x32xf32, #tpu.memory_space<vmem>>, vector<32x32xf32>
    %cst = arith.constant dense<0.000000e+00> : vector<16x32xf32>
    %2 = tpu.matmul %0, %1, %cst {dimension_numbers = #tpu.dot_dimension_numbers<[1], [0], [0], [1], [0, 0, 1, 1], [], []>} : vector<16x32xf32>, vector<32x32xf32>, vector<16x32xf32> -> vector<16x32xf32>
    %c0_3 = arith.constant 0 : index
    %c0_4 = arith.constant 0 : index
    %3 = vector.load %arg3[%c0_3, %c0_4] : memref<1x32xf32, #tpu.memory_space<vmem>>, vector<1x32xf32>
    %4 = vector.broadcast %3 : vector<1x32xf32> to vector<16x32xf32>
    %5 = arith.addf %2, %4 : vector<16x32xf32>
    %c0_5 = arith.constant 0 : index
    %c0_6 = arith.constant 0 : index
    %6 = vector.load %arg4[%c0_5, %c0_6] : memref<32x32xf32, #tpu.memory_space<vmem>>, vector<32x32xf32>
    %cst_7 = arith.constant dense<0.000000e+00> : vector<16x32xf32>
    %7 = tpu.matmul %0, %6, %cst_7 {dimension_numbers = #tpu.dot_dimension_numbers<[1], [0], [0], [1], [0, 0, 1, 1], [], []>} : vector<16x32xf32>, vector<32x32xf32>, vector<16x32xf32> -> vector<16x32xf32>
    %c0_8 = arith.constant 0 : index
    %c0_9 = arith.constant 0 : index
    %8 = vector.load %arg5[%c0_8, %c0_9] : memref<1x32xf32, #tpu.memory_space<vmem>>, vector<1x32xf32>
    %9 = vector.broadcast %8 : vector<1x32xf32> to vector<16x32xf32>
    %10 = arith.addf %7, %9 : vector<16x32xf32>
    %c0_10 = arith.constant 0 : index
    %c0_11 = arith.constant 0 : index
    %11 = vector.load %arg6[%c0_10, %c0_11] : memref<32x32xf32, #tpu.memory_space<vmem>>, vector<32x32xf32>
    %cst_12 = arith.constant dense<0.000000e+00> : vector<16x32xf32>
    %12 = tpu.matmul %0, %11, %cst_12 {dimension_numbers = #tpu.dot_dimension_numbers<[1], [0], [0], [1], [0, 0, 1, 1], [], []>} : vector<16x32xf32>, vector<32x32xf32>, vector<16x32xf32> -> vector<16x32xf32>
    %c0_13 = arith.constant 0 : index
    %c0_14 = arith.constant 0 : index
    %13 = vector.load %arg7[%c0_13, %c0_14] : memref<1x32xf32, #tpu.memory_space<vmem>>, vector<1x32xf32>
    %14 = vector.broadcast %13 : vector<1x32xf32> to vector<16x32xf32>
    %15 = arith.addf %12, %14 : vector<16x32xf32>
    %cst_15 = arith.constant 0.000000e+00 : f32
    %16 = vector.broadcast %cst_15 : f32 to vector<16x32xf32>
    %17 = vector.extract_strided_slice %5 {offsets = [0, 0], sizes = [16, 8], strides = [1, 1]} : vector<16x32xf32> to vector<16x8xf32>
    %cst_16 = arith.constant 0.353553385 : f32
    %18 = vector.broadcast %cst_16 : f32 to vector<16x8xf32>
    %19 = arith.mulf %17, %18 : vector<16x8xf32>
    %20 = vector.extract_strided_slice %10 {offsets = [0, 0], sizes = [16, 8], strides = [1, 1]} : vector<16x32xf32> to vector<16x8xf32>
    %21 = vector.extract_strided_slice %15 {offsets = [0, 0], sizes = [16, 8], strides = [1, 1]} : vector<16x32xf32> to vector<16x8xf32>
    %cst_17 = arith.constant dense<0.000000e+00> : vector<16x16xf32>
    %22 = tpu.matmul %19, %20, %cst_17 {dimension_numbers = #tpu.dot_dimension_numbers<[1], [1], [0], [0], [0, 0, 1, 0], [], []>} : vector<16x8xf32>, vector<16x8xf32>, vector<16x16xf32> -> vector<16x16xf32>
    %cst_18 = arith.constant dense<0xFF800000> : vector<16xf32>
    %23 = vector.multi_reduction <maximumf>, %22, %cst_18 [1] : vector<16x16xf32> to vector<16xf32>
    %24 = vector.shape_cast %23 : vector<16xf32> to vector<16x1xf32>
    %25 = vector.broadcast %24 : vector<16x1xf32> to vector<16x16xf32>
    %26 = arith.subf %22, %25 : vector<16x16xf32>
    %27 = math.exp %26 : vector<16x16xf32>
    %cst_19 = arith.constant dense<0.000000e+00> : vector<16xf32>
    %28 = vector.multi_reduction <add>, %27, %cst_19 [1] : vector<16x16xf32> to vector<16xf32>
    %29 = vector.shape_cast %28 : vector<16xf32> to vector<16x1xf32>
    %30 = tpu.reciprocal %29 {approx = true} : vector<16x1xf32> -> vector<16x1xf32>
    %31 = vector.broadcast %30 : vector<16x1xf32> to vector<16x16xf32>
    %32 = arith.mulf %27, %31 : vector<16x16xf32>
    %cst_20 = arith.constant dense<0.000000e+00> : vector<16x8xf32>
    %33 = tpu.matmul %32, %21, %cst_20 {dimension_numbers = #tpu.dot_dimension_numbers<[1], [0], [0], [1], [0, 0, 1, 1], [], []>} : vector<16x16xf32>, vector<16x8xf32>, vector<16x8xf32> -> vector<16x8xf32>
    %c0_21 = arith.constant 0 : index
    %c0_22 = arith.constant 0 : index
    %34 = vector.load %arg8[%c0_21, %c0_22] : memref<32x32xf32, #tpu.memory_space<vmem>>, vector<8x32xf32>
    %cst_23 = arith.constant dense<0.000000e+00> : vector<16x32xf32>
    %35 = tpu.matmul %33, %34, %cst_23 {dimension_numbers = #tpu.dot_dimension_numbers<[1], [0], [0], [1], [0, 0, 1, 1], [], []>} : vector<16x8xf32>, vector<8x32xf32>, vector<16x32xf32> -> vector<16x32xf32>
    %36 = arith.addf %16, %35 : vector<16x32xf32>
    %37 = vector.extract_strided_slice %5 {offsets = [0, 8], sizes = [16, 8], strides = [1, 1]} : vector<16x32xf32> to vector<16x8xf32>
    %cst_24 = arith.constant 0.353553385 : f32
    %38 = vector.broadcast %cst_24 : f32 to vector<16x8xf32>
    %39 = arith.mulf %37, %38 : vector<16x8xf32>
    %40 = vector.extract_strided_slice %10 {offsets = [0, 8], sizes = [16, 8], strides = [1, 1]} : vector<16x32xf32> to vector<16x8xf32>
    %41 = vector.extract_strided_slice %15 {offsets = [0, 8], sizes = [16, 8], strides = [1, 1]} : vector<16x32xf32> to vector<16x8xf32>
    %cst_25 = arith.constant dense<0.000000e+00> : vector<16x16xf32>
    %42 = tpu.matmul %39, %40, %cst_25 {dimension_numbers = #tpu.dot_dimension_numbers<[1], [1], [0], [0], [0, 0, 1, 0], [], []>} : vector<16x8xf32>, vector<16x8xf32>, vector<16x16xf32> -> vector<16x16xf32>
    %cst_26 = arith.constant dense<0xFF800000> : vector<16xf32>
    %43 = vector.multi_reduction <maximumf>, %42, %cst_26 [1] : vector<16x16xf32> to vector<16xf32>
    %44 = vector.shape_cast %43 : vector<16xf32> to vector<16x1xf32>
    %45 = vector.broadcast %44 : vector<16x1xf32> to vector<16x16xf32>
    %46 = arith.subf %42, %45 : vector<16x16xf32>
    %47 = math.exp %46 : vector<16x16xf32>
    %cst_27 = arith.constant dense<0.000000e+00> : vector<16xf32>
    %48 = vector.multi_reduction <add>, %47, %cst_27 [1] : vector<16x16xf32> to vector<16xf32>
    %49 = vector.shape_cast %48 : vector<16xf32> to vector<16x1xf32>
    %50 = tpu.reciprocal %49 {approx = true} : vector<16x1xf32> -> vector<16x1xf32>
    %51 = vector.broadcast %50 : vector<16x1xf32> to vector<16x16xf32>
    %52 = arith.mulf %47, %51 : vector<16x16xf32>
    %cst_28 = arith.constant dense<0.000000e+00> : vector<16x8xf32>
    %53 = tpu.matmul %52, %41, %cst_28 {dimension_numbers = #tpu.dot_dimension_numbers<[1], [0], [0], [1], [0, 0, 1, 1], [], []>} : vector<16x16xf32>, vector<16x8xf32>, vector<16x8xf32> -> vector<16x8xf32>
    %c8 = arith.constant 8 : index
    %c0_29 = arith.constant 0 : index
    %54 = vector.load %arg8[%c8, %c0_29] : memref<32x32xf32, #tpu.memory_space<vmem>>, vector<8x32xf32>
    %cst_30 = arith.constant dense<0.000000e+00> : vector<16x32xf32>
    %55 = tpu.matmul %53, %54, %cst_30 {dimension_numbers = #tpu.dot_dimension_numbers<[1], [0], [0], [1], [0, 0, 1, 1], [], []>} : vector<16x8xf32>, vector<8x32xf32>, vector<16x32xf32> -> vector<16x32xf32>
    %56 = arith.addf %36, %55 : vector<16x32xf32>
    %57 = vector.extract_strided_slice %5 {offsets = [0, 16], sizes = [16, 8], strides = [1, 1]} : vector<16x32xf32> to vector<16x8xf32>
    %cst_31 = arith.constant 0.353553385 : f32
    %58 = vector.broadcast %cst_31 : f32 to vector<16x8xf32>
    %59 = arith.mulf %57, %58 : vector<16x8xf32>
    %60 = vector.extract_strided_slice %10 {offsets = [0, 16], sizes = [16, 8], strides = [1, 1]} : vector<16x32xf32> to vector<16x8xf32>
    %61 = vector.extract_strided_slice %15 {offsets = [0, 16], sizes = [16, 8], strides = [1, 1]} : vector<16x32xf32> to vector<16x8xf32>
    %cst_32 = arith.constant dense<0.000000e+00> : vector<16x16xf32>
    %62 = tpu.matmul %59, %60, %cst_32 {dimension_numbers = #tpu.dot_dimension_numbers<[1], [1], [0], [0], [0, 0, 1, 0], [], []>} : vector<16x8xf32>, vector<16x8xf32>, vector<16x16xf32> -> vector<16x16xf32>
    %cst_33 = arith.constant dense<0xFF800000> : vector<16xf32>
    %63 = vector.multi_reduction <maximumf>, %62, %cst_33 [1] : vector<16x16xf32> to vector<16xf32>
    %64 = vector.shape_cast %63 : vector<16xf32> to vector<16x1xf32>
    %65 = vector.broadcast %64 : vector<16x1xf32> to vector<16x16xf32>
    %66 = arith.subf %62, %65 : vector<16x16xf32>
    %67 = math.exp %66 : vector<16x16xf32>
    %cst_34 = arith.constant dense<0.000000e+00> : vector<16xf32>
    %68 = vector.multi_reduction <add>, %67, %cst_34 [1] : vector<16x16xf32> to vector<16xf32>
    %69 = vector.shape_cast %68 : vector<16xf32> to vector<16x1xf32>
    %70 = tpu.reciprocal %69 {approx = true} : vector<16x1xf32> -> vector<16x1xf32>
    %71 = vector.broadcast %70 : vector<16x1xf32> to vector<16x16xf32>
    %72 = arith.mulf %67, %71 : vector<16x16xf32>
    %cst_35 = arith.constant dense<0.000000e+00> : vector<16x8xf32>
    %73 = tpu.matmul %72, %61, %cst_35 {dimension_numbers = #tpu.dot_dimension_numbers<[1], [0], [0], [1], [0, 0, 1, 1], [], []>} : vector<16x16xf32>, vector<16x8xf32>, vector<16x8xf32> -> vector<16x8xf32>
    %c16 = arith.constant 16 : index
    %c0_36 = arith.constant 0 : index
    %74 = vector.load %arg8[%c16, %c0_36] : memref<32x32xf32, #tpu.memory_space<vmem>>, vector<8x32xf32>
    %cst_37 = arith.constant dense<0.000000e+00> : vector<16x32xf32>
    %75 = tpu.matmul %73, %74, %cst_37 {dimension_numbers = #tpu.dot_dimension_numbers<[1], [0], [0], [1], [0, 0, 1, 1], [], []>} : vector<16x8xf32>, vector<8x32xf32>, vector<16x32xf32> -> vector<16x32xf32>
    %76 = arith.addf %56, %75 : vector<16x32xf32>
    %77 = vector.extract_strided_slice %5 {offsets = [0, 24], sizes = [16, 8], strides = [1, 1]} : vector<16x32xf32> to vector<16x8xf32>
    %cst_38 = arith.constant 0.353553385 : f32
    %78 = vector.broadcast %cst_38 : f32 to vector<16x8xf32>
    %79 = arith.mulf %77, %78 : vector<16x8xf32>
    %80 = vector.extract_strided_slice %10 {offsets = [0, 24], sizes = [16, 8], strides = [1, 1]} : vector<16x32xf32> to vector<16x8xf32>
    %81 = vector.extract_strided_slice %15 {offsets = [0, 24], sizes = [16, 8], strides = [1, 1]} : vector<16x32xf32> to vector<16x8xf32>
    %cst_39 = arith.constant dense<0.000000e+00> : vector<16x16xf32>
    %82 = tpu.matmul %79, %80, %cst_39 {dimension_numbers = #tpu.dot_dimension_numbers<[1], [1], [0], [0], [0, 0, 1, 0], [], []>} : vector<16x8xf32>, vector<16x8xf32>, vector<16x16xf32> -> vector<16x16xf32>
    %cst_40 = arith.constant dense<0xFF800000> : vector<16xf32>
    %83 = vector.multi_reduction <maximumf>, %82, %cst_40 [1] : vector<16x16xf32> to vector<16xf32>
    %84 = vector.shape_cast %83 : vector<16xf32> to vector<16x1xf32>
    %85 = vector.broadcast %84 : vector<16x1xf32> to vector<16x16xf32>
    %86 = arith.subf %82, %85 : vector<16x16xf32>
    %87 = math.exp %86 : vector<16x16xf32>
    %cst_41 = arith.constant dense<0.000000e+00> : vector<16xf32>
    %88 = vector.multi_reduction <add>, %87, %cst_41 [1] : vector<16x16xf32> to vector<16xf32>
    %89 = vector.shape_cast %88 : vector<16xf32> to vector<16x1xf32>
    %90 = tpu.reciprocal %89 {approx = true} : vector<16x1xf32> -> vector<16x1xf32>
    %91 = vector.broadcast %90 : vector<16x1xf32> to vector<16x16xf32>
    %92 = arith.mulf %87, %91 : vector<16x16xf32>
    %cst_42 = arith.constant dense<0.000000e+00> : vector<16x8xf32>
    %93 = tpu.matmul %92, %81, %cst_42 {dimension_numbers = #tpu.dot_dimension_numbers<[1], [0], [0], [1], [0, 0, 1, 1], [], []>} : vector<16x16xf32>, vector<16x8xf32>, vector<16x8xf32> -> vector<16x8xf32>
    %c24 = arith.constant 24 : index
    %c0_43 = arith.constant 0 : index
    %94 = vector.load %arg8[%c24, %c0_43] : memref<32x32xf32, #tpu.memory_space<vmem>>, vector<8x32xf32>
    %cst_44 = arith.constant dense<0.000000e+00> : vector<16x32xf32>
    %95 = tpu.matmul %93, %94, %cst_44 {dimension_numbers = #tpu.dot_dimension_numbers<[1], [0], [0], [1], [0, 0, 1, 1], [], []>} : vector<16x8xf32>, vector<8x32xf32>, vector<16x32xf32> -> vector<16x32xf32>
    %96 = arith.addf %76, %95 : vector<16x32xf32>
    %c0_45 = arith.constant 0 : index
    %c0_46 = arith.constant 0 : index
    %97 = vector.load %arg9[%c0_45, %c0_46] : memref<1x32xf32, #tpu.memory_space<vmem>>, vector<1x32xf32>
    %98 = vector.broadcast %97 : vector<1x32xf32> to vector<16x32xf32>
    %99 = arith.addf %96, %98 : vector<16x32xf32>
    %100 = arith.addf %0, %99 : vector<16x32xf32>
    %cst_47 = arith.constant dense<0.000000e+00> : vector<16xf32>
    %101 = vector.multi_reduction <add>, %100, %cst_47 [1] : vector<16x32xf32> to vector<16xf32>
    %102 = vector.shape_cast %101 : vector<16xf32> to vector<16x1xf32>
    %cst_48 = arith.constant 3.200000e+01 : f32
    %103 = vector.broadcast %cst_48 : f32 to vector<16x1xf32>
    %104 = arith.divf %102, %103 : vector<16x1xf32>
    %105 = vector.broadcast %104 : vector<16x1xf32> to vector<16x32xf32>
    %106 = arith.subf %100, %105 : vector<16x32xf32>
    %107 = arith.mulf %106, %106 : vector<16x32xf32>
    %cst_49 = arith.constant dense<0.000000e+00> : vector<16xf32>
    %108 = vector.multi_reduction <add>, %107, %cst_49 [1] : vector<16x32xf32> to vector<16xf32>
    %109 = vector.shape_cast %108 : vector<16xf32> to vector<16x1xf32>
    %cst_50 = arith.constant 3.200000e+01 : f32
    %110 = vector.broadcast %cst_50 : f32 to vector<16x1xf32>
    %111 = arith.divf %109, %110 : vector<16x1xf32>
    %112 = vector.broadcast %104 : vector<16x1xf32> to vector<16x32xf32>
    %113 = arith.subf %100, %112 : vector<16x32xf32>
    %cst_51 = arith.constant 9.99999974E-6 : f32
    %114 = vector.broadcast %cst_51 : f32 to vector<16x1xf32>
    %115 = arith.addf %111, %114 : vector<16x1xf32>
    %116 = math.rsqrt %115 : vector<16x1xf32>
    %117 = vector.broadcast %116 : vector<16x1xf32> to vector<16x32xf32>
    %118 = arith.mulf %113, %117 : vector<16x32xf32>
    %c0_52 = arith.constant 0 : index
    %c0_53 = arith.constant 0 : index
    %119 = vector.load %arg10[%c0_52, %c0_53] : memref<1x32xf32, #tpu.memory_space<vmem>>, vector<1x32xf32>
    %120 = vector.broadcast %119 : vector<1x32xf32> to vector<16x32xf32>
    %121 = arith.mulf %118, %120 : vector<16x32xf32>
    %c0_54 = arith.constant 0 : index
    %c0_55 = arith.constant 0 : index
    %122 = vector.load %arg11[%c0_54, %c0_55] : memref<1x32xf32, #tpu.memory_space<vmem>>, vector<1x32xf32>
    %123 = vector.broadcast %122 : vector<1x32xf32> to vector<16x32xf32>
    %124 = arith.addf %121, %123 : vector<16x32xf32>
    %c0_56 = arith.constant 0 : index
    %c0_57 = arith.constant 0 : index
    %125 = vector.load %arg12[%c0_56, %c0_57] : memref<32x64xf32, #tpu.memory_space<vmem>>, vector<32x64xf32>
    %cst_58 = arith.constant dense<0.000000e+00> : vector<16x64xf32>
    %126 = tpu.matmul %124, %125, %cst_58 {dimension_numbers = #tpu.dot_dimension_numbers<[1], [0], [0], [1], [0, 0, 1, 1], [], []>} : vector<16x32xf32>, vector<32x64xf32>, vector<16x64xf32> -> vector<16x64xf32>
    %c0_59 = arith.constant 0 : index
    %c0_60 = arith.constant 0 : index
    %127 = vector.load %arg13[%c0_59, %c0_60] : memref<1x64xf32, #tpu.memory_space<vmem>>, vector<1x64xf32>
    %128 = vector.broadcast %127 : vector<1x64xf32> to vector<16x64xf32>
    %129 = arith.addf %126, %128 : vector<16x64xf32>
    %cst_61 = arith.constant 0.000000e+00 : f32
    %130 = vector.broadcast %cst_61 : f32 to vector<16x64xf32>
    %131 = arith.maximumf %129, %130 : vector<16x64xf32>
    %c0_62 = arith.constant 0 : index
    %c0_63 = arith.constant 0 : index
    %132 = vector.load %arg14[%c0_62, %c0_63] : memref<64x32xf32, #tpu.memory_space<vmem>>, vector<64x32xf32>
    %cst_64 = arith.constant dense<0.000000e+00> : vector<16x32xf32>
    %133 = tpu.matmul %131, %132, %cst_64 {dimension_numbers = #tpu.dot_dimension_numbers<[1], [0], [0], [1], [0, 0, 1, 1], [], []>} : vector<16x64xf32>, vector<64x32xf32>, vector<16x32xf32> -> vector<16x32xf32>
    %c0_65 = arith.constant 0 : index
    %c0_66 = arith.constant 0 : index
    %134 = vector.load %arg15[%c0_65, %c0_66] : memref<1x32xf32, #tpu.memory_space<vmem>>, vector<1x32xf32>
    %135 = vector.broadcast %134 : vector<1x32xf32> to vector<16x32xf32>
    %136 = arith.addf %133, %135 : vector<16x32xf32>
    %137 = arith.addf %124, %136 : vector<16x32xf32>
    %cst_67 = arith.constant dense<0.000000e+00> : vector<16xf32>
    %138 = vector.multi_reduction <add>, %137, %cst_67 [1] : vector<16x32xf32> to vector<16xf32>
    %139 = vector.shape_cast %138 : vector<16xf32> to vector<16x1xf32>
    %cst_68 = arith.constant 3.200000e+01 : f32
    %140 = vector.broadcast %cst_68 : f32 to vector<16x1xf32>
    %141 = arith.divf %139, %140 : vector<16x1xf32>
    %142 = vector.broadcast %141 : vector<16x1xf32> to vector<16x32xf32>
    %143 = arith.subf %137, %142 : vector<16x32xf32>
    %144 = arith.mulf %143, %143 : vector<16x32xf32>
    %cst_69 = arith.constant dense<0.000000e+00> : vector<16xf32>
    %145 = vector.multi_reduction <add>, %144, %cst_69 [1] : vector<16x32xf32> to vector<16xf32>
    %146 = vector.shape_cast %145 : vector<16xf32> to vector<16x1xf32>
    %cst_70 = arith.constant 3.200000e+01 : f32
    %147 = vector.broadcast %cst_70 : f32 to vector<16x1xf32>
    %148 = arith.divf %146, %147 : vector<16x1xf32>
    %149 = vector.broadcast %141 : vector<16x1xf32> to vector<16x32xf32>
    %150 = arith.subf %137, %149 : vector<16x32xf32>
    %cst_71 = arith.constant 9.99999974E-6 : f32
    %151 = vector.broadcast %cst_71 : f32 to vector<16x1xf32>
    %152 = arith.addf %148, %151 : vector<16x1xf32>
    %153 = math.rsqrt %152 : vector<16x1xf32>
    %154 = vector.broadcast %153 : vector<16x1xf32> to vector<16x32xf32>
    %155 = arith.mulf %150, %154 : vector<16x32xf32>
    %c0_72 = arith.constant 0 : index
    %c0_73 = arith.constant 0 : index
    %156 = vector.load %arg16[%c0_72, %c0_73] : memref<1x32xf32, #tpu.memory_space<vmem>>, vector<1x32xf32>
    %157 = vector.broadcast %156 : vector<1x32xf32> to vector<16x32xf32>
    %158 = arith.mulf %155, %157 : vector<16x32xf32>
    %c0_74 = arith.constant 0 : index
    %c0_75 = arith.constant 0 : index
    %159 = vector.load %arg17[%c0_74, %c0_75] : memref<1x32xf32, #tpu.memory_space<vmem>>, vector<1x32xf32>
    %160 = vector.broadcast %159 : vector<1x32xf32> to vector<16x32xf32>
    %161 = arith.addf %158, %160 : vector<16x32xf32>
    %c0_76 = arith.constant 0 : index
    %c0_77 = arith.constant 0 : index
    %162 = vector.load %arg18[%c0_76, %c0_77] : memref<16x32xf32, #tpu.memory_space<vmem>>, vector<16x32xf32>
    tpu.vector_store %arg18[%c0_76, %c0_77], %161 {strides = array<i32>} : memref<16x32xf32, #tpu.memory_space<vmem>>, vector<16x32xf32>,
    return
  }
  func.func @transform_0(%arg0: i32) -> (i32, i32) {
    %c0_i32 = arith.constant 0 : i32
    %c0_i32_0 = arith.constant 0 : i32
    return %arg0, %c0_i32 : i32, i32
  }
  func.func @transform_1(%arg0: i32) -> (i32, i32) {
    %c0_i32 = arith.constant 0 : i32
    %c0_i32_0 = arith.constant 0 : i32
    %c0_i32_1 = arith.constant 0 : i32
    return %c0_i32, %c0_i32_0 : i32, i32
  }
  func.func @transform_2(%arg0: i32) -> (i32, i32) {
    %c0_i32 = arith.constant 0 : i32
    %c0_i32_0 = arith.constant 0 : i32
    %c0_i32_1 = arith.constant 0 : i32
    return %c0_i32, %c0_i32_0 : i32, i32
  }
  func.func @transform_3(%arg0: i32) -> (i32, i32) {
    %c0_i32 = arith.constant 0 : i32
    %c0_i32_0 = arith.constant 0 : i32
    %c0_i32_1 = arith.constant 0 : i32
    return %c0_i32, %c0_i32_0 : i32, i32
  }
  func.func @transform_4(%arg0: i32) -> (i32, i32) {
    %c0_i32 = arith.constant 0 : i32
    %c0_i32_0 = arith.constant 0 : i32
    %c0_i32_1 = arith.constant 0 : i32
    return %c0_i32, %c0_i32_0 : i32, i32
  }
  func.func @transform_5(%arg0: i32) -> (i32, i32) {
    %c0_i32 = arith.constant 0 : i32
    %c0_i32_0 = arith.constant 0 : i32
    %c0_i32_1 = arith.constant 0 : i32
    return %c0_i32, %c0_i32_0 : i32, i32
  }
  func.func @transform_6(%arg0: i32) -> (i32, i32) {
    %c0_i32 = arith.constant 0 : i32
    %c0_i32_0 = arith.constant 0 : i32
    %c0_i32_1 = arith.constant 0 : i32
    return %c0_i32, %c0_i32_0 : i32, i32
  }
  func.func @transform_7(%arg0: i32) -> (i32, i32) {
    %c0_i32 = arith.constant 0 : i32
    %c0_i32_0 = arith.constant 0 : i32
    %c0_i32_1 = arith.constant 0 : i32
    return %c0_i32, %c0_i32_0 : i32, i32
  }
  func.func @transform_8(%arg0: i32) -> (i32, i32) {
    %c0_i32 = arith.constant 0 : i32
    %c0_i32_0 = arith.constant 0 : i32
    %c0_i32_1 = arith.constant 0 : i32
    return %c0_i32, %c0_i32_0 : i32, i32
  }
  func.func @transform_9(%arg0: i32) -> (i32, i32) {
    %c0_i32 = arith.constant 0 : i32
    %c0_i32_0 = arith.constant 0 : i32
    %c0_i32_1 = arith.constant 0 : i32
    return %c0_i32, %c0_i32_0 : i32, i32
  }
  func.func @transform_10(%arg0: i32) -> (i32, i32) {
    %c0_i32 = arith.constant 0 : i32
    %c0_i32_0 = arith.constant 0 : i32
    %c0_i32_1 = arith.constant 0 : i32
    return %c0_i32, %c0_i32_0 : i32, i32
  }
  func.func @transform_11(%arg0: i32) -> (i32, i32) {
    %c0_i32 = arith.constant 0 : i32
    %c0_i32_0 = arith.constant 0 : i32
    %c0_i32_1 = arith.constant 0 : i32
    return %c0_i32, %c0_i32_0 : i32, i32
  }
  func.func @transform_12(%arg0: i32) -> (i32, i32) {
    %c0_i32 = arith.constant 0 : i32
    %c0_i32_0 = arith.constant 0 : i32
    %c0_i32_1 = arith.constant 0 : i32
    return %c0_i32, %c0_i32_0 : i32, i32
  }
  func.func @transform_13(%arg0: i32) -> (i32, i32) {
    %c0_i32 = arith.constant 0 : i32
    %c0_i32_0 = arith.constant 0 : i32
    %c0_i32_1 = arith.constant 0 : i32
    return %c0_i32, %c0_i32_0 : i32, i32
  }
  func.func @transform_14(%arg0: i32) -> (i32, i32) {
    %c0_i32 = arith.constant 0 : i32
    %c0_i32_0 = arith.constant 0 : i32
    %c0_i32_1 = arith.constant 0 : i32
    return %c0_i32, %c0_i32_0 : i32, i32
  }
  func.func @transform_15(%arg0: i32) -> (i32, i32) {
    %c0_i32 = arith.constant 0 : i32
    %c0_i32_0 = arith.constant 0 : i32
    %c0_i32_1 = arith.constant 0 : i32
    return %c0_i32, %c0_i32_0 : i32, i32
  }
  func.func @transform_16(%arg0: i32) -> (i32, i32) {
    %c0_i32 = arith.constant 0 : i32
    %c0_i32_0 = arith.constant 0 : i32
    %c0_i32_1 = arith.constant 0 : i32
    return %c0_i32, %c0_i32_0 : i32, i32
  }
  func.func @transform_17(%arg0: i32) -> (i32, i32) {
    %c0_i32 = arith.constant 0 : i32
    %c0_i32_0 = arith.constant 0 : i32
    return %arg0, %c0_i32 : i32, i32
  }
}

module attributes {stable_mosaic.version = 11 : i64} {
  func.func @_mean_pool_kernel(%arg0: memref<2x16x32xf32, #tpu.memory_space<vmem>>, %arg1: memref<2x32xf32, #tpu.memory_space<vmem>>) attributes {dimension_semantics = [], scalar_prefetch = 0 : i64, scratch_operands = 0 : i64, tpu.core_type = #tpu.core_type<tc>} {
    %c0 = arith.constant 0 : index
    %c0_0 = arith.constant 0 : index
    %c0_1 = arith.constant 0 : index
    %0 = vector.load %arg0[%c0, %c0_0, %c0_1] : memref<2x16x32xf32, #tpu.memory_space<vmem>>, vector<2x16x32xf32>
    %cst = arith.constant dense<0.000000e+00> : vector<2x32xf32>
    %1 = vector.multi_reduction <add>, %0, %cst [1] : vector<2x16x32xf32> to vector<2x32xf32>
    %cst_2 = arith.constant 1.600000e+01 : f32
    %2 = vector.broadcast %cst_2 : f32 to vector<2x32xf32>
    %3 = arith.divf %1, %2 : vector<2x32xf32>
    %c0_3 = arith.constant 0 : index
    %c0_4 = arith.constant 0 : index
    %4 = vector.load %arg1[%c0_3, %c0_4] : memref<2x32xf32, #tpu.memory_space<vmem>>, vector<2x32xf32>
    tpu.vector_store %arg1[%c0_3, %c0_4], %3 {strides = array<i32>} : memref<2x32xf32, #tpu.memory_space<vmem>>, vector<2x32xf32>,
    return
  }
}

</mosaic_0001>

<bundles_post_ra>
// kernel: cnn_transformer_forward.9
= control target key start
LH: loop header
LB: loop body
LE: loop exit
PB: predicated region body
PF: predicated region fallthrough
CT: control target
= control target key end

     0   :  { %s362_s6 = smov 0   ;;  %s364_s7 = smov 0   ;;  %s418_s0 = inlined_call_operand.vmem [shape: f32[2,16,9,16], index: 0, kind: input, shape index: {}]   ;;  %s419_s1 = inlined_call_operand.vmem [shape: f32[2,8,8,8], index: 1, kind: output, shape index: {}]  }
   0x1   :  { %s366_s8 = smov 0   ;;  %s368_s9 = smov 0  }
   0x2   :  { %s370_s10 = smov 0  }
   0x3 LB: > { %s20_s11 = sadd.s32 1, %s341_s8  ;;  %s23_s12 = sadd.s32 1, %s345_s9  ;;  %s349_s10 = sphi %s370_s10, %s11_s10   ;;  %s345_s9 = sphi %s368_s9, %s423_s9   ;;  %s341_s8 = sphi %s366_s8, %s422_s8   ;;  %s337_s7 = sphi %s364_s7, %s421_s7   ;;  %s333_s6 = sphi %s362_s6, %s420_s6  }
   0x4   : > { %p21_p0 = scmp.ge.s32.totalorder %s20_s11, 8  ;;  %p260_p1 = scmp.ge.s32.totalorder %s349_s10, 1 }
   0x5   : > { %p109_p2 = scmp.lt.s32.totalorder %s349_s10, 17 }
   0x6   : > { %s425_s11 = smov (%p21_p0, %s20_s11), 0  ;;  %s427_s12 = smov (!%p21_p0, %s23_s12), %s345_s9 }
   0x7   : > { %p110_p3 = pnand %p260_p1, %p109_p2  ;;  %p25_p4 = scmp.ge.s32.totalorder %s427_s12, 2 }
   0x8   : > { %s261_s13 = sshll.u32 (!%p110_p3), %s333_s6, 1  ;;  %p138_p5 = scmp.lt.s32.totalorder (!%p110_p3), %s337_s7, 1 }
   0x9   : > { %s429_s12 = smov (%p25_p4, %s427_s12), 0  ;;  %113 = sbr.rel (%p110_p3) target bundleno = 140 (0x8c), region = 24 }
   0xa   : > { %p140_p6 = scmp.lt.s32.totalorder (!%p110_p3), %s261_s13, 15  ;;  %s351_s21 = smov (!%p110_p3), 120  }
   0xb   : > { %p150_p7 = scmp.lt.s32.totalorder (!%p110_p3), %s333_s6, 7 }
   0xe   : > { %s431_s7 = smov (!%p138_p5, %s337_s7), 1  ;;  %s433_s13 = smov (!%p140_p6, %s261_s13), 15  ;;  %vm165_vm0 = vcmask 64512  }
   0xf   : > { %s263_s14 = sshll.u32 %s431_s7, 5  ;;  %s262_s15 = sshll.u32 %s433_s13, 1 }
  0x10   : > { %s144_s16 = sadd.s32 %s263_s14, %s262_s15  ;;  %s435_s6 = smov (!%p150_p7, %s333_s6), 7 }
  0x11   : > { %s264_s17 = sshll.u32 %s144_s16, 3  ;;  %s265_s22 = sshll.u32 %s431_s7, 3 }
  0x12   : > { %s146_s20 = scalar_lea.vmem %s418_s0, %s264_s17  ;;  %s153_s23 = sadd.s32 %s265_s22, %s435_s6 }
  0x13   : > { %v156_v0 = vld [vmem:[%s146_s20] sm:$0xff]  ;;  %v267_v1 = vld [vmem:[%s146_s20 + $0x10] sm:$0xff]  ;;  %s266_s24 = sshll.u32 %s153_s23, 3 }
  0x14   : > { %v159_v2 = vmax.f32 %v156_v0, %v267_v1  ;;  %s155_s27 = scalar_lea.vmem %s419_s1, %s266_s24 }
  0x16   : > { %161 = vrot.lane.b32.xlu0 %v159_v2, %s351_s21 }
  0x88   : > { %v162_v3 = vpop.permute.xlu0 %161 }
  0x89   : > { %v164_v4 = vmax.f32 %v159_v2, %v162_v3 }
  0x8b   : > { %166 = vst.msk [vmem:[%s155_s27] sm:$0xff] %vm165_vm0, %v164_v4 }
  0x8c PF: > { %s11_s10 = sadd.s32 1, %s349_s10   ;;  %s420_s6 = smov %s341_s8 }
  0x8d   : > { %p8_p8 = scmp.ge.s32.totalorder %s11_s10, 18   ;;  %s421_s7 = smov %s345_s9 }
  0x8e   : > { %s422_s8 = smov %s425_s11  ;;  %s423_s9 = smov %s429_s12 }
  0x8f   :  { %10 = sbr.rel (!%p8_p8) target bundleno = 3 (0x3), region = 55 }

// kernel: cnn_transformer_forward.11
= control target key start
LH: loop header
LB: loop body
LE: loop exit
PB: predicated region body
PF: predicated region fallthrough
CT: control target
= control target key end

     0   :  { %s355_s6 = smov 0   ;;  %s357_s7 = smov 0   ;;  %s411_s0 = inlined_call_operand.vmem [shape: f32[2,8,5,16], index: 0, kind: input, shape index: {}]   ;;  %s412_s1 = inlined_call_operand.vmem [shape: f32[2,4,4,8], index: 1, kind: output, shape index: {}]  }
   0x1   :  { %s359_s8 = smov 0   ;;  %s361_s9 = smov 0  }
   0x2   :  { %s363_s10 = smov 0  }
   0x3 LB: > { %s20_s11 = sadd.s32 1, %s334_s8  ;;  %s23_s12 = sadd.s32 1, %s338_s9  ;;  %s342_s10 = sphi %s363_s10, %s11_s10   ;;  %s338_s9 = sphi %s361_s9, %s416_s9   ;;  %s334_s8 = sphi %s359_s8, %s415_s8   ;;  %s330_s7 = sphi %s357_s7, %s414_s7   ;;  %s326_s6 = sphi %s355_s6, %s413_s6  }
   0x4   : > { %p21_p0 = scmp.ge.s32.totalorder %s20_s11, 4  ;;  %p254_p1 = scmp.ge.s32.totalorder %s342_s10, 1 }
   0x5   : > { %p108_p2 = scmp.lt.s32.totalorder %s342_s10, 9 }
   0x6   : > { %s418_s11 = smov (%p21_p0, %s20_s11), 0  ;;  %s420_s12 = smov (!%p21_p0, %s23_s12), %s338_s9 }
   0x7   : > { %p109_p3 = pnand %p254_p1, %p108_p2  ;;  %p25_p4 = scmp.ge.s32.totalorder %s420_s12, 2 }
   0x8   : > { %s255_s13 = sshll.u32 (!%p109_p3), %s326_s6, 1  ;;  %p136_p5 = scmp.lt.s32.totalorder (!%p109_p3), %s330_s7, 1 }
   0x9   : > { %s422_s12 = smov (%p25_p4, %s420_s12), 0  ;;  %112 = sbr.rel (%p109_p3) target bundleno = 140 (0x8c), region = 24 }
   0xa   : > { %p138_p6 = scmp.lt.s32.totalorder (!%p109_p3), %s255_s13, 7  ;;  %s344_s20 = smov (!%p109_p3), 120  }
   0xb   : > { %p147_p7 = scmp.lt.s32.totalorder (!%p109_p3), %s326_s6, 3 }
   0xe   : > { %s424_s7 = smov (!%p136_p5, %s330_s7), 1  ;;  %s426_s13 = smov (!%p138_p6, %s255_s13), 7  ;;  %vm162_vm0 = vcmask 60416  }
   0xf   : > { %s256_s14 = sshll.u32 %s424_s7, 3  ;;  %s428_s6 = smov (!%p147_p7, %s326_s6), 3 }
  0x10   : > { %s141_s15 = sadd.s32 %s256_s14, %s426_s13  ;;  %s258_s21 = sshll.u32 %s424_s7, 2 }
  0x11   : > { %s257_s16 = sshll.u32 %s141_s15, 3  ;;  %s150_s22 = sadd.s32 %s258_s21, %s428_s6 }
  0x12   : > { %s143_s19 = scalar_lea.vmem %s411_s0, %s257_s16  ;;  %s259_s23 = sshll.u32 %s150_s22, 2 }
  0x13   : > { %v153_v0 = vld [vmem:[%s143_s19] sm:$0x1f]  ;;  %v260_v1 = vld [vmem:[%s143_s19 + $0x8] sm:$0x1f]  ;;  %s152_s26 = scalar_lea.vmem %s412_s1, %s259_s23 }
  0x14   : > { %v156_v2 = vmax.f32 %v153_v0, %v260_v1 }
  0x16   : > { %158 = vrot.lane.b32.xlu0 %v156_v2, %s344_s20 }
  0x88   : > { %v159_v3 = vpop.permute.xlu0 %158 }
  0x89   : > { %v161_v4 = vmax.f32 %v156_v2, %v159_v3 }
  0x8b   : > { %163 = vst.msk [vmem:[%s152_s26] sm:$0xf] %vm162_vm0, %v161_v4 }
  0x8c PF: > { %s11_s10 = sadd.s32 1, %s342_s10   ;;  %s413_s6 = smov %s334_s8 }
  0x8d   : > { %p8_p8 = scmp.ge.s32.totalorder %s11_s10, 10   ;;  %s414_s7 = smov %s338_s9 }
  0x8e   : > { %s415_s8 = smov %s418_s11  ;;  %s416_s9 = smov %s422_s12 }
  0x8f   :  { %10 = sbr.rel (!%p8_p8) target bundleno = 3 (0x3), region = 55 }

// kernel: cnn_transformer_forward.12
= control target key start
LH: loop header
LB: loop body
LE: loop exit
PB: predicated region body
PF: predicated region fallthrough
CT: control target
= control target key end

     0   :  { %vm32_vm0 = vcmask 64512   ;;  %vm18_vm1 = vcmask 261120   ;;  %v115_v3 = vmov 0.0   ;;  %s182_s1 = inlined_call_operand.vmem [shape: f32[8,32], index: 1, kind: input, shape index: {}]   ;;  %s183_s0 = inlined_call_operand.vmem [shape: f32[32,8], index: 0, kind: input, shape index: {}]   ;;  %s184_s2 = inlined_call_operand.vmem [shape: f32[1,32], index: 2, kind: input, shape index: {}]   ;;  %s185_s3 = inlined_call_operand.vmem [shape: f32[32,32], index: 3, kind: output, shape index: {}]  }
   0x1   :  { %v31_v0 = vld [vmem:[%s182_s1] sm:$0xff]  ;;  %v29_v1 = vld [vmem:[%s183_s0 + $0x10] sm:$0xff]  ;;  %v30_v2 = vld [vmem:[%s183_s0 + $0x18] sm:$0xff]  ;;  %19 = vst.msk [vmem:[#allocation2] sm:$0xff] %vm18_vm1, %v115_v3 }
   0x2   :  { %111 = vmatpush.msra.mxu2 %v31_v0  ;;  %112 = vmatpush.msra.mxu3 %v31_v0  ;;  %v27_v4 = vld [vmem:[%s183_s0] sm:$0xff]  ;;  %v28_v5 = vld [vmem:[%s183_s0 + $0x8] sm:$0xff]  ;;  %20 = vst.msk [vmem:[#allocation2 + $0x8] sm:$0xff] %vm18_vm1, %v115_v3 }
   0x3   :  { %108 = vmatmul.msk.f32.vlgmr.msra.gmra.mxu2 %vm32_vm0, %v29_v1  ;;  %109 = vmatmul.msk.f32.vlgmr.msra.gmra.mxu3 %vm32_vm0, %v30_v2  ;;  %21 = vst.msk [vmem:[#allocation2 + $0x10] sm:$0xff] %vm18_vm1, %v115_v3  ;;  %v114_v18 = vld [vmem:[%s184_s2] ss:$0 sm:$0xff] }
   0x4   :  { %60 = vmatpush.msra.mxu0 %v31_v0  ;;  %110 = vmatpush.msra.mxu1 %v31_v0  ;;  %22 = vst.msk [vmem:[#allocation2 + $0x18] sm:$0xff] %vm18_vm1, %v115_v3 }
   0x5   :  { %106 = vmatmul.msk.f32.vlgmr.msra.gmra.mxu0 %vm32_vm0, %v27_v4  ;;  %107 = vmatmul.msk.f32.vlgmr.msra.gmra.mxu1 %vm32_vm0, %v28_v5 }
   0x8   :  { %v23_v6 = vld [vmem:[#allocation2] sm:$0xff] }
   0x9   :  { %v24_v7 = vld [vmem:[#allocation2 + $0x8] sm:$0xff] }
   0xa   :  { %v25_v12 = vld [vmem:[#allocation2 + $0x10] sm:$0xff] }
   0xb   :  { %v26_v13 = vld [vmem:[#allocation2 + $0x18] sm:$0xff] }
  0x82   :  { %v62_v8 = vpop.f32.mrf.mxu0  ;;  %v65_v9 = vpop.f32.mrf.mxu1 }
  0x83   :  { %v74_v10 = vadd.f32 %v62_v8, %v23_v6  ;;  %v75_v11 = vadd.f32 %v65_v9, %v24_v7 }
  0x85   :  { %79 = vst.msk [vmem:[#allocation2] sm:$0xff] %vm18_vm1, %v74_v10 }
  0x86   :  { %80 = vst.msk [vmem:[#allocation2 + $0x8] sm:$0xff] %vm18_vm1, %v75_v11  ;;  %v68_v14 = vpop.f32.mrf.mxu2  ;;  %v71_v15 = vpop.f32.mrf.mxu3 }
  0x87   :  { %v76_v16 = vadd.f32 %v68_v14, %v25_v12  ;;  %v77_v17 = vadd.f32 %v71_v15, %v26_v13 }
  0x89   :  { %81 = vst.msk [vmem:[#allocation2 + $0x10] sm:$0xff] %vm18_vm1, %v76_v16 }
  0x8a   :  { %82 = vst.msk [vmem:[#allocation2 + $0x18] sm:$0xff] %vm18_vm1, %v77_v17 }
  0x8c   :  { %v86_v19 = vld [vmem:[#allocation2] sm:$0xff] }
  0x8d   :  { %v94_v20 = vadd.f32 %v114_v18, %v86_v19  ;;  %v87_v21 = vld [vmem:[#allocation2 + $0x8] sm:$0xff] }
  0x8e   :  { %v95_v22 = vadd.f32 %v114_v18, %v87_v21 }
  0x8f   :  { %98 = vst.msk [vmem:[%s185_s3] sm:$0xff] %vm18_vm1, %v94_v20 }
  0x90   :  { %99 = vst.msk [vmem:[%s185_s3 + $0x8] sm:$0xff] %vm18_vm1, %v95_v22  ;;  %v88_v23 = vld [vmem:[#allocation2 + $0x10] sm:$0xff] }
  0x91   :  { %v96_v24 = vadd.f32 %v114_v18, %v88_v23  ;;  %v89_v25 = vld [vmem:[#allocation2 + $0x18] sm:$0xff] }
  0x92   :  { %v97_v26 = vadd.f32 %v114_v18, %v89_v25 }
  0x93   :  { %100 = vst.msk [vmem:[%s185_s3 + $0x10] sm:$0xff] %vm18_vm1, %v96_v24 }
  0x94   :  { %101 = vst.msk [vmem:[%s185_s3 + $0x18] sm:$0xff] %vm18_vm1, %v97_v26 }

// kernel: cnn_transformer_forward.10
= control target key start
LH: loop header
LB: loop body
LE: loop exit
PB: predicated region body
PF: predicated region fallthrough
CT: control target
= control target key end

     0   :  { %s1280_s12 = smov 0   ;;  %s1580_s0 = inlined_call_operand.vmem [shape: f32[2,110,8], index: 0, kind: input, shape index: {}]   ;;  %s1581_s1 = inlined_call_operand.vmem [shape: f32[9,8,8], index: 1, kind: input, shape index: {}]   ;;  %s1582_s2 = inlined_call_operand.vmem [shape: f32[1,8], index: 2, kind: input, shape index: {}]   ;;  %s1583_s3 = inlined_call_operand.vmem [shape: f32[2,80,8], index: 3, kind: output, shape index: {}]  }
   0x1 LB: > { %s1131_s13 = sadd.s32 4294967295, %s1258_s12   ;;  %p1135_p0 = scmp.ge.s32.totalorder %s1258_s12, 1  ;;  %s1258_s12 = sphi %s1280_s12, %s13_s12  }
   0x2   : > { %p137_p1 = scmp.lt.s32.totalorder %s1258_s12, 3 }
   0x4   : > { %p138_p2 = pnand %p1135_p0, %p137_p1 }
   0x5   : > { %p161_p3 = scmp.lt.s32.totalorder (!%p138_p2), %s1131_s13, 1 }
   0x6   : > { %141 = sbr.rel (%p138_p2) target bundleno = 334 (0x14e), region = 32 }
   0xb   : > { %v1138_v0 = vld [vmem:[%s1581_s1 + $0x8] sm:$0xff]  ;;  %v1170_v1 = vld [vmem:[%s1581_s1 + $0x18] sm:$0xff]  ;;  %v181_v2 = vld [vmem:[%s1581_s1] sm:$0xff]  ;;  %s1585_s13 = smov (!%p161_p3, %s1131_s13), 1  ;;  %vm194_vm0 = vcmask 64512  }
   0xc   : > { %1238 = vmatpush.msra.mxu1 %v1138_v0  ;;  %1240 = vmatpush.msra.mxu3 %v1138_v0  ;;  %v1181_v3 = vld [vmem:[%s1581_s1 + $0x20] sm:$0xff]  ;;  %v1159_v4 = vld [vmem:[%s1581_s1 + $0x10] sm:$0xff]  ;;  %s1241_s24 = smul.u32 112, %s1585_s13  ;;  %v1214_v6 = vld [vmem:[%s1581_s1 + $0x38] sm:$0xff] }
   0xd   : > { %240 = vmatpush.msra.mxu0 %v1138_v0  ;;  %1239 = vmatpush.msra.mxu2 %v1138_v0  ;;  %v1203_v5 = vld [vmem:[%s1581_s1 + $0x30] sm:$0xff]  ;;  %v1192_v11 = vld [vmem:[%s1581_s1 + $0x28] sm:$0xff]  ;;  %v1225_v12 = vld [vmem:[%s1581_s1 + $0x40] sm:$0xff]  ;;  %s1242_s11 = smul.u32 80, %s1585_s13 }
   0xe   : > { %505 = vmatpush.msrb.mxu3 %v1170_v1  ;;  %317 = vmatpush.msrb.mxu1 %v181_v2  ;;  %s1309_s27 = scalar_lea.vmem %s1580_s0, %s1241_s24 }
   0xf   : > { %604 = vmatpush.msrb.mxu0 %v1181_v3  ;;  %406 = vmatpush.msrb.mxu2 %v1159_v4  ;;  %v185_v7 = vld [vmem:[%s1309_s27 + $0x19] sm:$0xff]  ;;  %v182_v9 = vld [vmem:[%s1309_s27 + $0x1] sm:$0xff]  ;;  %v188_v10 = vld [vmem:[%s1309_s27 + $0x31] sm:$0xff]  ;;  %s1538_s16 = scalar_lea.vmem %s1583_s3, %s1242_s11 }
  0x10   : > { %v189_v8 = vld [vmem:[%s1309_s27 + $0x39] sm:$0xff]  ;;  %1142 = vmatmul.msk.f32.vlgmr.msra.gmra.mxu1 %vm194_vm0, %v185_v7  ;;  %1139 = vmatmul.msk.f32.vlgmr.msra.gmra.mxu0 %vm194_vm0, %v182_v9  ;;  %v186_v13 = vld [vmem:[%s1309_s27 + $0x21] sm:$0xff]  ;;  %v183_v15 = vld [vmem:[%s1309_s27 + $0x9] sm:$0xff] }
  0x11   : > { %1146 = vmatmul.msk.f32.vlgmr.msra.gmra.mxu3 %vm194_vm0, %v189_v8  ;;  %1145 = vmatmul.msk.f32.vlgmr.msra.gmra.mxu2 %vm194_vm0, %v188_v10  ;;  %v190_v14 = vld [vmem:[%s1309_s27 + $0x41] sm:$0xff]  ;;  %v187_v17 = vld [vmem:[%s1309_s27 + $0x29] sm:$0xff]  ;;  %v184_v19 = vld [vmem:[%s1309_s27 + $0x11] sm:$0xff] }
  0x12   : > { %802 = vmatpush.msra.mxu2 %v1203_v5  ;;  %901 = vmatpush.msra.mxu3 %v1214_v6  ;;  %v349_v16 = vld [vmem:[%s1309_s27 + $0x2] sm:$0xff]  ;;  %v448_v20 = vld [vmem:[%s1309_s27 + $0xa] sm:$0xff]  ;;  %v449_v23 = vld [vmem:[%s1309_s27 + $0x12] sm:$0xff] }
  0x13   : > { %703 = vmatpush.msra.mxu1 %v1192_v11  ;;  %1000 = vmatpush.msra.mxu0 %v1225_v12  ;;  %v191_v18 = vld [vmem:[%s1309_s27 + $0x49] sm:$0xff]  ;;  %v171_v21 = vld [vmem:[%s1309_s27] sm:$0xff]  ;;  %v548_v25 = vld [vmem:[%s1309_s27 + $0x13] sm:$0xff] }
  0x14   : > { %v547_v22 = vld [vmem:[%s1309_s27 + $0xb] sm:$0xff]  ;;  %v450_v26 = vld [vmem:[%s1309_s27 + $0x1a] sm:$0xff]  ;;  %v451_v29 = vld [vmem:[%s1309_s27 + $0x22] sm:$0xff] }
  0x15   : > { %v172_v24 = vld [vmem:[%s1309_s27 + $0x8] sm:$0xff]  ;;  %v173_v27 = vld [vmem:[%s1309_s27 + $0x10] sm:$0xff]  ;;  %v549_v28 = vld [vmem:[%s1309_s27 + $0x1b] sm:$0xff] }
  0x16   : > { %v174_v30 = vld [vmem:[%s1309_s27 + $0x18] sm:$0xff]  ;;  %v550_v31 = vld [vmem:[%s1309_s27 + $0x23] sm:$0xff]  ;;  %v551_v34 = vld [vmem:[%s1309_s27 + $0x2b] sm:$0xff] }
  0x17   : > { %v452_v32 = vld [vmem:[%s1309_s27 + $0x2a] sm:$0xff]  ;;  %v175_v33 = vld [vmem:[%s1309_s27 + $0x20] sm:$0xff]  ;;  %v453_v35 = vld [vmem:[%s1309_s27 + $0x32] sm:$0xff] }
  0x18   : > { %1143 = vmatmul.msk.f32.gmra.mxu1 %vm194_vm0, %v186_v13  ;;  %1140 = vmatmul.msk.f32.gmra.mxu0 %vm194_vm0, %v183_v15  ;;  %v176_v36 = vld [vmem:[%s1309_s27 + $0x28] sm:$0xff]  ;;  %v552_v37 = vld [vmem:[%s1309_s27 + $0x33] sm:$0xff]  ;;  %v553_v40 = vld [vmem:[%s1309_s27 + $0x3b] sm:$0xff] }
  0x19   : > { %1147 = vmatmul.msk.f32.gmra.mxu3 %vm194_vm0, %v190_v14  ;;  %1160 = vmatmul.msk.f32.vlgmr.msrb.gmra.mxu2 %vm194_vm0, %v349_v16  ;;  %v454_v38 = vld [vmem:[%s1309_s27 + $0x3a] sm:$0xff]  ;;  %v177_v39 = vld [vmem:[%s1309_s27 + $0x30] sm:$0xff]  ;;  %v455_v41 = vld [vmem:[%s1309_s27 + $0x42] sm:$0xff] }
  0x1a   : > { %v178_v42 = vld [vmem:[%s1309_s27 + $0x38] sm:$0xff]  ;;  %v554_v43 = vld [vmem:[%s1309_s27 + $0x43] sm:$0xff]  ;;  %v555_v46 = vld [vmem:[%s1309_s27 + $0x4b] sm:$0xff] }
  0x1b   : > { %v456_v44 = vld [vmem:[%s1309_s27 + $0x4a] sm:$0xff]  ;;  %v179_v45 = vld [vmem:[%s1309_s27 + $0x40] sm:$0xff]  ;;  %v745_v47 = vld [vmem:[%s1309_s27 + $0x14] sm:$0xff] }
  0x1c   : > { %v180_v48 = vld [vmem:[%s1309_s27 + $0x48] sm:$0xff]  ;;  %v457_v49 = vld [vmem:[%s1309_s27 + $0x52] sm:$0xff]  ;;  %v746_v51 = vld [vmem:[%s1309_s27 + $0x1c] sm:$0xff] }
  0x1d   : > { %v556_v50 = vld [vmem:[%s1309_s27 + $0x53] sm:$0xff]  ;;  %v747_v55 = vld [vmem:[%s1309_s27 + $0x24] sm:$0xff]  ;;  %v750_v2 = vld [vmem:[%s1309_s27 + $0x3c] sm:$0xff] }
  0x1e   : > { %v646_v52 = vld [vmem:[%s1309_s27 + $0xc] sm:$0xff]  ;;  %v844_v53 = vld [vmem:[%s1309_s27 + $0x15] sm:$0xff]  ;;  %v845_v56 = vld [vmem:[%s1309_s27 + $0x1d] sm:$0xff] }
  0x1f   : > { %v943_v54 = vld [vmem:[%s1309_s27 + $0x16] sm:$0xff]  ;;  %v944_v57 = vld [vmem:[%s1309_s27 + $0x1e] sm:$0xff]  ;;  %v748_v58 = vld [vmem:[%s1309_s27 + $0x2c] sm:$0xff] }
  0x20   : > { %1144 = vmatmul.msk.f32.gmra.mxu1 %vm194_vm0, %v187_v17  ;;  %1141 = vmatmul.msk.f32.gmra.mxu0 %vm194_vm0, %v184_v19  ;;  %v846_v59 = vld [vmem:[%s1309_s27 + $0x25] sm:$0xff]  ;;  %v749_v61 = vld [vmem:[%s1309_s27 + $0x34] sm:$0xff]  ;;  %v849_v13 = vld [vmem:[%s1309_s27 + $0x3d] sm:$0xff] }
  0x21   : > { %1148 = vmatmul.msk.f32.gmra.mxu3 %vm194_vm0, %v191_v18  ;;  %1161 = vmatmul.msk.f32.gmra.mxu2 %vm194_vm0, %v448_v20  ;;  %v945_v60 = vld [vmem:[%s1309_s27 + $0x26] sm:$0xff]  ;;  %v946_v1 = vld [vmem:[%s1309_s27 + $0x2e] sm:$0xff]  ;;  %v947_v8 = vld [vmem:[%s1309_s27 + $0x36] sm:$0xff] }
  0x22   : > { %v847_v63 = vld [vmem:[%s1309_s27 + $0x2d] sm:$0xff]  ;;  %v848_v6 = vld [vmem:[%s1309_s27 + $0x35] sm:$0xff]  ;;  %v751_v9 = vld [vmem:[%s1309_s27 + $0x44] sm:$0xff] }
  0x23   : > { %v948_v15 = vld [vmem:[%s1309_s27 + $0x3e] sm:$0xff]  ;;  %v752_v16 = vld [vmem:[%s1309_s27 + $0x4c] sm:$0xff] }
  0x28   : > { %1149 = vmatmul.msk.f32.vlgmr.msrb.gmra.mxu1 %vm194_vm0, %v171_v21  ;;  %1182 = vmatmul.msk.f32.vlgmr.msrb.gmra.mxu0 %vm194_vm0, %v547_v22 }
  0x29   : > { %1171 = vmatmul.msk.f32.vlgmr.msrb.gmra.mxu3 %vm194_vm0, %v448_v20  ;;  %1162 = vmatmul.msk.f32.gmra.mxu2 %vm194_vm0, %v449_v23  ;;  %v850_v20 = vld [vmem:[%s1309_s27 + $0x45] sm:$0xff] }
  0x30   : > { %1150 = vmatmul.msk.f32.gmra.mxu1 %vm194_vm0, %v172_v24  ;;  %1183 = vmatmul.msk.f32.gmra.mxu0 %vm194_vm0, %v548_v25  ;;  %v753_v24 = vld [vmem:[%s1309_s27 + $0x54] sm:$0xff] }
  0x31   : > { %1172 = vmatmul.msk.f32.gmra.mxu3 %vm194_vm0, %v449_v23  ;;  %1163 = vmatmul.msk.f32.gmra.mxu2 %vm194_vm0, %v450_v26  ;;  %v949_v23 = vld [vmem:[%s1309_s27 + $0x46] sm:$0xff] }
  0x38   : > { %1151 = vmatmul.msk.f32.gmra.mxu1 %vm194_vm0, %v173_v27  ;;  %1184 = vmatmul.msk.f32.gmra.mxu0 %vm194_vm0, %v549_v28 }
  0x39   : > { %1173 = vmatmul.msk.f32.gmra.mxu3 %vm194_vm0, %v450_v26  ;;  %1164 = vmatmul.msk.f32.gmra.mxu2 %vm194_vm0, %v451_v29 }
  0x40   : > { %1152 = vmatmul.msk.f32.gmra.mxu1 %vm194_vm0, %v174_v30  ;;  %1185 = vmatmul.msk.f32.gmra.mxu0 %vm194_vm0, %v550_v31  ;;  %v851_v30 = vld [vmem:[%s1309_s27 + $0x4d] sm:$0xff] }
  0x41   : > { %1174 = vmatmul.msk.f32.gmra.mxu3 %vm194_vm0, %v451_v29  ;;  %1165 = vmatmul.msk.f32.gmra.mxu2 %vm194_vm0, %v452_v32 }
  0x48   : > { %1153 = vmatmul.msk.f32.gmra.mxu1 %vm194_vm0, %v175_v33  ;;  %1186 = vmatmul.msk.f32.gmra.mxu0 %vm194_vm0, %v551_v34  ;;  %v950_v34 = vld [vmem:[%s1309_s27 + $0x4e] sm:$0xff] }
  0x49   : > { %1175 = vmatmul.msk.f32.gmra.mxu3 %vm194_vm0, %v452_v32  ;;  %1166 = vmatmul.msk.f32.gmra.mxu2 %vm194_vm0, %v453_v35 }
  0x50   : > { %1154 = vmatmul.msk.f32.gmra.mxu1 %vm194_vm0, %v176_v36  ;;  %1187 = vmatmul.msk.f32.gmra.mxu0 %vm194_vm0, %v552_v37 }
  0x51   : > { %1176 = vmatmul.msk.f32.gmra.mxu3 %vm194_vm0, %v453_v35  ;;  %1167 = vmatmul.msk.f32.gmra.mxu2 %vm194_vm0, %v454_v38  ;;  %v754_v35 = vld [vmem:[%s1309_s27 + $0x5c] sm:$0xff] }
  0x58   : > { %1155 = vmatmul.msk.f32.gmra.mxu1 %vm194_vm0, %v177_v39  ;;  %1188 = vmatmul.msk.f32.gmra.mxu0 %vm194_vm0, %v553_v40 }
  0x59   : > { %1177 = vmatmul.msk.f32.gmra.mxu3 %vm194_vm0, %v454_v38  ;;  %1168 = vmatmul.msk.f32.gmra.mxu2 %vm194_vm0, %v455_v41 }
  0x60   : > { %1156 = vmatmul.msk.f32.gmra.mxu1 %vm194_vm0, %v178_v42  ;;  %1189 = vmatmul.msk.f32.gmra.mxu0 %vm194_vm0, %v554_v43 }
  0x61   : > { %1178 = vmatmul.msk.f32.gmra.mxu3 %vm194_vm0, %v455_v41  ;;  %1169 = vmatmul.msk.f32.gmra.mxu2 %vm194_vm0, %v456_v44  ;;  %v852_v41 = vld [vmem:[%s1309_s27 + $0x55] sm:$0xff] }
  0x68   : > { %1157 = vmatmul.msk.f32.gmra.mxu1 %vm194_vm0, %v179_v45  ;;  %1190 = vmatmul.msk.f32.gmra.mxu0 %vm194_vm0, %v555_v46  ;;  %v951_v45 = vld [vmem:[%s1309_s27 + $0x56] sm:$0xff] }
  0x69   : > { %1179 = vmatmul.msk.f32.gmra.mxu3 %vm194_vm0, %v456_v44  ;;  %1204 = vmatmul.msk.f32.vlgmr.msra.gmra.mxu2 %vm194_vm0, %v745_v47 }
  0x70   : > { %1158 = vmatmul.msk.f32.gmra.mxu1 %vm194_vm0, %v180_v48  ;;  %1191 = vmatmul.msk.f32.gmra.mxu0 %vm194_vm0, %v556_v50 }
  0x71   : > { %1180 = vmatmul.msk.f32.gmra.mxu3 %vm194_vm0, %v457_v49  ;;  %1205 = vmatmul.msk.f32.gmra.mxu2 %vm194_vm0, %v746_v51 }
  0x78   : > { %1193 = vmatmul.msk.f32.vlgmr.msra.gmra.mxu1 %vm194_vm0, %v646_v52  ;;  %1226 = vmatmul.msk.f32.vlgmr.msra.gmra.mxu0 %vm194_vm0, %v943_v54 }
  0x79   : > { %1215 = vmatmul.msk.f32.vlgmr.msra.gmra.mxu3 %vm194_vm0, %v844_v53  ;;  %1206 = vmatmul.msk.f32.gmra.mxu2 %vm194_vm0, %v747_v55 }
  0x80   : > { %1194 = vmatmul.msk.f32.gmra.mxu1 %vm194_vm0, %v745_v47  ;;  %1227 = vmatmul.msk.f32.gmra.mxu0 %vm194_vm0, %v944_v57 }
  0x81   : > { %1216 = vmatmul.msk.f32.gmra.mxu3 %vm194_vm0, %v845_v56  ;;  %1207 = vmatmul.msk.f32.gmra.mxu2 %vm194_vm0, %v748_v58 }
  0x88   : > { %1195 = vmatmul.msk.f32.gmra.mxu1 %vm194_vm0, %v746_v51  ;;  %1228 = vmatmul.msk.f32.gmra.mxu0 %vm194_vm0, %v945_v60  ;;  %v853_v51 = vld [vmem:[%s1309_s27 + $0x5d] sm:$0xff] }
  0x89   : > { %1217 = vmatmul.msk.f32.gmra.mxu3 %vm194_vm0, %v846_v59  ;;  %1208 = vmatmul.msk.f32.gmra.mxu2 %vm194_vm0, %v749_v61 }
  0x8d   : > { %v1440_v62 = vpop.f32.mrf.mxu1  ;;  %v242_v0 = vpop.f32.mrf.mxu0 }
  0x90   : > { %1196 = vmatmul.msk.f32.gmra.mxu1 %vm194_vm0, %v747_v55  ;;  %1229 = vmatmul.msk.f32.gmra.mxu0 %vm194_vm0, %v946_v1  ;;  %v952_v55 = vld [vmem:[%s1309_s27 + $0x5e] sm:$0xff] }
  0x91   : > { %1218 = vmatmul.msk.f32.gmra.mxu3 %vm194_vm0, %v847_v63  ;;  %1209 = vmatmul.msk.f32.gmra.mxu2 %vm194_vm0, %v750_v2 }
  0x94   : > { %v1449_v3 = vpop.f32.mrf.mxu3  ;;  %v1451_v4 = vpop.f32.mrf.mxu2 }
  0x95   : > { %v1453_v5 = vpop.f32.mrf.mxu1  ;;  %v245_v7 = vpop.f32.mrf.mxu0 }
  0x98   : > { %1197 = vmatmul.msk.f32.gmra.mxu1 %vm194_vm0, %v748_v58  ;;  %1230 = vmatmul.msk.f32.gmra.mxu0 %vm194_vm0, %v947_v8 }
  0x99   : > { %1219 = vmatmul.msk.f32.gmra.mxu3 %vm194_vm0, %v848_v6  ;;  %1210 = vmatmul.msk.f32.gmra.mxu2 %vm194_vm0, %v751_v9 }
  0x9c   : > { %v1462_v10 = vpop.f32.mrf.mxu3  ;;  %v408_v11 = vpop.f32.mrf.mxu2 }
  0x9d   : > { %v1464_v12 = vpop.f32.mrf.mxu1  ;;  %v248_v14 = vpop.f32.mrf.mxu0 }
  0xa0   : > { %1198 = vmatmul.msk.f32.gmra.mxu1 %vm194_vm0, %v749_v61  ;;  %1231 = vmatmul.msk.f32.gmra.mxu0 %vm194_vm0, %v948_v15 }
  0xa1   : > { %1220 = vmatmul.msk.f32.gmra.mxu3 %vm194_vm0, %v849_v13  ;;  %1211 = vmatmul.msk.f32.gmra.mxu2 %vm194_vm0, %v752_v16 }
  0xa4   : > { %v1473_v17 = vpop.f32.mrf.mxu3  ;;  %v411_v18 = vpop.f32.mrf.mxu2 }
  0xa5   : > { %v319_v19 = vpop.f32.mrf.mxu1  ;;  %v606_v22 = vpop.f32.mrf.mxu0 }
  0xa6   : > { %v320_v21 = vadd.f32 %v319_v19, %v242_v0 }
  0xa8   : > { %v438_v25 = vadd.f32 %v408_v11, %v320_v21  ;;  %1199 = vmatmul.msk.f32.gmra.mxu1 %vm194_vm0, %v750_v2  ;;  %1232 = vmatmul.msk.f32.gmra.mxu0 %vm194_vm0, %v949_v23 }
  0xa9   : > { %1221 = vmatmul.msk.f32.gmra.mxu3 %vm194_vm0, %v850_v20  ;;  %1212 = vmatmul.msk.f32.gmra.mxu2 %vm194_vm0, %v753_v24 }
  0xac   : > { %v507_v26 = vpop.f32.mrf.mxu3  ;;  %v414_v28 = vpop.f32.mrf.mxu2 }
  0xad   : > { %v537_v27 = vadd.f32 %v507_v26, %v438_v25  ;;  %v322_v29 = vpop.f32.mrf.mxu1  ;;  %v609_v33 = vpop.f32.mrf.mxu0 }
  0xae   : > { %v323_v31 = vadd.f32 %v322_v29, %v245_v7 }
  0xaf   : > { %v1483_v32 = vadd.f32 %v606_v22, %v537_v27 }
  0xb0   : > { %v439_v36 = vadd.f32 %v411_v18, %v323_v31  ;;  %1200 = vmatmul.msk.f32.gmra.mxu1 %vm194_vm0, %v751_v9  ;;  %1233 = vmatmul.msk.f32.gmra.mxu0 %vm194_vm0, %v950_v34 }
  0xb1   : > { %1222 = vmatmul.msk.f32.gmra.mxu3 %vm194_vm0, %v851_v30  ;;  %1213 = vmatmul.msk.f32.gmra.mxu2 %vm194_vm0, %v754_v35 }
  0xb4   : > { %v510_v37 = vpop.f32.mrf.mxu3  ;;  %v417_v39 = vpop.f32.mrf.mxu2 }
  0xb5   : > { %v538_v38 = vadd.f32 %v510_v37, %v439_v36  ;;  %v325_v40 = vpop.f32.mrf.mxu1  ;;  %v612_v44 = vpop.f32.mrf.mxu0 }
  0xb6   : > { %v326_v42 = vadd.f32 %v325_v40, %v248_v14 }
  0xb7   : > { %v1492_v43 = vadd.f32 %v609_v33, %v538_v38 }
  0xb8   : > { %v440_v46 = vadd.f32 %v414_v28, %v326_v42  ;;  %1201 = vmatmul.msk.f32.gmra.mxu1 %vm194_vm0, %v752_v16  ;;  %1234 = vmatmul.msk.f32.gmra.mxu0 %vm194_vm0, %v951_v45 }
  0xb9   : > { %1223 = vmatmul.msk.f32.gmra.mxu3 %vm194_vm0, %v852_v41 }
  0xbc   : > { %v513_v47 = vpop.f32.mrf.mxu3  ;;  %v420_v49 = vpop.f32.mrf.mxu2 }
  0xbd   : > { %v539_v48 = vadd.f32 %v513_v47, %v440_v46  ;;  %v328_v50 = vpop.f32.mrf.mxu1  ;;  %v615_v54 = vpop.f32.mrf.mxu0 }
  0xbe   : > { %v329_v52 = vadd.f32 %v328_v50, %v1440_v62 }
  0xbf   : > { %v1500_v53 = vadd.f32 %v612_v44, %v539_v48 }
  0xc0   : > { %v441_v56 = vadd.f32 %v417_v39, %v329_v52  ;;  %1202 = vmatmul.msk.f32.gmra.mxu1 %vm194_vm0, %v753_v24  ;;  %1235 = vmatmul.msk.f32.gmra.mxu0 %vm194_vm0, %v952_v55 }
  0xc1   : > { %1224 = vmatmul.msk.f32.gmra.mxu3 %vm194_vm0, %v853_v51 }
  0xc4   : > { %v516_v57 = vpop.f32.mrf.mxu3  ;;  %v423_v59 = vpop.f32.mrf.mxu2 }
  0xc5   : > { %v540_v58 = vadd.f32 %v516_v57, %v441_v56  ;;  %v331_v60 = vpop.f32.mrf.mxu1  ;;  %v618_v62 = vpop.f32.mrf.mxu0 }
  0xc6   : > { %v332_v61 = vadd.f32 %v331_v60, %v1453_v5 }
  0xc7   : > { %v1507_v63 = vadd.f32 %v615_v54, %v540_v58 }
  0xc8   : > { %v442_v0 = vadd.f32 %v420_v49, %v332_v61 }
  0xcc   : > { %v519_v1 = vpop.f32.mrf.mxu3  ;;  %v426_v6 = vpop.f32.mrf.mxu2 }
  0xcd   : > { %v541_v2 = vadd.f32 %v519_v1, %v442_v0  ;;  %v334_v7 = vpop.f32.mrf.mxu1  ;;  %v621_v11 = vpop.f32.mrf.mxu0 }
  0xce   : > { %v335_v8 = vadd.f32 %v334_v7, %v1464_v12 }
  0xcf   : > { %v1510_v9 = vadd.f32 %v618_v62, %v541_v2 }
  0xd0   : > { %v443_v13 = vadd.f32 %v423_v59, %v335_v8 }
  0xd4   : > { %v522_v14 = vpop.f32.mrf.mxu3  ;;  %v429_v16 = vpop.f32.mrf.mxu2 }
  0xd5   : > { %v542_v15 = vadd.f32 %v522_v14, %v443_v13  ;;  %v337_v18 = vpop.f32.mrf.mxu1  ;;  %v624_v20 = vpop.f32.mrf.mxu0 }
  0xd6   : > { %v338_v5 = vadd.f32 %v337_v18, %v1451_v4 }
  0xd7   : > { %v1513_v19 = vadd.f32 %v621_v11, %v542_v15 }
  0xd8   : > { %v444_v21 = vadd.f32 %v426_v6, %v338_v5 }
  0xdc   : > { %v525_v22 = vpop.f32.mrf.mxu3  ;;  %v432_v24 = vpop.f32.mrf.mxu2 }
  0xdd   : > { %v543_v23 = vadd.f32 %v525_v22, %v444_v21  ;;  %v340_v25 = vpop.f32.mrf.mxu1  ;;  %v627_v27 = vpop.f32.mrf.mxu0 }
  0xde   : > { %v341_v12 = vadd.f32 %v340_v25, %v1449_v3 }
  0xdf   : > { %v1516_v26 = vadd.f32 %v624_v20, %v543_v23 }
  0xe0   : > { %v445_v28 = vadd.f32 %v429_v16, %v341_v12 }
  0xe4   : > { %v528_v29 = vpop.f32.mrf.mxu3  ;;  %v435_v31 = vpop.f32.mrf.mxu2 }
  0xe5   : > { %v544_v30 = vadd.f32 %v528_v29, %v445_v28  ;;  %v343_v33 = vpop.f32.mrf.mxu1  ;;  %v630_v35 = vpop.f32.mrf.mxu0 }
  0xe6   : > { %v344_v4 = vadd.f32 %v343_v33, %v1462_v10 }
  0xe7   : > { %v1519_v34 = vadd.f32 %v627_v27, %v544_v30 }
  0xe8   : > { %v446_v36 = vadd.f32 %v432_v24, %v344_v4 }
  0xec   : > { %v531_v37 = vpop.f32.mrf.mxu3  ;;  %v804_v39 = vpop.f32.mrf.mxu2 }
  0xed   : > { %v545_v38 = vadd.f32 %v531_v37, %v446_v36  ;;  %v346_v40 = vpop.f32.mrf.mxu1  ;;  %v633_v42 = vpop.f32.mrf.mxu0 }
  0xee   : > { %v347_v3 = vadd.f32 %v346_v40, %v1473_v17  ;;  %v1530_v17 = vld [vmem:[%s1582_s2] ss:$0 sm:$0xff] }
  0xef   : > { %v1522_v41 = vadd.f32 %v630_v35, %v545_v38 }
  0xf0   : > { %v447_v44 = vadd.f32 %v435_v31, %v347_v3 }
  0xf4   : > { %v534_v45 = vpop.f32.mrf.mxu3  ;;  %v807_v47 = vpop.f32.mrf.mxu2 }
  0xf5   : > { %v546_v46 = vadd.f32 %v534_v45, %v447_v44  ;;  %v705_v48 = vpop.f32.mrf.mxu1  ;;  %v1002_v50 = vpop.f32.mrf.mxu0 }
  0xf6   : > { %v735_v49 = vadd.f32 %v705_v48, %v1483_v32 }
  0xf7   : > { %v1524_v10 = vadd.f32 %v633_v42, %v546_v46 }
  0xf8   : > { %v834_v51 = vadd.f32 %v804_v39, %v735_v49 }
  0xfc   : > { %v903_v52 = vpop.f32.mrf.mxu3  ;;  %v810_v55 = vpop.f32.mrf.mxu2 }
  0xfd   : > { %v933_v54 = vadd.f32 %v903_v52, %v834_v51  ;;  %v708_v56 = vpop.f32.mrf.mxu1  ;;  %v1005_v59 = vpop.f32.mrf.mxu0 }
  0xfe   : > { %v736_v57 = vadd.f32 %v708_v56, %v1492_v43 }
  0xff   : > { %v1032_v58 = vadd.f32 %v1002_v50, %v933_v54 }
 0x100   : > { %v835_v61 = vadd.f32 %v807_v47, %v736_v57 }
 0x101   : > { %v1046_v60 = vadd.f32 %v1530_v17, %v1032_v58 }
 0x103   : > { %v1056_v32 = vmax.f32 %v1046_v60, 0.0 }
 0x104   : > { %v906_v62 = vpop.f32.mrf.mxu3  ;;  %v813_v1 = vpop.f32.mrf.mxu2 }
 0x105   : > { %1066 = vst.msk [vmem:[%s1538_s16] sm:$0xff] %vm194_vm0, %v1056_v32  ;;  %v934_v0 = vadd.f32 %v906_v62, %v835_v61  ;;  %v711_v2 = vpop.f32.mrf.mxu1  ;;  %v1008_v7 = vpop.f32.mrf.mxu0 }
 0x106   : > { %v737_v43 = vadd.f32 %v711_v2, %v1500_v53 }
 0x107   : > { %v1033_v6 = vadd.f32 %v1005_v59, %v934_v0 }
 0x108   : > { %v836_v13 = vadd.f32 %v810_v55, %v737_v43 }
 0x109   : > { %v1047_v8 = vadd.f32 %v1530_v17, %v1033_v6 }
 0x10b   : > { %v1057_v11 = vmax.f32 %v1047_v8, 0.0 }
 0x10c   : > { %v909_v14 = vpop.f32.mrf.mxu3  ;;  %v816_v18 = vpop.f32.mrf.mxu2 }
 0x10d   : > { %1067 = vst.msk [vmem:[%s1538_s16 + $0x8] sm:$0xff] %vm194_vm0, %v1057_v11  ;;  %v935_v15 = vadd.f32 %v909_v14, %v836_v13  ;;  %v714_v16 = vpop.f32.mrf.mxu1  ;;  %v1011_v21 = vpop.f32.mrf.mxu0 }
 0x10e   : > { %v738_v5 = vadd.f32 %v714_v16, %v1507_v63 }
 0x10f   : > { %v1034_v20 = vadd.f32 %v1008_v7, %v935_v15 }
 0x110   : > { %v837_v23 = vadd.f32 %v813_v1, %v738_v5 }
 0x111   : > { %v1048_v53 = vadd.f32 %v1530_v17, %v1034_v20 }
 0x113   : > { %v1058_v22 = vmax.f32 %v1048_v53, 0.0 }
 0x114   : > { %v912_v24 = vpop.f32.mrf.mxu3  ;;  %v819_v30 = vpop.f32.mrf.mxu2 }
 0x115   : > { %1068 = vst.msk [vmem:[%s1538_s16 + $0x10] sm:$0xff] %vm194_vm0, %v1058_v22  ;;  %v936_v25 = vadd.f32 %v912_v24, %v837_v23  ;;  %v717_v12 = vpop.f32.mrf.mxu1  ;;  %v1014_v29 = vpop.f32.mrf.mxu0 }
 0x116   : > { %v739_v27 = vadd.f32 %v717_v12, %v1510_v9 }
 0x117   : > { %v1035_v28 = vadd.f32 %v1011_v21, %v936_v25 }
 0x118   : > { %v838_v33 = vadd.f32 %v816_v18, %v739_v27 }
 0x119   : > { %v1049_v63 = vadd.f32 %v1530_v17, %v1035_v28 }
 0x11b   : > { %v1059_v31 = vmax.f32 %v1049_v63, 0.0 }
 0x11c   : > { %v915_v4 = vpop.f32.mrf.mxu3  ;;  %v822_v9 = vpop.f32.mrf.mxu2 }
 0x11d   : > { %1069 = vst.msk [vmem:[%s1538_s16 + $0x18] sm:$0xff] %vm194_vm0, %v1059_v31  ;;  %v937_v35 = vadd.f32 %v915_v4, %v838_v33  ;;  %v720_v36 = vpop.f32.mrf.mxu1  ;;  %v1017_v39 = vpop.f32.mrf.mxu0 }
 0x11e   : > { %v740_v37 = vadd.f32 %v720_v36, %v1513_v19 }
 0x11f   : > { %v1036_v38 = vadd.f32 %v1014_v29, %v937_v35 }
 0x120   : > { %v839_v42 = vadd.f32 %v819_v30, %v740_v37 }
 0x121   : > { %v1050_v40 = vadd.f32 %v1530_v17, %v1036_v38 }
 0x123   : > { %v1060_v3 = vmax.f32 %v1050_v40, 0.0 }
 0x124   : > { %v918_v44 = vpop.f32.mrf.mxu3  ;;  %v825_v54 = vpop.f32.mrf.mxu2 }
 0x125   : > { %1070 = vst.msk [vmem:[%s1538_s16 + $0x20] sm:$0xff] %vm194_vm0, %v1060_v3  ;;  %v938_v45 = vadd.f32 %v918_v44, %v839_v42  ;;  %v723_v46 = vpop.f32.mrf.mxu1  ;;  %v1020_v49 = vpop.f32.mrf.mxu0 }
 0x126   : > { %v741_v47 = vadd.f32 %v723_v46, %v1516_v26 }
 0x127   : > { %v1037_v48 = vadd.f32 %v1017_v39, %v938_v45 }
 0x128   : > { %v840_v51 = vadd.f32 %v822_v9, %v741_v47 }
 0x129   : > { %v1051_v19 = vadd.f32 %v1530_v17, %v1037_v48 }
 0x12b   : > { %v1061_v50 = vmax.f32 %v1051_v19, 0.0 }
 0x12c   : > { %v921_v52 = vpop.f32.mrf.mxu3  ;;  %v828_v1 = vpop.f32.mrf.mxu2 }
 0x12d   : > { %1071 = vst.msk [vmem:[%s1538_s16 + $0x28] sm:$0xff] %vm194_vm0, %v1061_v50  ;;  %v939_v55 = vadd.f32 %v921_v52, %v840_v51  ;;  %v726_v56 = vpop.f32.mrf.mxu1  ;;  %v1023_v59 = vpop.f32.mrf.mxu0 }
 0x12e   : > { %v742_v57 = vadd.f32 %v726_v56, %v1519_v34 }
 0x12f   : > { %v1038_v58 = vadd.f32 %v1020_v49, %v939_v55 }
 0x130   : > { %v841_v32 = vadd.f32 %v825_v54, %v742_v57 }
 0x131   : > { %v1052_v26 = vadd.f32 %v1530_v17, %v1038_v58 }
 0x133   : > { %v1062_v60 = vmax.f32 %v1052_v26, 0.0 }
 0x134   : > { %v924_v61 = vpop.f32.mrf.mxu3  ;;  %v831_v18 = vpop.f32.mrf.mxu2 }
 0x135   : > { %1072 = vst.msk [vmem:[%s1538_s16 + $0x30] sm:$0xff] %vm194_vm0, %v1062_v60  ;;  %v940_v62 = vadd.f32 %v924_v61, %v841_v32  ;;  %v729_v0 = vpop.f32.mrf.mxu1  ;;  %v1026_v34 = vpop.f32.mrf.mxu0 }
 0x136   : > { %v743_v2 = vadd.f32 %v729_v0, %v1522_v41 }
 0x137   : > { %v1039_v43 = vadd.f32 %v1023_v59, %v940_v62 }
 0x138   : > { %v842_v8 = vadd.f32 %v828_v1, %v743_v2 }
 0x139   : > { %v1053_v6 = vadd.f32 %v1530_v17, %v1039_v43 }
 0x13b   : > { %v1063_v7 = vmax.f32 %v1053_v6, 0.0 }
 0x13c   : > { %v927_v11 = vpop.f32.mrf.mxu3 }
 0x13d   : > { %1073 = vst.msk [vmem:[%s1538_s16 + $0x38] sm:$0xff] %vm194_vm0, %v1063_v7  ;;  %v941_v13 = vadd.f32 %v927_v11, %v842_v8  ;;  %v732_v14 = vpop.f32.mrf.mxu1  ;;  %v1029_v53 = vpop.f32.mrf.mxu0 }
 0x13e   : > { %v744_v15 = vadd.f32 %v732_v14, %v1524_v10 }
 0x13f   : > { %v1040_v16 = vadd.f32 %v1026_v34, %v941_v13 }
 0x140   : > { %v843_v20 = vadd.f32 %v831_v18, %v744_v15 }
 0x141   : > { %v1054_v5 = vadd.f32 %v1530_v17, %v1040_v16 }
 0x143   : > { %v1064_v41 = vmax.f32 %v1054_v5, 0.0 }
 0x144   : > { %v930_v21 = vpop.f32.mrf.mxu3 }
 0x145   : > { %1074 = vst.msk [vmem:[%s1538_s16 + $0x40] sm:$0xff] %vm194_vm0, %v1064_v41  ;;  %v942_v22 = vadd.f32 %v930_v21, %v843_v20 }
 0x147   : > { %v1041_v23 = vadd.f32 %v1029_v53, %v942_v22 }
 0x149   : > { %v1055_v24 = vadd.f32 %v1530_v17, %v1041_v23 }
 0x14b   : > { %v1065_v25 = vmax.f32 %v1055_v24, 0.0 }
 0x14d   : > { %1075 = vst.msk [vmem:[%s1538_s16 + $0x48] sm:$0xff] %vm194_vm0, %v1065_v25 }
 0x14e PF: > { %s13_s12 = sadd.s32 1, %s1258_s12  }
 0x14f   : > { %p10_p4 = scmp.ge.s32.totalorder %s13_s12, 4  }
 0x151   :  { %12 = sbr.rel (!%p10_p4) target bundleno = 1 (0x1), region = 70 }

// kernel: cnn_transformer_forward.8
= control target key start
LH: loop header
LB: loop body
LE: loop exit
PB: predicated region body
PF: predicated region fallthrough
CT: control target
= control target key end

     0   :  { %s3052_s12 = smov 0   ;;  %s5111_s0 = inlined_call_operand.vmem [shape: f32[2,342,1], index: 0, kind: input, shape index: {}]   ;;  %s5112_s1 = inlined_call_operand.vmem [shape: f32[9,1,8], index: 1, kind: input, shape index: {}]   ;;  %s5113_s2 = inlined_call_operand.vmem [shape: f32[1,8], index: 2, kind: input, shape index: {}]   ;;  %s5114_s3 = inlined_call_operand.vmem [shape: f32[2,288,8], index: 3, kind: output, shape index: {}]  }
   0x1 LB: > { %s2975_s13 = sadd.s32 4294967295, %s3029_s12   ;;  %p2979_p0 = scmp.ge.s32.totalorder %s3029_s12, 1  ;;  %s3029_s12 = sphi %s3052_s12, %s13_s12  }
   0x2   : > { %p137_p1 = scmp.lt.s32.totalorder %s3029_s12, 3 }
   0x4   : > { %p138_p2 = pnand %p2979_p0, %p137_p1 }
   0x6   : > { %141 = sbr.rel (%p138_p2) target bundleno = 1000 (0x3e8), region = 32 }
   0xb   : > { %p161_p3 = scmp.lt.s32.totalorder %s2975_s13, 1  ;;  %v3031_v0 = vmov 0   ;;  %vm2883_vm0 = vcmask 64512  }
   0xc   : > { %3005 = vset.pattern.permute.xlu2 %v3031_v0  ;;  %3004 = vset.pattern.permute.xlu1 %v3031_v0 }
   0xd   : > { %3003 = vset.pattern.permute.xlu0 %v3031_v0  ;;  %s5493_s13 = smov (!%p161_p3, %s2975_s13), 1 }
   0xe   : > { %s2992_s14 = smul.u32 344, %s5493_s13 }
  0x10   : > { %s3066_s17 = scalar_lea.vmem %s5111_s0, %s2992_s14 }
  0x11   : > { %v175_v1 = vld [vmem:[%s3066_s17 + $0x20] sm:$0xff]  ;;  %v173_v2 = vld [vmem:[%s3066_s17 + $0x10] sm:$0xff]  ;;  %v176_v4 = vld [vmem:[%s3066_s17 + $0x28] sm:$0xff] }
  0x12   : > { %v171_v3 = vld [vmem:[%s3066_s17] sm:$0xff]  ;;  %230 = vperm.xlu2 %3005, %v175_v1   ;;  %220 = vperm.xlu1 %3004, %v173_v2   ;;  %v174_v5 = vld [vmem:[%s3066_s17 + $0x18] sm:$0xff]  ;;  %v172_v6 = vld [vmem:[%s3066_s17 + $0x8] sm:$0xff] }
  0x13   : > { %210 = vperm.xlu0 %3003, %v171_v3   ;;  %v179_v7 = vld [vmem:[%s3066_s17 + $0x40] sm:$0xff]  ;;  %v178_v8 = vld [vmem:[%s3066_s17 + $0x38] sm:$0xff]  ;;  %v177_v9 = vld [vmem:[%s3066_s17 + $0x30] sm:$0xff] }
  0x14   : > { %v182_v10 = vld [vmem:[%s3066_s17 + $0x58] sm:$0xff]  ;;  %v181_v11 = vld [vmem:[%s3066_s17 + $0x50] sm:$0xff]  ;;  %v180_v12 = vld [vmem:[%s3066_s17 + $0x48] sm:$0xff] }
  0x15   : > { %v185_v13 = vld [vmem:[%s3066_s17 + $0x70] sm:$0xff]  ;;  %v184_v14 = vld [vmem:[%s3066_s17 + $0x68] sm:$0xff]  ;;  %v183_v15 = vld [vmem:[%s3066_s17 + $0x60] sm:$0xff] }
  0x16   : > { %v188_v16 = vld [vmem:[%s3066_s17 + $0x88] sm:$0xff]  ;;  %v187_v17 = vld [vmem:[%s3066_s17 + $0x80] sm:$0xff]  ;;  %v186_v18 = vld [vmem:[%s3066_s17 + $0x78] sm:$0xff] }
  0x17   : > { %v191_v19 = vld [vmem:[%s3066_s17 + $0xa0] sm:$0xff]  ;;  %v190_v20 = vld [vmem:[%s3066_s17 + $0x98] sm:$0xff]  ;;  %v189_v21 = vld [vmem:[%s3066_s17 + $0x90] sm:$0xff] }
  0x18   : > { %v194_v22 = vld [vmem:[%s3066_s17 + $0xb8] sm:$0xff]  ;;  %v193_v23 = vld [vmem:[%s3066_s17 + $0xb0] sm:$0xff]  ;;  %v192_v24 = vld [vmem:[%s3066_s17 + $0xa8] sm:$0xff] }
  0x19   : > { %v197_v25 = vld [vmem:[%s3066_s17 + $0xd0] sm:$0xff]  ;;  %v196_v26 = vld [vmem:[%s3066_s17 + $0xc8] sm:$0xff]  ;;  %v195_v27 = vld [vmem:[%s3066_s17 + $0xc0] sm:$0xff] }
  0x1a   : > { %235 = vperm.xlu2 %3005, %v176_v4   ;;  %225 = vperm.xlu1 %3004, %v174_v5   ;;  %v200_v28 = vld [vmem:[%s3066_s17 + $0xe8] sm:$0xff]  ;;  %v199_v29 = vld [vmem:[%s3066_s17 + $0xe0] sm:$0xff]  ;;  %v198_v30 = vld [vmem:[%s3066_s17 + $0xd8] sm:$0xff] }
  0x1b   : > { %215 = vperm.xlu0 %3003, %v172_v6   ;;  %v203_v31 = vld [vmem:[%s3066_s17 + $0x100] sm:$0xff]  ;;  %v202_v32 = vld [vmem:[%s3066_s17 + $0xf8] sm:$0xff]  ;;  %v201_v33 = vld [vmem:[%s3066_s17 + $0xf0] sm:$0xff] }
  0x1c   : > { %v206_v34 = vld [vmem:[%s3066_s17 + $0x118] sm:$0xff]  ;;  %v205_v35 = vld [vmem:[%s3066_s17 + $0x110] sm:$0xff]  ;;  %v204_v36 = vld [vmem:[%s3066_s17 + $0x108] sm:$0xff] }
  0x1d   : > { %v465_v38 = vld [vmem:[%s3066_s17 + $0x11] sm:$0xff]  ;;  %v464_v39 = vld [vmem:[%s3066_s17 + $0x9] sm:$0xff]  ;;  %v463_v40 = vld [vmem:[%s3066_s17 + $0x1] sm:$0xff] }
  0x1e   : > { %v468_v42 = vld [vmem:[%s3066_s17 + $0x29] sm:$0xff]  ;;  %v467_v43 = vld [vmem:[%s3066_s17 + $0x21] sm:$0xff]  ;;  %v466_v44 = vld [vmem:[%s3066_s17 + $0x19] sm:$0xff] }
  0x1f   : > { %v471_v46 = vld [vmem:[%s3066_s17 + $0x41] sm:$0xff]  ;;  %v470_v47 = vld [vmem:[%s3066_s17 + $0x39] sm:$0xff]  ;;  %v469_v48 = vld [vmem:[%s3066_s17 + $0x31] sm:$0xff] }
  0x20   : > { %v474_v52 = vld [vmem:[%s3066_s17 + $0x59] sm:$0xff]  ;;  %v473_v53 = vld [vmem:[%s3066_s17 + $0x51] sm:$0xff]  ;;  %v472_v54 = vld [vmem:[%s3066_s17 + $0x49] sm:$0xff] }
  0x21   : > { %v477_v58 = vld [vmem:[%s3066_s17 + $0x71] sm:$0xff]  ;;  %v476_v59 = vld [vmem:[%s3066_s17 + $0x69] sm:$0xff]  ;;  %v475_v60 = vld [vmem:[%s3066_s17 + $0x61] sm:$0xff] }
  0x22   : > { %250 = vperm.xlu2 %3005, %v179_v7   ;;  %245 = vperm.xlu1 %3004, %v178_v8   ;;  %v480_v0 = vld [vmem:[%s3066_s17 + $0x89] sm:$0xff]  ;;  %v479_v1 = vld [vmem:[%s3066_s17 + $0x81] sm:$0xff]  ;;  %v478_v2 = vld [vmem:[%s3066_s17 + $0x79] sm:$0xff] }
  0x23   : > { %240 = vperm.xlu0 %3003, %v177_v9   ;;  %v483_v6 = vld [vmem:[%s3066_s17 + $0xa1] sm:$0xff]  ;;  %v482_v7 = vld [vmem:[%s3066_s17 + $0x99] sm:$0xff]  ;;  %v481_v8 = vld [vmem:[%s3066_s17 + $0x91] sm:$0xff] }
  0x2a   : > { %265 = vperm.xlu2 %3005, %v182_v10   ;;  %260 = vperm.xlu1 %3004, %v181_v11  }
  0x2b   : > { %255 = vperm.xlu0 %3003, %v180_v12   ;;  %v486_v12 = vld [vmem:[%s3066_s17 + $0xb9] sm:$0xff] }
  0x32   : > { %280 = vperm.xlu2 %3005, %v185_v13   ;;  %275 = vperm.xlu1 %3004, %v184_v14   ;;  %v485_v13 = vld [vmem:[%s3066_s17 + $0xb1] sm:$0xff]  ;;  %v484_v14 = vld [vmem:[%s3066_s17 + $0xa9] sm:$0xff] }
  0x33   : > { %270 = vperm.xlu0 %3003, %v183_v15  }
  0x3a   : > { %295 = vperm.xlu2 %3005, %v188_v16   ;;  %290 = vperm.xlu1 %3004, %v187_v17  }
  0x3b   : > { %285 = vperm.xlu0 %3003, %v186_v18   ;;  %v489_v18 = vld [vmem:[%s3066_s17 + $0xd1] sm:$0xff] }
  0x42   : > { %310 = vperm.xlu2 %3005, %v191_v19   ;;  %305 = vperm.xlu1 %3004, %v190_v20   ;;  %v488_v19 = vld [vmem:[%s3066_s17 + $0xc9] sm:$0xff]  ;;  %v487_v20 = vld [vmem:[%s3066_s17 + $0xc1] sm:$0xff] }
  0x43   : > { %300 = vperm.xlu0 %3003, %v189_v21  }
  0x4a   : > { %325 = vperm.xlu2 %3005, %v194_v22   ;;  %320 = vperm.xlu1 %3004, %v193_v23  }
  0x4b   : > { %315 = vperm.xlu0 %3003, %v192_v24   ;;  %v492_v24 = vld [vmem:[%s3066_s17 + $0xe9] sm:$0xff] }
  0x52   : > { %340 = vperm.xlu2 %3005, %v197_v25   ;;  %335 = vperm.xlu1 %3004, %v196_v26   ;;  %v491_v25 = vld [vmem:[%s3066_s17 + $0xe1] sm:$0xff]  ;;  %v490_v26 = vld [vmem:[%s3066_s17 + $0xd9] sm:$0xff] }
  0x53   : > { %330 = vperm.xlu0 %3003, %v195_v27  }
  0x5a   : > { %355 = vperm.xlu2 %3005, %v200_v28   ;;  %350 = vperm.xlu1 %3004, %v199_v29  }
  0x5b   : > { %345 = vperm.xlu0 %3003, %v198_v30   ;;  %v495_v30 = vld [vmem:[%s3066_s17 + $0x101] sm:$0xff] }
  0x62   : > { %370 = vperm.xlu2 %3005, %v203_v31   ;;  %365 = vperm.xlu1 %3004, %v202_v32   ;;  %v494_v31 = vld [vmem:[%s3066_s17 + $0xf9] sm:$0xff]  ;;  %v493_v32 = vld [vmem:[%s3066_s17 + $0xf1] sm:$0xff] }
  0x63   : > { %360 = vperm.xlu0 %3003, %v201_v33  }
  0x6a   : > { %385 = vperm.xlu2 %3005, %v206_v34   ;;  %380 = vperm.xlu1 %3004, %v205_v35  }
  0x6b   : > { %375 = vperm.xlu0 %3003, %v204_v36   ;;  %v498_v36 = vld [vmem:[%s3066_s17 + $0x119] sm:$0xff] }
  0x6c   : > { %v3104_v37 = vpop.permute.xlu2 %230 }
  0x72   : > { %513 = vperm.xlu2 %3005, %v465_v38   ;;  %508 = vperm.xlu1 %3004, %v464_v39   ;;  %v497_v38 = vld [vmem:[%s3066_s17 + $0x111] sm:$0xff]  ;;  %v496_v39 = vld [vmem:[%s3066_s17 + $0x109] sm:$0xff] }
  0x73   : > { %503 = vperm.xlu0 %3003, %v463_v40  }
  0x74   : > { %v3109_v41 = vpop.permute.xlu2 %235 }
  0x7a   : > { %528 = vperm.xlu2 %3005, %v468_v42   ;;  %523 = vperm.xlu1 %3004, %v467_v43  }
  0x7b   : > { %518 = vperm.xlu0 %3003, %v466_v44   ;;  %v3207_v44 = vld [vmem:[%s3066_s17 + $0x12] sm:$0xff] }
  0x7c   : > { %v3114_v45 = vpop.permute.xlu2 %250 }
  0x82   : > { %543 = vperm.xlu2 %3005, %v471_v46   ;;  %538 = vperm.xlu1 %3004, %v470_v47   ;;  %v757_v46 = vld [vmem:[%s3066_s17 + $0xa] sm:$0xff]  ;;  %v756_v47 = vld [vmem:[%s3066_s17 + $0x2] sm:$0xff] }
  0x83   : > { %533 = vperm.xlu0 %3003, %v469_v48  }
  0x84   : > { %v3119_v49 = vpop.permute.xlu2 %265  ;;  %v3121_v50 = vpop.permute.xlu1 %220 }
  0x85   : > { %v3123_v51 = vpop.permute.xlu0 %210 }
  0x8a   : > { %558 = vperm.xlu2 %3005, %v474_v52   ;;  %553 = vperm.xlu1 %3004, %v473_v53  }
  0x8b   : > { %548 = vperm.xlu0 %3003, %v472_v54   ;;  %v3219_v54 = vld [vmem:[%s3066_s17 + $0x2a] sm:$0xff] }
  0x8c   : > { %v3128_v55 = vpop.permute.xlu2 %280  ;;  %v3130_v56 = vpop.permute.xlu1 %225 }
  0x8d   : > { %v3132_v57 = vpop.permute.xlu0 %215 }
  0x92   : > { %573 = vperm.xlu2 %3005, %v477_v58   ;;  %568 = vperm.xlu1 %3004, %v476_v59   ;;  %v3222_v58 = vld [vmem:[%s3066_s17 + $0x22] sm:$0xff]  ;;  %v3225_v59 = vld [vmem:[%s3066_s17 + $0x1a] sm:$0xff] }
  0x93   : > { %563 = vperm.xlu0 %3003, %v475_v60  }
  0x94   : > { %v3137_v61 = vpop.permute.xlu2 %295  ;;  %v3139_v62 = vpop.permute.xlu1 %245 }
  0x95   : > { %v3141_v63 = vpop.permute.xlu0 %240 }
  0x9a   : > { %588 = vperm.xlu2 %3005, %v480_v0   ;;  %583 = vperm.xlu1 %3004, %v479_v1  }
  0x9b   : > { %578 = vperm.xlu0 %3003, %v478_v2   ;;  %v3237_v2 = vld [vmem:[%s3066_s17 + $0x42] sm:$0xff] }
  0x9c   : > { %v3146_v3 = vpop.permute.xlu2 %310  ;;  %v3148_v4 = vpop.permute.xlu1 %260 }
  0x9d   : > { %v3150_v5 = vpop.permute.xlu0 %255 }
  0xa2   : > { %603 = vperm.xlu2 %3005, %v483_v6   ;;  %598 = vperm.xlu1 %3004, %v482_v7   ;;  %v3240_v6 = vld [vmem:[%s3066_s17 + $0x3a] sm:$0xff]  ;;  %v3243_v7 = vld [vmem:[%s3066_s17 + $0x32] sm:$0xff] }
  0xa3   : > { %593 = vperm.xlu0 %3003, %v481_v8  }
  0xa4   : > { %v3155_v9 = vpop.permute.xlu2 %325  ;;  %v3157_v10 = vpop.permute.xlu1 %275 }
  0xa5   : > { %v3159_v11 = vpop.permute.xlu0 %270 }
  0xaa   : > { %618 = vperm.xlu2 %3005, %v486_v12   ;;  %613 = vperm.xlu1 %3004, %v485_v13  }
  0xab   : > { %608 = vperm.xlu0 %3003, %v484_v14   ;;  %v3255_v14 = vld [vmem:[%s3066_s17 + $0x5a] sm:$0xff] }
  0xac   : > { %v3164_v15 = vpop.permute.xlu2 %340  ;;  %v3166_v16 = vpop.permute.xlu1 %290 }
  0xad   : > { %v3168_v17 = vpop.permute.xlu0 %285 }
  0xb2   : > { %633 = vperm.xlu2 %3005, %v489_v18   ;;  %628 = vperm.xlu1 %3004, %v488_v19   ;;  %v3258_v18 = vld [vmem:[%s3066_s17 + $0x52] sm:$0xff]  ;;  %v3261_v19 = vld [vmem:[%s3066_s17 + $0x4a] sm:$0xff] }
  0xb3   : > { %623 = vperm.xlu0 %3003, %v487_v20  }
  0xb4   : > { %v3173_v21 = vpop.permute.xlu2 %355  ;;  %v3175_v22 = vpop.permute.xlu1 %305 }
  0xb5   : > { %5118 = vst [vmem:[#allocation2_spill] sm:$0xff] %v3173_v21  ;;  %v3177_v23 = vpop.permute.xlu0 %300 }
  0xb6   : > { %5119 = vst [vmem:[#allocation3_spill] sm:$0xff] %v3175_v22 }
  0xb7   : > { %5120 = vst [vmem:[#allocation4_spill] sm:$0xff] %v3177_v23 }
  0xba   : > { %648 = vperm.xlu2 %3005, %v492_v24   ;;  %643 = vperm.xlu1 %3004, %v491_v25  }
  0xbb   : > { %638 = vperm.xlu0 %3003, %v490_v26   ;;  %v3273_v26 = vld [vmem:[%s3066_s17 + $0x72] sm:$0xff] }
  0xbc   : > { %v3182_v27 = vpop.permute.xlu2 %370  ;;  %v3184_v28 = vpop.permute.xlu1 %320 }
  0xbd   : > { %5121 = vst [vmem:[#allocation5_spill] sm:$0xff] %v3182_v27  ;;  %v3186_v29 = vpop.permute.xlu0 %315 }
  0xbe   : > { %5122 = vst [vmem:[#allocation6_spill] sm:$0xff] %v3184_v28 }
  0xbf   : > { %5123 = vst [vmem:[#allocation7_spill] sm:$0xff] %v3186_v29 }
  0xc2   : > { %663 = vperm.xlu2 %3005, %v495_v30   ;;  %658 = vperm.xlu1 %3004, %v494_v31   ;;  %v3276_v30 = vld [vmem:[%s3066_s17 + $0x6a] sm:$0xff]  ;;  %v3279_v31 = vld [vmem:[%s3066_s17 + $0x62] sm:$0xff] }
  0xc3   : > { %653 = vperm.xlu0 %3003, %v493_v32  }
  0xc4   : > { %v3191_v33 = vpop.permute.xlu2 %385  ;;  %v3193_v34 = vpop.permute.xlu1 %335 }
  0xc5   : > { %5124 = vst [vmem:[#allocation8_spill] sm:$0xff] %v3193_v34  ;;  %v3195_v35 = vpop.permute.xlu0 %330  ;;  %v3387_v34 = vld [vmem:[%s3066_s17 + $0xf2] sm:$0xff] }
  0xc6   : > { %5125 = vst [vmem:[#allocation9_spill] sm:$0xff] %v3195_v35  ;;  %v3312_v35 = vld [vmem:[%s3066_s17 + $0x9a] sm:$0xff] }
  0xca   : > { %678 = vperm.xlu2 %3005, %v498_v36   ;;  %673 = vperm.xlu1 %3004, %v497_v38  }
  0xcb   : > { %668 = vperm.xlu0 %3003, %v496_v39   ;;  %v3291_v39 = vld [vmem:[%s3066_s17 + $0x8a] sm:$0xff] }
  0xcc   : > { %v3200_v40 = vpop.permute.xlu2 %513  ;;  %v3202_v42 = vpop.permute.xlu1 %350 }
  0xcd   : > { %5126 = vst [vmem:[#allocation10_spill] sm:$0xff] %v3202_v42  ;;  %v3204_v43 = vpop.permute.xlu0 %345  ;;  %v3309_v42 = vld [vmem:[%s3066_s17 + $0xa2] sm:$0xff] }
  0xce   : > { %5127 = vst [vmem:[#allocation11_spill] sm:$0xff] %v3204_v43 }
  0xd2   : > { %806 = vperm.xlu2 %3005, %v3207_v44   ;;  %801 = vperm.xlu1 %3004, %v757_v46   ;;  %v3294_v46 = vld [vmem:[%s3066_s17 + $0x82] sm:$0xff] }
  0xd3   : > { %796 = vperm.xlu0 %3003, %v756_v47   ;;  %v3297_v47 = vld [vmem:[%s3066_s17 + $0x7a] sm:$0xff] }
  0xd4   : > { %v3212_v48 = vpop.permute.xlu2 %528  ;;  %v3214_v52 = vpop.permute.xlu1 %365 }
  0xd5   : > { %5128 = vst [vmem:[#allocation12_spill] sm:$0xff] %v3212_v48  ;;  %v3216_v53 = vpop.permute.xlu0 %360  ;;  %v3405_v48 = vld [vmem:[%s3066_s17 + $0x10a] sm:$0xff] }
  0xd6   : > { %5129 = vst [vmem:[#allocation13_spill] sm:$0xff] %v3214_v52 }
  0xd7   : > { %5130 = vst [vmem:[#allocation14_spill] sm:$0xff] %v3216_v53 }
  0xda   : > { %821 = vperm.xlu2 %3005, %v3219_v54   ;;  %816 = vperm.xlu1 %3004, %v3222_v58  }
  0xdb   : > { %811 = vperm.xlu0 %3003, %v3225_v59  }
  0xdc   : > { %v3230_v60 = vpop.permute.xlu2 %543  ;;  %v3232_v0 = vpop.permute.xlu1 %380 }
  0xdd   : > { %5131 = vst [vmem:[#allocation15_spill] sm:$0xff] %v3230_v60  ;;  %v3234_v1 = vpop.permute.xlu0 %375  ;;  %v3384_v60 = vld [vmem:[%s3066_s17 + $0xfa] sm:$0xff] }
  0xde   : > { %5132 = vst [vmem:[#allocation16_spill] sm:$0xff] %v3232_v0  ;;  %v3345_v0 = vld [vmem:[%s3066_s17 + $0xd2] sm:$0xff] }
  0xdf   : > { %5133 = vst [vmem:[#allocation17_spill] sm:$0xff] %v3234_v1  ;;  %v3333_v1 = vld [vmem:[%s3066_s17 + $0xaa] sm:$0xff] }
  0xe2   : > { %836 = vperm.xlu2 %3005, %v3237_v2   ;;  %831 = vperm.xlu1 %3004, %v3240_v6  }
  0xe3   : > { %826 = vperm.xlu0 %3003, %v3243_v7  }
  0xe4   : > { %v3248_v8 = vpop.permute.xlu2 %558  ;;  %v3250_v12 = vpop.permute.xlu1 %508 }
  0xe5   : > { %5134 = vst [vmem:[#allocation18_spill] sm:$0xff] %v3248_v8  ;;  %v3252_v13 = vpop.permute.xlu0 %503  ;;  %v3381_v8 = vld [vmem:[%s3066_s17 + $0x102] sm:$0xff] }
  0xe6   : > { %5135 = vst [vmem:[#allocation19_spill] sm:$0xff] %v3250_v12  ;;  %v3369_v12 = vld [vmem:[%s3066_s17 + $0xda] sm:$0xff] }
  0xe7   : > { %5136 = vst [vmem:[#allocation20_spill] sm:$0xff] %v3252_v13  ;;  %v3366_v13 = vld [vmem:[%s3066_s17 + $0xe2] sm:$0xff] }
  0xea   : > { %851 = vperm.xlu2 %3005, %v3255_v14   ;;  %846 = vperm.xlu1 %3004, %v3258_v18  }
  0xeb   : > { %841 = vperm.xlu0 %3003, %v3261_v19  }
  0xec   : > { %v3266_v20 = vpop.permute.xlu2 %573  ;;  %v3268_v24 = vpop.permute.xlu1 %523 }
  0xed   : > { %5137 = vst [vmem:[#allocation21_spill] sm:$0xff] %v3266_v20  ;;  %v3270_v25 = vpop.permute.xlu0 %518  ;;  %v3363_v20 = vld [vmem:[%s3066_s17 + $0xea] sm:$0xff] }
  0xee   : > { %5138 = vst [vmem:[#allocation22_spill] sm:$0xff] %v3268_v24  ;;  %v3351_v24 = vld [vmem:[%s3066_s17 + $0xc2] sm:$0xff] }
  0xef   : > { %5139 = vst [vmem:[#allocation23_spill] sm:$0xff] %v3270_v25  ;;  %v3348_v25 = vld [vmem:[%s3066_s17 + $0xca] sm:$0xff] }
  0xf2   : > { %866 = vperm.xlu2 %3005, %v3273_v26   ;;  %861 = vperm.xlu1 %3004, %v3276_v30  }
  0xf3   : > { %856 = vperm.xlu0 %3003, %v3279_v31  }
  0xf4   : > { %v3284_v32 = vpop.permute.xlu2 %588  ;;  %v3286_v36 = vpop.permute.xlu1 %538 }
  0xf5   : > { %5140 = vst [vmem:[#allocation24_spill] sm:$0xff] %v3284_v32  ;;  %v3288_v38 = vpop.permute.xlu0 %533  ;;  %v3330_v32 = vld [vmem:[%s3066_s17 + $0xb2] sm:$0xff] }
  0xf6   : > { %5141 = vst [vmem:[#allocation25_spill] sm:$0xff] %v3286_v36  ;;  %v3327_v36 = vld [vmem:[%s3066_s17 + $0xba] sm:$0xff] }
  0xf7   : > { %5142 = vst [vmem:[#allocation26_spill] sm:$0xff] %v3288_v38  ;;  %v3315_v38 = vld [vmem:[%s3066_s17 + $0x92] sm:$0xff] }
  0xfa   : > { %881 = vperm.xlu2 %3005, %v3291_v39   ;;  %876 = vperm.xlu1 %3004, %v3294_v46  }
  0xfb   : > { %871 = vperm.xlu0 %3003, %v3297_v47  }
  0xfc   : > { %v3302_v53 = vpop.permute.xlu2 %603  ;;  %v3304_v52 = vpop.permute.xlu1 %553 }
  0xfd   : > { %5143 = vst [vmem:[#allocation27_spill] sm:$0xff] %v3302_v53  ;;  %v3306_v43 = vpop.permute.xlu0 %548 }
  0xfe   : > { %5144 = vst [vmem:[#allocation28_spill] sm:$0xff] %v3304_v52 }
  0xff   : > { %5145 = vst [vmem:[#allocation29_spill] sm:$0xff] %v3306_v43 }
 0x102   : > { %896 = vperm.xlu2 %3005, %v3309_v42   ;;  %891 = vperm.xlu1 %3004, %v3312_v35  }
 0x103   : > { %886 = vperm.xlu0 %3003, %v3315_v38  }
 0x104   : > { %v3320_v53 = vpop.permute.xlu2 %618  ;;  %v3322_v52 = vpop.permute.xlu1 %568 }
 0x105   : > { %5146 = vst [vmem:[#allocation30_spill] sm:$0xff] %v3320_v53  ;;  %v3324_v43 = vpop.permute.xlu0 %563 }
 0x106   : > { %5147 = vst [vmem:[#allocation31_spill] sm:$0xff] %v3322_v52 }
 0x107   : > { %5148 = vst [vmem:[#allocation32_spill] sm:$0xff] %v3324_v43 }
 0x10a   : > { %911 = vperm.xlu2 %3005, %v3327_v36   ;;  %906 = vperm.xlu1 %3004, %v3330_v32  }
 0x10b   : > { %901 = vperm.xlu0 %3003, %v3333_v1  }
 0x10c   : > { %v3338_v53 = vpop.permute.xlu2 %633  ;;  %v3340_v52 = vpop.permute.xlu1 %583 }
 0x10d   : > { %5149 = vst [vmem:[#allocation33_spill] sm:$0xff] %v3338_v53  ;;  %v3342_v43 = vpop.permute.xlu0 %578 }
 0x10e   : > { %5150 = vst [vmem:[#allocation34_spill] sm:$0xff] %v3340_v52 }
 0x10f   : > { %5151 = vst [vmem:[#allocation35_spill] sm:$0xff] %v3342_v43 }
 0x112   : > { %926 = vperm.xlu2 %3005, %v3345_v0   ;;  %921 = vperm.xlu1 %3004, %v3348_v25  }
 0x113   : > { %916 = vperm.xlu0 %3003, %v3351_v24  }
 0x114   : > { %v3356_v53 = vpop.permute.xlu2 %648  ;;  %v3358_v52 = vpop.permute.xlu1 %598 }
 0x115   : > { %5152 = vst [vmem:[#allocation36_spill] sm:$0xff] %v3356_v53  ;;  %v3360_v43 = vpop.permute.xlu0 %593 }
 0x116   : > { %5153 = vst [vmem:[#allocation37_spill] sm:$0xff] %v3358_v52 }
 0x117   : > { %5154 = vst [vmem:[#allocation38_spill] sm:$0xff] %v3360_v43 }
 0x11a   : > { %941 = vperm.xlu2 %3005, %v3363_v20   ;;  %936 = vperm.xlu1 %3004, %v3366_v13  }
 0x11b   : > { %931 = vperm.xlu0 %3003, %v3369_v12  }
 0x11c   : > { %v3374_v53 = vpop.permute.xlu2 %663  ;;  %v3376_v52 = vpop.permute.xlu1 %613 }
 0x11d   : > { %5155 = vst [vmem:[#allocation39_spill] sm:$0xff] %v3374_v53  ;;  %v3378_v43 = vpop.permute.xlu0 %608 }
 0x11e   : > { %5156 = vst [vmem:[#allocation40_spill] sm:$0xff] %v3376_v52  ;;  %v3399_v52 = vld [vmem:[%s3066_s17 + $0x11a] sm:$0xff] }
 0x11f   : > { %5157 = vst [vmem:[#allocation41_spill] sm:$0xff] %v3378_v43  ;;  %v3402_v43 = vld [vmem:[%s3066_s17 + $0x112] sm:$0xff] }
 0x122   : > { %956 = vperm.xlu2 %3005, %v3381_v8   ;;  %951 = vperm.xlu1 %3004, %v3384_v60  }
 0x123   : > { %946 = vperm.xlu0 %3003, %v3387_v34  }
 0x124   : > { %v3392_v29 = vpop.permute.xlu2 %678  ;;  %v3394_v28 = vpop.permute.xlu1 %628 }
 0x125   : > { %5158 = vst [vmem:[#allocation42_spill] sm:$0xff] %v3394_v28  ;;  %v3396_v53 = vpop.permute.xlu0 %623 }
 0x126   : > { %5159 = vst [vmem:[#allocation43_spill] sm:$0xff] %v3396_v53 }
 0x12a   : > { %971 = vperm.xlu2 %3005, %v3399_v52   ;;  %966 = vperm.xlu1 %3004, %v3402_v43  }
 0x12b   : > { %961 = vperm.xlu0 %3003, %v3405_v48  }
 0x12c   : > { %v3410_v27 = vpop.permute.xlu2 %806  ;;  %v3412_v23 = vpop.permute.xlu1 %643 }
 0x12d   : > { %5160 = vst [vmem:[#allocation44_spill] sm:$0xff] %v3410_v27  ;;  %v3414_v22 = vpop.permute.xlu0 %638 }
 0x12e   : > { %5161 = vst [vmem:[#allocation45_spill] sm:$0xff] %v3412_v23 }
 0x12f   : > { %5162 = vst [vmem:[#allocation46_spill] sm:$0xff] %v3414_v22 }
 0x132   : > { %1099 = vperm.xlu2 %3005, %v3222_v58   ;;  %1094 = vperm.xlu1 %3004, %v3225_v59  }
 0x133   : > { %1089 = vperm.xlu0 %3003, %v3207_v44  }
 0x134   : > { %v3419_v53 = vpop.permute.xlu2 %821  ;;  %v3421_v28 = vpop.permute.xlu1 %658 }
 0x135   : > { %5163 = vst [vmem:[#allocation47_spill] sm:$0xff] %v3419_v53  ;;  %v3423_v21 = vpop.permute.xlu0 %653 }
 0x136   : > { %5164 = vst [vmem:[#allocation48_spill] sm:$0xff] %v3421_v28  ;;  %v1343_v28 = vld [vmem:[%s3066_s17 + $0x1b] sm:$0xff] }
 0x137   : > { %5165 = vst [vmem:[#allocation49_spill] sm:$0xff] %v3423_v21  ;;  %v1344_v21 = vld [vmem:[%s3066_s17 + $0x23] sm:$0xff] }
 0x13a   : > { %1114 = vperm.xlu2 %3005, %v3240_v6   ;;  %1109 = vperm.xlu1 %3004, %v3243_v7  }
 0x13b   : > { %1104 = vperm.xlu0 %3003, %v3219_v54  }
 0x13c   : > { %v3428_v23 = vpop.permute.xlu2 %836  ;;  %v3430_v22 = vpop.permute.xlu1 %673 }
 0x13d   : > { %5166 = vst [vmem:[#allocation50_spill] sm:$0xff] %v3428_v23  ;;  %v3432_v58 = vpop.permute.xlu0 %668  ;;  %v3807_v23 = vld [vmem:[%s3066_s17 + $0x114] sm:$0xff] }
 0x13e   : > { %5167 = vst [vmem:[#allocation51_spill] sm:$0xff] %v3430_v22  ;;  %v3795_v22 = vld [vmem:[%s3066_s17 + $0xec] sm:$0xff] }
 0x13f   : > { %5168 = vst [vmem:[#allocation52_spill] sm:$0xff] %v3432_v58  ;;  %v3792_v58 = vld [vmem:[%s3066_s17 + $0xf4] sm:$0xff] }
 0x140   : > { %5263 = vst [vmem:[#allocation147_spill] sm:$0xff] %v3807_v23 }
 0x142   : > { %1129 = vperm.xlu2 %3005, %v3258_v18   ;;  %1124 = vperm.xlu1 %3004, %v3261_v19  }
 0x143   : > { %1119 = vperm.xlu0 %3003, %v3237_v2  }
 0x144   : > { %v3437_v44 = vpop.permute.xlu2 %851  ;;  %v3439_v59 = vpop.permute.xlu1 %801 }
 0x145   : > { %5169 = vst [vmem:[#allocation53_spill] sm:$0xff] %v3437_v44  ;;  %v3441_v6 = vpop.permute.xlu0 %796  ;;  %v3756_v44 = vld [vmem:[%s3066_s17 + $0xc4] sm:$0xff] }
 0x146   : > { %5170 = vst [vmem:[#allocation54_spill] sm:$0xff] %v3439_v59  ;;  %v3741_v59 = vld [vmem:[%s3066_s17 + $0xa4] sm:$0xff] }
 0x147   : > { %5171 = vst [vmem:[#allocation55_spill] sm:$0xff] %v3441_v6  ;;  %v3738_v6 = vld [vmem:[%s3066_s17 + $0xac] sm:$0xff] }
 0x14a   : > { %1144 = vperm.xlu2 %3005, %v3276_v30   ;;  %1139 = vperm.xlu1 %3004, %v3279_v31  }
 0x14b   : > { %1134 = vperm.xlu0 %3003, %v3255_v14  }
 0x14c   : > { %v3446_v54 = vpop.permute.xlu2 %866  ;;  %v3448_v7 = vpop.permute.xlu1 %816 }
 0x14d   : > { %5172 = vst [vmem:[#allocation56_spill] sm:$0xff] %v3446_v54  ;;  %v3450_v18 = vpop.permute.xlu0 %811  ;;  %v3702_v54 = vld [vmem:[%s3066_s17 + $0x7c] sm:$0xff] }
 0x14e   : > { %5173 = vst [vmem:[#allocation57_spill] sm:$0xff] %v3448_v7 }
 0x14f   : > { %5174 = vst [vmem:[#allocation58_spill] sm:$0xff] %v3450_v18 }
 0x152   : > { %1159 = vperm.xlu2 %3005, %v3294_v46   ;;  %1154 = vperm.xlu1 %3004, %v3297_v47  }
 0x153   : > { %1149 = vperm.xlu0 %3003, %v3273_v26  }
 0x154   : > { %v3455_v2 = vpop.permute.xlu2 %881  ;;  %v3457_v19 = vpop.permute.xlu1 %831 }
 0x155   : > { %5175 = vst [vmem:[#allocation59_spill] sm:$0xff] %v3455_v2  ;;  %v3459_v30 = vpop.permute.xlu0 %826  ;;  %v3681_v2 = vld [vmem:[%s3066_s17 + $0x6c] sm:$0xff] }
 0x156   : > { %5176 = vst [vmem:[#allocation60_spill] sm:$0xff] %v3457_v19 }
 0x157   : > { %5177 = vst [vmem:[#allocation61_spill] sm:$0xff] %v3459_v30 }
 0x15a   : > { %1174 = vperm.xlu2 %3005, %v3312_v35   ;;  %1169 = vperm.xlu1 %3004, %v3315_v38  }
 0x15b   : > { %1164 = vperm.xlu0 %3003, %v3291_v39  }
 0x15c   : > { %v3464_v14 = vpop.permute.xlu2 %896  ;;  %v3466_v31 = vpop.permute.xlu1 %846 }
 0x15d   : > { %5178 = vst [vmem:[#allocation62_spill] sm:$0xff] %v3464_v14  ;;  %v3468_v46 = vpop.permute.xlu0 %841  ;;  %v1635_v14 = vld [vmem:[%s3066_s17 + $0x14] sm:$0xff] }
 0x15e   : > { %5179 = vst [vmem:[#allocation63_spill] sm:$0xff] %v3466_v31  ;;  %v1364_v31 = vld [vmem:[%s3066_s17 + $0xc3] sm:$0xff] }
 0x15f   : > { %5180 = vst [vmem:[#allocation64_spill] sm:$0xff] %v3468_v46  ;;  %v1360_v46 = vld [vmem:[%s3066_s17 + $0xa3] sm:$0xff] }
 0x162   : > { %1189 = vperm.xlu2 %3005, %v3330_v32   ;;  %1184 = vperm.xlu1 %3004, %v3333_v1  }
 0x163   : > { %1179 = vperm.xlu0 %3003, %v3309_v42  }
 0x164   : > { %v3473_v26 = vpop.permute.xlu2 %911  ;;  %v3475_v47 = vpop.permute.xlu1 %861 }
 0x165   : > { %5181 = vst [vmem:[#allocation65_spill] sm:$0xff] %v3473_v26  ;;  %v3477_v35 = vpop.permute.xlu0 %856  ;;  %v1361_v26 = vld [vmem:[%s3066_s17 + $0xab] sm:$0xff] }
 0x166   : > { %5182 = vst [vmem:[#allocation66_spill] sm:$0xff] %v3475_v47  ;;  %v1362_v47 = vld [vmem:[%s3066_s17 + $0xb3] sm:$0xff] }
 0x167   : > { %5183 = vst [vmem:[#allocation67_spill] sm:$0xff] %v3477_v35  ;;  %v1357_v35 = vld [vmem:[%s3066_s17 + $0x8b] sm:$0xff] }
 0x16a   : > { %1204 = vperm.xlu2 %3005, %v3348_v25   ;;  %1199 = vperm.xlu1 %3004, %v3351_v24  }
 0x16b   : > { %1194 = vperm.xlu0 %3003, %v3327_v36   ;;  %v1083_v36 = vld [vmem:[%s3066_s17 + $0x122] sm:$0xff] }
 0x16c   : > { %v3482_v38 = vpop.permute.xlu2 %926  ;;  %v3484_v39 = vpop.permute.xlu1 %876 }
 0x16d   : > { %5184 = vst [vmem:[#allocation68_spill] sm:$0xff] %v3482_v38  ;;  %v3486_v32 = vpop.permute.xlu0 %871  ;;  %v1358_v38 = vld [vmem:[%s3066_s17 + $0x93] sm:$0xff] }
 0x16e   : > { %5185 = vst [vmem:[#allocation69_spill] sm:$0xff] %v3484_v39  ;;  %v1359_v39 = vld [vmem:[%s3066_s17 + $0x9b] sm:$0xff] }
 0x16f   : > { %5186 = vst [vmem:[#allocation70_spill] sm:$0xff] %v3486_v32  ;;  %v1354_v32 = vld [vmem:[%s3066_s17 + $0x73] sm:$0xff] }
 0x172   : > { %1219 = vperm.xlu2 %3005, %v3366_v13   ;;  %1214 = vperm.xlu1 %3004, %v3369_v12  }
 0x173   : > { %1209 = vperm.xlu0 %3003, %v3345_v0  }
 0x174   : > { %v3491_v42 = vpop.permute.xlu2 %941  ;;  %v3493_v1 = vpop.permute.xlu1 %891 }
 0x175   : > { %5187 = vst [vmem:[#allocation71_spill] sm:$0xff] %v3491_v42  ;;  %v3495_v24 = vpop.permute.xlu0 %886  ;;  %v1355_v42 = vld [vmem:[%s3066_s17 + $0x7b] sm:$0xff] }
 0x176   : > { %5188 = vst [vmem:[#allocation72_spill] sm:$0xff] %v3493_v1  ;;  %v1356_v1 = vld [vmem:[%s3066_s17 + $0x83] sm:$0xff] }
 0x177   : > { %5189 = vst [vmem:[#allocation73_spill] sm:$0xff] %v3495_v24  ;;  %v1351_v24 = vld [vmem:[%s3066_s17 + $0x5b] sm:$0xff] }
 0x17a   : > { %1234 = vperm.xlu2 %3005, %v3384_v60   ;;  %1229 = vperm.xlu1 %3004, %v3387_v34  }
 0x17b   : > { %1224 = vperm.xlu0 %3003, %v3363_v20   ;;  %v1084_v20 = vld [vmem:[%s3066_s17 + $0x12a] sm:$0xff] }
 0x17c   : > { %v3500_v25 = vpop.permute.xlu2 %956  ;;  %v3502_v13 = vpop.permute.xlu1 %906 }
 0x17d   : > { %5190 = vst [vmem:[#allocation74_spill] sm:$0xff] %v3500_v25  ;;  %v3504_v0 = vpop.permute.xlu0 %901  ;;  %v1352_v25 = vld [vmem:[%s3066_s17 + $0x63] sm:$0xff] }
 0x17e   : > { %5191 = vst [vmem:[#allocation75_spill] sm:$0xff] %v3502_v13  ;;  %v1349_v13 = vld [vmem:[%s3066_s17 + $0x4b] sm:$0xff] }
 0x17f   : > { %5192 = vst [vmem:[#allocation76_spill] sm:$0xff] %v3504_v0  ;;  %v1346_v0 = vld [vmem:[%s3066_s17 + $0x33] sm:$0xff] }
 0x182   : > { %1249 = vperm.xlu2 %3005, %v3402_v43   ;;  %1244 = vperm.xlu1 %3004, %v3405_v48  }
 0x183   : > { %1239 = vperm.xlu0 %3003, %v3381_v8  }
 0x184   : > { %v3509_v60 = vpop.permute.xlu2 %971  ;;  %v3511_v34 = vpop.permute.xlu1 %921 }
 0x185   : > { %5193 = vst [vmem:[#allocation77_spill] sm:$0xff] %v3511_v34  ;;  %v3513_v12 = vpop.permute.xlu0 %916  ;;  %v1342_v34 = vld [vmem:[%s3066_s17 + $0x13] sm:$0xff] }
 0x186   : > { %5194 = vst [vmem:[#allocation78_spill] sm:$0xff] %v3513_v12  ;;  %v1347_v12 = vld [vmem:[%s3066_s17 + $0x3b] sm:$0xff] }
 0x18a   : > { %1264 = vperm.xlu2 %3005, %v1084_v20   ;;  %1259 = vperm.xlu1 %3004, %v1083_v36  }
 0x18b   : > { %1254 = vperm.xlu0 %3003, %v3399_v52  }
 0x18c   : > { %v3518_v43 = vpop.permute.xlu2 %1099  ;;  %v3520_v48 = vpop.permute.xlu1 %936 }
 0x18d   : > { %5195 = vst [vmem:[#allocation79_spill] sm:$0xff] %v3518_v43  ;;  %v3522_v8 = vpop.permute.xlu0 %931  ;;  %v3831_v43 = vld [vmem:[%s3066_s17 + $0x11c] sm:$0xff] }
 0x18e   : > { %5196 = vst [vmem:[#allocation80_spill] sm:$0xff] %v3520_v48  ;;  %v1345_v48 = vld [vmem:[%s3066_s17 + $0x2b] sm:$0xff] }
 0x18f   : > { %5197 = vst [vmem:[#allocation81_spill] sm:$0xff] %v3522_v8  ;;  %v1350_v8 = vld [vmem:[%s3066_s17 + $0x53] sm:$0xff] }
 0x192   : > { %1392 = vperm.xlu2 %3005, %v1344_v21   ;;  %1387 = vperm.xlu1 %3004, %v1343_v28  }
 0x193   : > { %1382 = vperm.xlu0 %3003, %v1342_v34  }
 0x194   : > { %v3527_v20 = vpop.permute.xlu2 %1114  ;;  %v3529_v36 = vpop.permute.xlu1 %951 }
 0x195   : > { %5198 = vst [vmem:[#allocation82_spill] sm:$0xff] %v3527_v20  ;;  %v3531_v52 = vpop.permute.xlu0 %946  ;;  %v3813_v20 = vld [vmem:[%s3066_s17 + $0x104] sm:$0xff] }
 0x196   : > { %5199 = vst [vmem:[#allocation83_spill] sm:$0xff] %v3529_v36  ;;  %v1348_v36 = vld [vmem:[%s3066_s17 + $0x43] sm:$0xff] }
 0x197   : > { %5200 = vst [vmem:[#allocation84_spill] sm:$0xff] %v3531_v52  ;;  %v1353_v52 = vld [vmem:[%s3066_s17 + $0x6b] sm:$0xff] }
 0x19a   : > { %1407 = vperm.xlu2 %3005, %v1347_v12   ;;  %1402 = vperm.xlu1 %3004, %v1346_v0  }
 0x19b   : > { %1397 = vperm.xlu0 %3003, %v1345_v48  }
 0x19c   : > { %v3536_v21 = vpop.permute.xlu2 %1129  ;;  %v3538_v28 = vpop.permute.xlu1 %966 }
 0x19d   : > { %5201 = vst [vmem:[#allocation85_spill] sm:$0xff] %v3536_v21  ;;  %v3540_v34 = vpop.permute.xlu0 %961  ;;  %v3789_v21 = vld [vmem:[%s3066_s17 + $0xfc] sm:$0xff] }
 0x19e   : > { %5202 = vst [vmem:[#allocation86_spill] sm:$0xff] %v3538_v28  ;;  %v3777_v28 = vld [vmem:[%s3066_s17 + $0xd4] sm:$0xff] }
 0x19f   : > { %5203 = vst [vmem:[#allocation87_spill] sm:$0xff] %v3540_v34  ;;  %v3774_v34 = vld [vmem:[%s3066_s17 + $0xdc] sm:$0xff] }
 0x1a2   : > { %1422 = vperm.xlu2 %3005, %v1350_v8   ;;  %1417 = vperm.xlu1 %3004, %v1349_v13  }
 0x1a3   : > { %1412 = vperm.xlu0 %3003, %v1348_v36  }
 0x1a4   : > { %v3545_v12 = vpop.permute.xlu2 %1144  ;;  %v3547_v0 = vpop.permute.xlu1 %1094 }
 0x1a5   : > { %5204 = vst [vmem:[#allocation88_spill] sm:$0xff] %v3545_v12  ;;  %v3549_v48 = vpop.permute.xlu0 %1089  ;;  %v3735_v12 = vld [vmem:[%s3066_s17 + $0xb4] sm:$0xff] }
 0x1a6   : > { %5205 = vst [vmem:[#allocation89_spill] sm:$0xff] %v3547_v0  ;;  %v3723_v0 = vld [vmem:[%s3066_s17 + $0x8c] sm:$0xff] }
 0x1a7   : > { %5206 = vst [vmem:[#allocation90_spill] sm:$0xff] %v3549_v48  ;;  %v3720_v48 = vld [vmem:[%s3066_s17 + $0x94] sm:$0xff] }
 0x1aa   : > { %1437 = vperm.xlu2 %3005, %v1353_v52   ;;  %1432 = vperm.xlu1 %3004, %v1352_v25  }
 0x1ab   : > { %1427 = vperm.xlu0 %3003, %v1351_v24  }
 0x1ac   : > { %v3554_v8 = vpop.permute.xlu2 %1159  ;;  %v3556_v13 = vpop.permute.xlu1 %1109 }
 0x1ad   : > { %5207 = vst [vmem:[#allocation91_spill] sm:$0xff] %v3554_v8  ;;  %v3558_v36 = vpop.permute.xlu0 %1104 }
 0x1ae   : > { %5208 = vst [vmem:[#allocation92_spill] sm:$0xff] %v3556_v13  ;;  %v3687_v13 = vld [vmem:[%s3066_s17 + $0x5c] sm:$0xff] }
 0x1af   : > { %5209 = vst [vmem:[#allocation93_spill] sm:$0xff] %v3558_v36  ;;  %v3684_v36 = vld [vmem:[%s3066_s17 + $0x64] sm:$0xff] }
 0x1b2   : > { %1452 = vperm.xlu2 %3005, %v1356_v1   ;;  %1447 = vperm.xlu1 %3004, %v1355_v42  }
 0x1b3   : > { %1442 = vperm.xlu0 %3003, %v1354_v32  }
 0x1b4   : > { %v3563_v52 = vpop.permute.xlu2 %1174  ;;  %v3565_v25 = vpop.permute.xlu1 %1124 }
 0x1b5   : > { %5210 = vst [vmem:[#allocation94_spill] sm:$0xff] %v3563_v52  ;;  %v3567_v24 = vpop.permute.xlu0 %1119 }
 0x1b6   : > { %5211 = vst [vmem:[#allocation95_spill] sm:$0xff] %v3565_v25  ;;  %v3669_v25 = vld [vmem:[%s3066_s17 + $0x44] sm:$0xff] }
 0x1b7   : > { %5212 = vst [vmem:[#allocation96_spill] sm:$0xff] %v3567_v24  ;;  %v3666_v24 = vld [vmem:[%s3066_s17 + $0x4c] sm:$0xff] }
 0x1ba   : > { %1467 = vperm.xlu2 %3005, %v1359_v39   ;;  %1462 = vperm.xlu1 %3004, %v1358_v38  }
 0x1bb   : > { %1457 = vperm.xlu0 %3003, %v1357_v35  }
 0x1bc   : > { %v3572_v1 = vpop.permute.xlu2 %1189  ;;  %v3574_v42 = vpop.permute.xlu1 %1139 }
 0x1bd   : > { %5213 = vst [vmem:[#allocation97_spill] sm:$0xff] %v3572_v1  ;;  %v3576_v32 = vpop.permute.xlu0 %1134  ;;  %v1365_v1 = vld [vmem:[%s3066_s17 + $0xcb] sm:$0xff] }
 0x1be   : > { %5214 = vst [vmem:[#allocation98_spill] sm:$0xff] %v3574_v42  ;;  %v1363_v42 = vld [vmem:[%s3066_s17 + $0xbb] sm:$0xff] }
 0x1bf   : > { %5215 = vst [vmem:[#allocation99_spill] sm:$0xff] %v3576_v32  ;;  %v1367_v32 = vld [vmem:[%s3066_s17 + $0xdb] sm:$0xff] }
 0x1c2   : > { %1482 = vperm.xlu2 %3005, %v1362_v47   ;;  %1477 = vperm.xlu1 %3004, %v1361_v26  }
 0x1c3   : > { %1472 = vperm.xlu0 %3003, %v1360_v46  }
 0x1c4   : > { %v3581_v39 = vpop.permute.xlu2 %1204  ;;  %v3583_v38 = vpop.permute.xlu1 %1154 }
 0x1c5   : > { %5216 = vst [vmem:[#allocation100_spill] sm:$0xff] %v3581_v39  ;;  %v3585_v35 = vpop.permute.xlu0 %1149  ;;  %v1368_v39 = vld [vmem:[%s3066_s17 + $0xe3] sm:$0xff] }
 0x1c6   : > { %5217 = vst [vmem:[#allocation101_spill] sm:$0xff] %v3583_v38  ;;  %v1366_v38 = vld [vmem:[%s3066_s17 + $0xd3] sm:$0xff] }
 0x1c7   : > { %5218 = vst [vmem:[#allocation102_spill] sm:$0xff] %v3585_v35  ;;  %v1370_v35 = vld [vmem:[%s3066_s17 + $0xf3] sm:$0xff] }
 0x1ca   : > { %1497 = vperm.xlu2 %3005, %v1365_v1   ;;  %1492 = vperm.xlu1 %3004, %v1364_v31  }
 0x1cb   : > { %1487 = vperm.xlu0 %3003, %v1363_v42  }
 0x1cc   : > { %v3590_v47 = vpop.permute.xlu2 %1219  ;;  %v3592_v26 = vpop.permute.xlu1 %1169 }
 0x1cd   : > { %5219 = vst [vmem:[#allocation103_spill] sm:$0xff] %v3590_v47  ;;  %v3594_v46 = vpop.permute.xlu0 %1164  ;;  %v1371_v47 = vld [vmem:[%s3066_s17 + $0xfb] sm:$0xff] }
 0x1ce   : > { %5220 = vst [vmem:[#allocation104_spill] sm:$0xff] %v3592_v26  ;;  %v1369_v26 = vld [vmem:[%s3066_s17 + $0xeb] sm:$0xff] }
 0x1cf   : > { %5221 = vst [vmem:[#allocation105_spill] sm:$0xff] %v3594_v46  ;;  %v1373_v46 = vld [vmem:[%s3066_s17 + $0x10b] sm:$0xff] }
 0x1d2   : > { %1512 = vperm.xlu2 %3005, %v1368_v39   ;;  %1507 = vperm.xlu1 %3004, %v1367_v32  }
 0x1d3   : > { %1502 = vperm.xlu0 %3003, %v1366_v38  }
 0x1d4   : > { %v3599_v1 = vpop.permute.xlu2 %1234  ;;  %v3601_v31 = vpop.permute.xlu1 %1184 }
 0x1d5   : > { %5222 = vst [vmem:[#allocation106_spill] sm:$0xff] %v3599_v1  ;;  %v3603_v42 = vpop.permute.xlu0 %1179  ;;  %v1374_v1 = vld [vmem:[%s3066_s17 + $0x113] sm:$0xff] }
 0x1d6   : > { %5223 = vst [vmem:[#allocation107_spill] sm:$0xff] %v3601_v31  ;;  %v1372_v31 = vld [vmem:[%s3066_s17 + $0x103] sm:$0xff] }
 0x1d7   : > { %5224 = vst [vmem:[#allocation108_spill] sm:$0xff] %v3603_v42  ;;  %v1376_v42 = vld [vmem:[%s3066_s17 + $0x123] sm:$0xff] }
 0x1da   : > { %1527 = vperm.xlu2 %3005, %v1371_v47   ;;  %1522 = vperm.xlu1 %3004, %v1370_v35  }
 0x1db   : > { %1517 = vperm.xlu0 %3003, %v1369_v26  }
 0x1dc   : > { %v3608_v39 = vpop.permute.xlu2 %1249  ;;  %v3610_v32 = vpop.permute.xlu1 %1199 }
 0x1dd   : > { %5225 = vst [vmem:[#allocation109_spill] sm:$0xff] %v3608_v39  ;;  %v3612_v38 = vpop.permute.xlu0 %1194  ;;  %v1377_v39 = vld [vmem:[%s3066_s17 + $0x12b] sm:$0xff] }
 0x1de   : > { %5226 = vst [vmem:[#allocation110_spill] sm:$0xff] %v3610_v32  ;;  %v1375_v32 = vld [vmem:[%s3066_s17 + $0x11b] sm:$0xff] }
 0x1df   : > { %5227 = vst [vmem:[#allocation111_spill] sm:$0xff] %v3612_v38  ;;  %v3633_v38 = vld [vmem:[%s3066_s17 + $0x24] sm:$0xff] }
 0x1e2   : > { %1542 = vperm.xlu2 %3005, %v1374_v1   ;;  %1537 = vperm.xlu1 %3004, %v1373_v46  }
 0x1e3   : > { %1532 = vperm.xlu0 %3003, %v1372_v31  }
 0x1e4   : > { %v3617_v47 = vpop.permute.xlu2 %1264  ;;  %v3619_v35 = vpop.permute.xlu1 %1214 }
 0x1e5   : > { %5228 = vst [vmem:[#allocation112_spill] sm:$0xff] %v3619_v35  ;;  %v3621_v26 = vpop.permute.xlu0 %1209  ;;  %v1636_v35 = vld [vmem:[%s3066_s17 + $0x1c] sm:$0xff] }
 0x1e6   : > { %5229 = vst [vmem:[#allocation113_spill] sm:$0xff] %v3621_v26  ;;  %v3651_v26 = vld [vmem:[%s3066_s17 + $0x2c] sm:$0xff] }
 0x1ea   : > { %1557 = vperm.xlu2 %3005, %v1377_v39   ;;  %1552 = vperm.xlu1 %3004, %v1376_v42  }
 0x1eb   : > { %1547 = vperm.xlu0 %3003, %v1375_v32  }
 0x1ec   : > { %v3626_v1 = vpop.permute.xlu2 %1392  ;;  %v3628_v46 = vpop.permute.xlu1 %1229 }
 0x1ed   : > { %5230 = vst [vmem:[#allocation114_spill] sm:$0xff] %v3626_v1  ;;  %v3630_v31 = vpop.permute.xlu0 %1224 }
 0x1ee   : > { %5231 = vst [vmem:[#allocation115_spill] sm:$0xff] %v3628_v46  ;;  %v3645_v46 = vld [vmem:[%s3066_s17 + $0x3c] sm:$0xff] }
 0x1ef   : > { %5232 = vst [vmem:[#allocation116_spill] sm:$0xff] %v3630_v31  ;;  %v3648_v31 = vld [vmem:[%s3066_s17 + $0x34] sm:$0xff] }
 0x1f2   : > { %1685 = vperm.xlu2 %3005, %v3633_v38   ;;  %1680 = vperm.xlu1 %3004, %v1636_v35  }
 0x1f3   : > { %1675 = vperm.xlu0 %3003, %v1635_v14  }
 0x1f4   : > { %v3638_v42 = vpop.permute.xlu2 %1407  ;;  %v3640_v39 = vpop.permute.xlu1 %1244 }
 0x1f5   : > { %5233 = vst [vmem:[#allocation117_spill] sm:$0xff] %v3638_v42  ;;  %v3642_v32 = vpop.permute.xlu0 %1239  ;;  %v3810_v42 = vld [vmem:[%s3066_s17 + $0x10c] sm:$0xff] }
 0x1f6   : > { %5234 = vst [vmem:[#allocation118_spill] sm:$0xff] %v3640_v39  ;;  %v3663_v39 = vld [vmem:[%s3066_s17 + $0x54] sm:$0xff] }
 0x1f7   : > { %5235 = vst [vmem:[#allocation119_spill] sm:$0xff] %v3642_v32 }
 0x1fa   : > { %1700 = vperm.xlu2 %3005, %v3645_v46   ;;  %1695 = vperm.xlu1 %3004, %v3648_v31  }
 0x1fb   : > { %1690 = vperm.xlu0 %3003, %v3651_v26  }
 0x1fc   : > { %v3656_v14 = vpop.permute.xlu2 %1422  ;;  %v3658_v35 = vpop.permute.xlu1 %1259 }
 0x1fd   : > { %5236 = vst [vmem:[#allocation120_spill] sm:$0xff] %v3656_v14  ;;  %v3660_v32 = vpop.permute.xlu0 %1254  ;;  %v3771_v14 = vld [vmem:[%s3066_s17 + $0xe4] sm:$0xff] }
 0x1fe   : > { %5237 = vst [vmem:[#allocation121_spill] sm:$0xff] %v3658_v35  ;;  %v3759_v35 = vld [vmem:[%s3066_s17 + $0xbc] sm:$0xff] }
 0x1ff   : > { %5238 = vst [vmem:[#allocation122_spill] sm:$0xff] %v3660_v32  ;;  %v3753_v32 = vld [vmem:[%s3066_s17 + $0xcc] sm:$0xff] }
 0x202   : > { %1715 = vperm.xlu2 %3005, %v3663_v39   ;;  %1710 = vperm.xlu1 %3004, %v3666_v24  }
 0x203   : > { %1705 = vperm.xlu0 %3003, %v3669_v25  }
 0x204   : > { %v3674_v52 = vpop.permute.xlu2 %1437  ;;  %v3676_v30 = vpop.permute.xlu1 %1387 }
 0x205   : > { %5239 = vst [vmem:[#allocation123_spill] sm:$0xff] %v3674_v52  ;;  %v3678_v19 = vpop.permute.xlu0 %1382  ;;  %v3717_v52 = vld [vmem:[%s3066_s17 + $0x9c] sm:$0xff] }
 0x206   : > { %5240 = vst [vmem:[#allocation124_spill] sm:$0xff] %v3676_v30  ;;  %v3705_v30 = vld [vmem:[%s3066_s17 + $0x74] sm:$0xff] }
 0x207   : > { %5241 = vst [vmem:[#allocation125_spill] sm:$0xff] %v3678_v19  ;;  %v3699_v19 = vld [vmem:[%s3066_s17 + $0x84] sm:$0xff] }
 0x20a   : > { %1730 = vperm.xlu2 %3005, %v3681_v2   ;;  %1725 = vperm.xlu1 %3004, %v3684_v36  }
 0x20b   : > { %1720 = vperm.xlu0 %3003, %v3687_v13  }
 0x20c   : > { %v3692_v8 = vpop.permute.xlu2 %1452  ;;  %v3694_v18 = vpop.permute.xlu1 %1402 }
 0x20d   : > { %5242 = vst [vmem:[#allocation126_spill] sm:$0xff] %v3692_v8  ;;  %v3696_v7 = vpop.permute.xlu0 %1397 }
 0x20e   : > { %5243 = vst [vmem:[#allocation127_spill] sm:$0xff] %v3694_v18 }
 0x20f   : > { %5244 = vst [vmem:[#allocation128_spill] sm:$0xff] %v3696_v7 }
 0x212   : > { %1745 = vperm.xlu2 %3005, %v3699_v19   ;;  %1740 = vperm.xlu1 %3004, %v3702_v54  }
 0x213   : > { %1735 = vperm.xlu0 %3003, %v3705_v30  }
 0x214   : > { %v3710_v8 = vpop.permute.xlu2 %1467  ;;  %v3712_v18 = vpop.permute.xlu1 %1417 }
 0x215   : > { %5245 = vst [vmem:[#allocation129_spill] sm:$0xff] %v3710_v8  ;;  %v3714_v7 = vpop.permute.xlu0 %1412 }
 0x216   : > { %5246 = vst [vmem:[#allocation130_spill] sm:$0xff] %v3712_v18 }
 0x217   : > { %5247 = vst [vmem:[#allocation131_spill] sm:$0xff] %v3714_v7 }
 0x21a   : > { %1760 = vperm.xlu2 %3005, %v3717_v52   ;;  %1755 = vperm.xlu1 %3004, %v3720_v48  }
 0x21b   : > { %1750 = vperm.xlu0 %3003, %v3723_v0  }
 0x21c   : > { %v3728_v8 = vpop.permute.xlu2 %1482  ;;  %v3730_v18 = vpop.permute.xlu1 %1432 }
 0x21d   : > { %5248 = vst [vmem:[#allocation132_spill] sm:$0xff] %v3728_v8  ;;  %v3732_v7 = vpop.permute.xlu0 %1427 }
 0x21e   : > { %5249 = vst [vmem:[#allocation133_spill] sm:$0xff] %v3730_v18 }
 0x21f   : > { %5250 = vst [vmem:[#allocation134_spill] sm:$0xff] %v3732_v7 }
 0x222   : > { %1775 = vperm.xlu2 %3005, %v3735_v12   ;;  %1770 = vperm.xlu1 %3004, %v3738_v6  }
 0x223   : > { %1765 = vperm.xlu0 %3003, %v3741_v59  }
 0x224   : > { %v3746_v8 = vpop.permute.xlu2 %1497  ;;  %v3748_v18 = vpop.permute.xlu1 %1447 }
 0x225   : > { %5251 = vst [vmem:[#allocation135_spill] sm:$0xff] %v3746_v8  ;;  %v3750_v7 = vpop.permute.xlu0 %1442 }
 0x226   : > { %5252 = vst [vmem:[#allocation136_spill] sm:$0xff] %v3748_v18 }
 0x227   : > { %5253 = vst [vmem:[#allocation137_spill] sm:$0xff] %v3750_v7 }
 0x22a   : > { %1790 = vperm.xlu2 %3005, %v3753_v32   ;;  %1785 = vperm.xlu1 %3004, %v3756_v44  }
 0x22b   : > { %1780 = vperm.xlu0 %3003, %v3759_v35  }
 0x22c   : > { %v3764_v8 = vpop.permute.xlu2 %1512  ;;  %v3766_v18 = vpop.permute.xlu1 %1462 }
 0x22d   : > { %5254 = vst [vmem:[#allocation138_spill] sm:$0xff] %v3764_v8  ;;  %v3768_v7 = vpop.permute.xlu0 %1457 }
 0x22e   : > { %5255 = vst [vmem:[#allocation139_spill] sm:$0xff] %v3766_v18 }
 0x22f   : > { %5256 = vst [vmem:[#allocation140_spill] sm:$0xff] %v3768_v7 }
 0x232   : > { %1805 = vperm.xlu2 %3005, %v3771_v14   ;;  %1800 = vperm.xlu1 %3004, %v3774_v34  }
 0x233   : > { %1795 = vperm.xlu0 %3003, %v3777_v28  }
 0x234   : > { %v3782_v8 = vpop.permute.xlu2 %1527  ;;  %v3784_v18 = vpop.permute.xlu1 %1477 }
 0x235   : > { %5257 = vst [vmem:[#allocation141_spill] sm:$0xff] %v3782_v8  ;;  %v3786_v7 = vpop.permute.xlu0 %1472 }
 0x236   : > { %5258 = vst [vmem:[#allocation142_spill] sm:$0xff] %v3784_v18 }
 0x237   : > { %5259 = vst [vmem:[#allocation143_spill] sm:$0xff] %v3786_v7 }
 0x23a   : > { %1820 = vperm.xlu2 %3005, %v3789_v21   ;;  %1815 = vperm.xlu1 %3004, %v3792_v58  }
 0x23b   : > { %1810 = vperm.xlu0 %3003, %v3795_v22  }
 0x23c   : > { %v3800_v8 = vpop.permute.xlu2 %1542  ;;  %v3802_v18 = vpop.permute.xlu1 %1492 }
 0x23d   : > { %5260 = vst [vmem:[#allocation144_spill] sm:$0xff] %v3800_v8  ;;  %v3804_v7 = vpop.permute.xlu0 %1487 }
 0x23e   : > { %5261 = vst [vmem:[#allocation145_spill] sm:$0xff] %v3802_v18  ;;  %v3825_v18 = vld [vmem:[%s3066_s17 + $0x12c] sm:$0xff] }
 0x23f   : > { %5262 = vst [vmem:[#allocation146_spill] sm:$0xff] %v3804_v7  ;;  %v3828_v7 = vld [vmem:[%s3066_s17 + $0x124] sm:$0xff] }
 0x240   : > { %5267 = vst [vmem:[#allocation151_spill] sm:$0xff] %v3825_v18 }
 0x242   : > { %1835 = vperm.xlu2 %3005, %v3807_v23   ;;  %1830 = vperm.xlu1 %3004, %v3810_v42  }
 0x243   : > { %1825 = vperm.xlu0 %3003, %v3813_v20  }
 0x244   : > { %v3818_v53 = vpop.permute.xlu2 %1557  ;;  %v3820_v1 = vpop.permute.xlu1 %1507 }
 0x245   : > { %5264 = vst [vmem:[#allocation148_spill] sm:$0xff] %v3818_v53  ;;  %v3822_v8 = vpop.permute.xlu0 %1502 }
 0x246   : > { %5265 = vst [vmem:[#allocation149_spill] sm:$0xff] %v3820_v1 }
 0x247   : > { %5266 = vst [vmem:[#allocation150_spill] sm:$0xff] %v3822_v8 }
 0x24a   : > { %1850 = vperm.xlu2 %3005, %v3825_v18   ;;  %1845 = vperm.xlu1 %3004, %v3828_v7  }
 0x24b   : > { %1840 = vperm.xlu0 %3003, %v3831_v43  }
 0x24c   : > { %v3836_v23 = vpop.permute.xlu2 %1685  ;;  %v3838_v27 = vpop.permute.xlu1 %1522 }
 0x24d   : > { %5268 = vst [vmem:[#allocation152_spill] sm:$0xff] %v3838_v27  ;;  %v3840_v53 = vpop.permute.xlu0 %1517 }
 0x24e   : > { %5269 = vst [vmem:[#allocation153_spill] sm:$0xff] %v3840_v53 }
 0x252   : > { %1978 = vperm.xlu2 %3005, %v3648_v31   ;;  %1973 = vperm.xlu1 %3004, %v3651_v26  }
 0x253   : > { %1968 = vperm.xlu0 %3003, %v3633_v38  }
 0x254   : > { %v3845_v8 = vpop.permute.xlu2 %1700  ;;  %v3847_v1 = vpop.permute.xlu1 %1537 }
 0x255   : > { %5270 = vst [vmem:[#allocation154_spill] sm:$0xff] %v3847_v1  ;;  %v3849_v18 = vpop.permute.xlu0 %1532 }
 0x256   : > { %5271 = vst [vmem:[#allocation155_spill] sm:$0xff] %v3849_v18 }
 0x25a   : > { %1993 = vperm.xlu2 %3005, %v3666_v24   ;;  %1988 = vperm.xlu1 %3004, %v3669_v25  }
 0x25b   : > { %1983 = vperm.xlu0 %3003, %v3645_v46  }
 0x25c   : > { %v3854_v27 = vpop.permute.xlu2 %1715  ;;  %v3856_v53 = vpop.permute.xlu1 %1552 }
 0x25d   : > { %v3858_v31 = vpop.permute.xlu0 %1547 }
 0x262   : > { %2008 = vperm.xlu2 %3005, %v3684_v36   ;;  %2003 = vperm.xlu1 %3004, %v3687_v13  }
 0x263   : > { %1998 = vperm.xlu0 %3003, %v3663_v39  }
 0x264   : > { %v3863_v38 = vpop.permute.xlu2 %1730  ;;  %v3865_v26 = vpop.permute.xlu1 %1680 }
 0x265   : > { %v3867_v24 = vpop.permute.xlu0 %1675 }
 0x26a   : > { %2023 = vperm.xlu2 %3005, %v3702_v54   ;;  %2018 = vperm.xlu1 %3004, %v3705_v30  }
 0x26b   : > { %2013 = vperm.xlu0 %3003, %v3681_v2  }
 0x26c   : > { %v3872_v25 = vpop.permute.xlu2 %1745  ;;  %v3874_v46 = vpop.permute.xlu1 %1695 }
 0x26d   : > { %v3876_v36 = vpop.permute.xlu0 %1690 }
 0x272   : > { %2038 = vperm.xlu2 %3005, %v3720_v48   ;;  %2033 = vperm.xlu1 %3004, %v3723_v0  }
 0x273   : > { %2028 = vperm.xlu0 %3003, %v3699_v19  }
 0x274   : > { %v3881_v13 = vpop.permute.xlu2 %1760  ;;  %v3883_v39 = vpop.permute.xlu1 %1710 }
 0x275   : > { %5272 = vst [vmem:[#allocation156_spill] sm:$0xff] %v3881_v13  ;;  %v3885_v54 = vpop.permute.xlu0 %1705 }
 0x276   : > { %5273 = vst [vmem:[#allocation157_spill] sm:$0xff] %v3883_v39  ;;  %v5315_v39 = vld [vmem:[#allocation23_spill] sm:$0xff] }
 0x277   : > { %5274 = vst [vmem:[#allocation158_spill] sm:$0xff] %v3885_v54  ;;  %v5314_v54 = vld [vmem:[#allocation22_spill] sm:$0xff] }
 0x27a   : > { %2053 = vperm.xlu2 %3005, %v3738_v6   ;;  %2048 = vperm.xlu1 %3004, %v3741_v59  }
 0x27b   : > { %2043 = vperm.xlu0 %3003, %v3717_v52  }
 0x27c   : > { %v3890_v2 = vpop.permute.xlu2 %1775  ;;  %v3892_v30 = vpop.permute.xlu1 %1725 }
 0x27d   : > { %5275 = vst [vmem:[#allocation159_spill] sm:$0xff] %v3890_v2  ;;  %v3894_v48 = vpop.permute.xlu0 %1720 }
 0x27e   : > { %5276 = vst [vmem:[#allocation160_spill] sm:$0xff] %v3892_v30  ;;  %v5313_v30 = vld [vmem:[#allocation21_spill] sm:$0xff] }
 0x27f   : > { %5277 = vst [vmem:[#allocation161_spill] sm:$0xff] %v3894_v48 }
 0x282   : > { %2068 = vperm.xlu2 %3005, %v3756_v44   ;;  %2063 = vperm.xlu1 %3004, %v3759_v35  }
 0x283   : > { %2058 = vperm.xlu0 %3003, %v3735_v12  }
 0x284   : > { %v3899_v19 = vpop.permute.xlu2 %1790  ;;  %v3901_v0 = vpop.permute.xlu1 %1740 }
 0x285   : > { %5278 = vst [vmem:[#allocation162_spill] sm:$0xff] %v3899_v19  ;;  %v3903_v6 = vpop.permute.xlu0 %1735 }
 0x286   : > { %5279 = vst [vmem:[#allocation163_spill] sm:$0xff] %v3901_v0 }
 0x287   : > { %5280 = vst [vmem:[#allocation164_spill] sm:$0xff] %v3903_v6 }
 0x28a   : > { %2083 = vperm.xlu2 %3005, %v3774_v34   ;;  %2078 = vperm.xlu1 %3004, %v3777_v28   ;;  %v3926_v28 = vld [vmem:[%s5112_s1] ss:$0 sm:$0xff] }
 0x28b   : > { %2073 = vperm.xlu0 %3003, %v3753_v32   ;;  %5287 = vst [vmem:[#allocation171_spill] sm:$0xff] %v3926_v28  ;;  %v3931_v32 = vld [vmem:[%s5112_s1 + $0x1] ss:$0 sm:$0xff]  ;;  %v3947_v18 = vmul.f32 %v3926_v28, %v3119_v49  ;;  %v393_v1 = vmul.f32 %v3926_v28, %v3121_v50  ;;  %v3965_v49 = vmul.f32 %v3926_v28, %v3128_v55 }
 0x28c   : > { %v3908_v59 = vpop.permute.xlu2 %1805  ;;  %v3910_v52 = vpop.permute.xlu1 %1755  ;;  %v3969_v50 = vmul.f32 %v3926_v28, %v3130_v56  ;;  %v3985_v55 = vmul.f32 %v3926_v28, %v3139_v62  ;;  %v3989_v56 = vmul.f32 %v3926_v28, %v3141_v63  ;;  %v4004_v62 = vmul.f32 %v3926_v28, %v3146_v3 }
 0x28d   : > { %5281 = vst [vmem:[#allocation165_spill] sm:$0xff] %v3908_v59  ;;  %v3912_v44 = vpop.permute.xlu0 %1750  ;;  %v4008_v63 = vmul.f32 %v3926_v28, %v3148_v4  ;;  %v4024_v3 = vmul.f32 %v3926_v28, %v3159_v11  ;;  %v4043_v11 = vmul.f32 %v3926_v28, %v3168_v17  ;;  %v5295_v17 = vld [vmem:[#allocation5_spill] sm:$0xff]  ;;  %v698_v2 = vmul.f32 %v3931_v32, %v5313_v30 }
 0x28e   : > { %5282 = vst [vmem:[#allocation166_spill] sm:$0xff] %v3910_v52  ;;  %v4063_v59 = vmul.f32 %v3926_v28, %v5295_v17 }
 0x28f   : > { %5283 = vst [vmem:[#allocation167_spill] sm:$0xff] %v3912_v44  ;;  %v5294_v44 = vld [vmem:[#allocation4_spill] sm:$0xff] }
 0x290   : > { %v4059_v52 = vmul.f32 %v3926_v28, %v5294_v44  ;;  %v5302_v44 = vld [vmem:[#allocation44_spill] sm:$0xff] }
 0x292   : > { %2098 = vperm.xlu2 %3005, %v3792_v58   ;;  %2093 = vperm.xlu1 %3004, %v3795_v22   ;;  %v3935_v22 = vmul.f32 %v3926_v28, %v3104_v37  ;;  %v396_v58 = vmul.f32 %v3926_v28, %v3109_v41  ;;  %v3953_v37 = vmul.f32 %v3926_v28, %v3123_v51 }
 0x293   : > { %2088 = vperm.xlu0 %3003, %v3771_v14   ;;  %v3941_v14 = vmul.f32 %v3926_v28, %v3114_v45  ;;  %v719_v41 = vmul.f32 %v3931_v32, %v3392_v29  ;;  %v3960_v45 = vld [vmem:[%s5112_s1 + $0x2] ss:$0 sm:$0xff]  ;;  %v3973_v51 = vmul.f32 %v3926_v28, %v3132_v57  ;;  %v3977_v29 = vmul.f32 %v3926_v28, %v3137_v61  ;;  %v3998_v61 = vld [vmem:[%s5112_s1 + $0x3] ss:$0 sm:$0xff] }
 0x294   : > { %v3917_v12 = vpop.permute.xlu2 %1820  ;;  %v3919_v35 = vpop.permute.xlu1 %1770  ;;  %v426_v57 = vmul.f32 %v3926_v28, %v3191_v33  ;;  %v4012_v33 = vmul.f32 %v3926_v28, %v3150_v5  ;;  %v1305_v4 = vmul.f32 %v3998_v61, %v3617_v47  ;;  %v4031_v5 = vld [vmem:[%s5112_s1 + $0x4] ss:$0 sm:$0xff]  ;;  %v686_v47 = vmul.f32 %v3931_v32, %v3200_v40  ;;  %v5297_v40 = vld [vmem:[#allocation12_spill] sm:$0xff] }
 0x295   : > { %5284 = vst [vmem:[#allocation168_spill] sm:$0xff] %v3917_v12  ;;  %v3921_v34 = vpop.permute.xlu0 %1765  ;;  %v5293_v12 = vld [vmem:[#allocation148_spill] sm:$0xff]  ;;  %v979_v6 = vmul.f32 %v3960_v45, %v5302_v44  ;;  %v5309_v44 = vld [vmem:[#allocation19_spill] sm:$0xff] }
 0x296   : > { %5285 = vst [vmem:[#allocation169_spill] sm:$0xff] %v3919_v35  ;;  %v685_v19 = vmul.f32 %v3931_v32, %v5309_v44  ;;  %v687_v44 = vmul.f32 %v3931_v32, %v5315_v39  ;;  %v5320_v39 = vld [vmem:[#allocation24_spill] sm:$0xff] }
 0x297   : > { %5286 = vst [vmem:[#allocation170_spill] sm:$0xff] %v3921_v34  ;;  %v5292_v34 = vld [vmem:[#allocation3_spill] sm:$0xff] }
 0x298   : > { %v4053_v35 = vmul.f32 %v3926_v28, %v5292_v34  ;;  %v5298_v34 = vld [vmem:[#allocation6_spill] sm:$0xff] }
 0x29a   : > { %2113 = vperm.xlu2 %3005, %v3810_v42   ;;  %2108 = vperm.xlu1 %3004, %v3813_v20  }
 0x29b   : > { %2103 = vperm.xlu0 %3003, %v3789_v21   ;;  %v1012_v21 = vmul.f32 %v3960_v45, %v3509_v60  ;;  %v4016_v60 = vmul.f32 %v3926_v28, %v3155_v9  ;;  %v4035_v9 = vmul.f32 %v3926_v28, %v3164_v15 }
 0x29c   : > { %v3979_v20 = vpop.permute.xlu2 %1835  ;;  %v3981_v42 = vpop.permute.xlu1 %1785 }
 0x29d   : > { %5288 = vst [vmem:[#allocation172_spill] sm:$0xff] %v3979_v20  ;;  %v4020_v20 = vmul.f32 %v3926_v28, %v3157_v10  ;;  %v4039_v10 = vmul.f32 %v3926_v28, %v3166_v16  ;;  %v1598_v16 = vmul.f32 %v4031_v5, %v5293_v12  ;;  %v5300_v12 = vld [vmem:[#allocation7_spill] sm:$0xff] }
 0x29e   : > { %5289 = vst [vmem:[#allocation173_spill] sm:$0xff] %v3981_v42  ;;  %v4000_v42 = vpop.permute.xlu0 %1780 }
 0x29f   : > { %5290 = vst [vmem:[#allocation174_spill] sm:$0xff] %v4000_v42  ;;  %v755_v42 = vadd.f32 %v719_v41, %v426_v57  ;;  %v5291_v41 = vld [vmem:[#allocation2_spill] sm:$0xff] }
 0x2a0   : > { %v4049_v57 = vmul.f32 %v3926_v28, %v5291_v41  ;;  %5296 = vst [vmem:[#allocation2_spill] sm:$0xff] %v4063_v59  ;;  %v689_v41 = vmul.f32 %v3931_v32, %v5297_v40  ;;  %v4082_v40 = vld [vmem:[%s5112_s1 + $0x5] ss:$0 sm:$0xff] }
 0x2a1   : > { %v1048_v15 = vadd.f32 %v1012_v21, %v755_v42  ;;  %v4071_v42 = vmul.f32 %v3926_v28, %v5298_v34  ;;  %v4075_v21 = vmul.f32 %v3926_v28, %v5300_v12  ;;  %v722_v34 = vadd.f32 %v686_v47, %v393_v1 }
 0x2a2   : > { %2128 = vperm.xlu2 %3005, %v3828_v7   ;;  %2123 = vperm.xlu1 %3004, %v3831_v43   ;;  %v5303_v7 = vld [vmem:[#allocation147_spill] sm:$0xff]  ;;  %v5304_v43 = vld [vmem:[#allocation8_spill] sm:$0xff] }
 0x2a3   : > { %5299 = vst [vmem:[#allocation3_spill] sm:$0xff] %v4071_v42  ;;  %v1341_v17 = vadd.f32 %v1305_v4, %v1048_v15  ;;  %2118 = vperm.xlu0 %3003, %v5303_v7   ;;  %v4087_v59 = vmul.f32 %v3926_v28, %v5304_v43  ;;  %v5306_v42 = vld [vmem:[#allocation15_spill] sm:$0xff]  ;;  %v1015_v13 = vadd.f32 %v979_v6, %v722_v34 }
 0x2a4   : > { %5301 = vst [vmem:[#allocation148_spill] sm:$0xff] %v4075_v21  ;;  %v692_v12 = vmul.f32 %v3931_v32, %v5306_v42  ;;  %v5307_v21 = vld [vmem:[#allocation18_spill] sm:$0xff]  ;;  %v1851_v4 = vpop.permute.xlu2 %1850  ;;  %v4093_v15 = vpop.permute.xlu1 %1800  ;;  %v5310_v7 = vld [vmem:[#allocation79_spill] sm:$0xff]  ;;  %v725_v42 = vadd.f32 %v689_v41, %v396_v58  ;;  %v1962_v58 = vld [vmem:[%s3066_s17 + $0x134] sm:$0xff]  ;;  %v701_v6 = vmul.f32 %v3931_v32, %v5320_v39 }
 0x2a5   : > { %5305 = vst [vmem:[#allocation4_spill] sm:$0xff] %v4087_v59  ;;  %v695_v0 = vmul.f32 %v3931_v32, %v5307_v21  ;;  %v1272_v48 = vmul.f32 %v3998_v61, %v5310_v7  ;;  %v1634_v43 = vadd.f32 %v1598_v16, %v1341_v17  ;;  %v1891_v1 = vmul.f32 %v4082_v40, %v1851_v4  ;;  %v5312_v59 = vld [vmem:[#allocation20_spill] sm:$0xff]  ;;  %v5316_v7 = vld [vmem:[#allocation114_spill] sm:$0xff] }
 0x2a6   : > { %5308 = vst [vmem:[#allocation5_spill] sm:$0xff] %v4093_v15  ;;  %v4100_v47 = vpop.permute.xlu0 %1795  ;;  %v684_v21 = vmul.f32 %v3931_v32, %v5312_v59  ;;  %v688_v15 = vmul.f32 %v3931_v32, %v5314_v54  ;;  %v1565_v16 = vmul.f32 %v4031_v5, %v5316_v7  ;;  %v1963_v4 = vld [vmem:[%s3066_s17 + $0x13c] sm:$0xff]  ;;  %v4117_v41 = vadd.f32 %v692_v12, %v3941_v14  ;;  %v5318_v59 = vld [vmem:[#allocation16_spill] sm:$0xff]  ;;  %v4140_v12 = vld [vmem:[%s5112_s1 + $0x6] ss:$0 sm:$0xff] }
 0x2a7   : > { %5311 = vst [vmem:[#allocation12_spill] sm:$0xff] %v4100_v47  ;;  %v4112_v17 = vadd.f32 %v1891_v1, %v1634_v43  ;;  %v4121_v30 = vmul.f32 %v3926_v28, %v5318_v59  ;;  %v5319_v47 = vld [vmem:[#allocation17_spill] sm:$0xff]  ;;  %v4130_v34 = vadd.f32 %v695_v0, %v3947_v18  ;;  %v4133_v43 = vadd.f32 %v685_v19, %v3973_v51  ;;  %v5329_v39 = vld [vmem:[#allocation82_spill] sm:$0xff] }
 0x2a8   : > { %v4125_v54 = vmul.f32 %v3926_v28, %v5319_v47  ;;  %v1308_v1 = vadd.f32 %v1272_v48, %v1015_v13  ;;  %v1858_v14 = vmul.f32 %v4082_v40, %v3836_v23  ;;  %v4143_v47 = vadd.f32 %v684_v21, %v3953_v37  ;;  %v5321_v18 = vld [vmem:[#allocation25_spill] sm:$0xff]  ;;  %v5322_v48 = vld [vmem:[#allocation47_spill] sm:$0xff] }
 0x2a9   : > { %5317 = vst [vmem:[#allocation6_spill] sm:$0xff] %v4112_v17  ;;  %v4146_v7 = vadd.f32 %v698_v2, %v3965_v49  ;;  %v691_v0 = vmul.f32 %v3931_v32, %v5321_v18  ;;  %v4151_v13 = vadd.f32 %v688_v15, %v3935_v22  ;;  %v4154_v23 = vadd.f32 %v687_v44, %v3969_v50  ;;  %v5323_v37 = vld [vmem:[#allocation151_spill] sm:$0xff]  ;;  %v5324_v49 = vld [vmem:[#allocation26_spill] sm:$0xff]  ;;  %v5326_v22 = vld [vmem:[#allocation28_spill] sm:$0xff] }
 0x2aa   : > { %2143 = vperm.xlu2 %3005, %v1963_v4   ;;  %2138 = vperm.xlu1 %3004, %v1962_v58   ;;  %v982_v19 = vmul.f32 %v3960_v45, %v5322_v48  ;;  %v1601_v51 = vadd.f32 %v1565_v16, %v1308_v1  ;;  %v4160_v2 = vadd.f32 %v701_v6, %v3977_v29  ;;  %v5325_v4 = vld [vmem:[#allocation27_spill] sm:$0xff]  ;;  %v5328_v16 = vld [vmem:[#allocation29_spill] sm:$0xff] }
 0x2ab   : > { %2133 = vperm.xlu0 %3003, %v5323_v37   ;;  %v690_v21 = vmul.f32 %v3931_v32, %v5324_v49  ;;  %v704_v58 = vmul.f32 %v3931_v32, %v5325_v4  ;;  %v694_v15 = vmul.f32 %v3931_v32, %v5326_v22  ;;  %v693_v59 = vmul.f32 %v3931_v32, %v5328_v16  ;;  %v5332_v37 = vld [vmem:[#allocation30_spill] sm:$0xff]  ;;  %v5333_v4 = vld [vmem:[#allocation31_spill] sm:$0xff]  ;;  %v5335_v17 = vld [vmem:[#allocation33_spill] sm:$0xff] }
 0x2ac   : > { %v1979_v50 = vpop.permute.xlu2 %1978  ;;  %v4168_v44 = vpop.permute.xlu1 %1815  ;;  %v1275_v29 = vmul.f32 %v3998_v61, %v5329_v39  ;;  %v1894_v6 = vadd.f32 %v1858_v14, %v1601_v51  ;;  %v4178_v48 = vadd.f32 %v691_v0, %v3985_v55  ;;  %v707_v49 = vmul.f32 %v3931_v32, %v5332_v37  ;;  %v2223_v55 = vld [vmem:[%s3066_s17 + $0x35] sm:$0xff]  ;;  %v2222_v0 = vld [vmem:[%s3066_s17 + $0x2d] sm:$0xff] }
 0x2ad   : > { %5327 = vst [vmem:[#allocation7_spill] sm:$0xff] %v4168_v44  ;;  %v2151_v1 = vmul.f32 %v4140_v12, %v1979_v50  ;;  %v697_v22 = vmul.f32 %v3931_v32, %v5333_v4  ;;  %v5334_v44 = vld [vmem:[#allocation32_spill] sm:$0xff]  ;;  %v710_v14 = vmul.f32 %v3931_v32, %v5335_v17  ;;  %v1018_v51 = vadd.f32 %v982_v19, %v725_v42  ;;  %v5336_v50 = vld [vmem:[#allocation117_spill] sm:$0xff]  ;;  %v5337_v4 = vld [vmem:[#allocation34_spill] sm:$0xff] }
 0x2ae   : > { %v4175_v18 = vpop.permute.xlu0 %1810  ;;  %5331 = vst [vmem:[#allocation147_spill] sm:$0xff] %v4178_v48  ;;  %v696_v16 = vmul.f32 %v3931_v32, %v5334_v44  ;;  %v1568_v39 = vmul.f32 %v4031_v5, %v5336_v50  ;;  %v4195_v28 = vadd.f32 %v690_v21, %v3989_v56  ;;  %v4198_v37 = vadd.f32 %v704_v58, %v4004_v62  ;;  %v5338_v48 = vld [vmem:[#allocation35_spill] sm:$0xff]  ;;  %v5339_v58 = vld [vmem:[#allocation50_spill] sm:$0xff] }
 0x2af   : > { %5330 = vst [vmem:[#allocation44_spill] sm:$0xff] %v4175_v18  ;;  %v4190_v18 = vadd.f32 %v2151_v1, %v1894_v6  ;;  %v700_v44 = vmul.f32 %v3931_v32, %v5337_v4  ;;  %v699_v17 = vmul.f32 %v3931_v32, %v5338_v48  ;;  %v2221_v42 = vld [vmem:[%s3066_s17 + $0x25] sm:$0xff]  ;;  %v4206_v19 = vadd.f32 %v694_v15, %v4008_v63 }
 0x2b0   : > { %v4209_v6 = vadd.f32 %v693_v59, %v4012_v33  ;;  %v1311_v1 = vadd.f32 %v1275_v29, %v1018_v51  ;;  %v1861_v56 = vmul.f32 %v4082_v40, %v3845_v8  ;;  %v4214_v62 = vadd.f32 %v707_v49, %v4016_v60  ;;  %v5340_v15 = vld [vmem:[#allocation51_spill] sm:$0xff]  ;;  %v5341_v29 = vld [vmem:[#allocation36_spill] sm:$0xff]  ;;  %v5344_v50 = vld [vmem:[#allocation86_spill] sm:$0xff] }
 0x2b1   : > { %v4217_v21 = vadd.f32 %v697_v22, %v4020_v20  ;;  %v985_v48 = vmul.f32 %v3960_v45, %v5339_v58  ;;  %v4222_v63 = vadd.f32 %v696_v16, %v4024_v3  ;;  %v4225_v33 = vadd.f32 %v710_v14, %v4035_v9  ;;  %v5342_v22 = vld [vmem:[#allocation52_spill] sm:$0xff]  ;;  %v5343_v14 = vld [vmem:[#allocation85_spill] sm:$0xff] }
 0x2b2   : > { %2271 = vperm.xlu2 %3005, %v2223_v55   ;;  %2266 = vperm.xlu1 %3004, %v2222_v0   ;;  %v718_v8 = vmul.f32 %v3931_v32, %v5340_v15  ;;  %v1604_v59 = vadd.f32 %v1568_v39, %v1311_v1  ;;  %v4230_v60 = vadd.f32 %v700_v44, %v4039_v10  ;;  %v5346_v0 = vld [vmem:[#allocation37_spill] sm:$0xff]  ;;  %v5347_v44 = vld [vmem:[#allocation38_spill] sm:$0xff]  ;;  %v5348_v1 = vld [vmem:[#allocation87_spill] sm:$0xff] }
 0x2b3   : > { %2261 = vperm.xlu0 %3003, %v2221_v42   ;;  %v4233_v20 = vadd.f32 %v699_v17, %v4043_v11  ;;  %v713_v49 = vmul.f32 %v3931_v32, %v5341_v29  ;;  %v717_v3 = vmul.f32 %v3931_v32, %v5342_v22  ;;  %v1278_v51 = vmul.f32 %v3998_v61, %v5343_v14  ;;  %v5350_v29 = vld [vmem:[#allocation121_spill] sm:$0xff]  ;;  %v2226_v14 = vld [vmem:[%s3066_s17 + $0x4d] sm:$0xff] }
 0x2b4   : > { %v1994_v9 = vpop.permute.xlu2 %1993  ;;  %v4239_v16 = vpop.permute.xlu1 %1830  ;;  %v1011_v10 = vmul.f32 %v3960_v45, %v5344_v50  ;;  %v1897_v39 = vadd.f32 %v1861_v56, %v1604_v59  ;;  %v703_v4 = vmul.f32 %v3931_v32, %v5346_v0  ;;  %v4252_v17 = vmul.f32 %v3931_v32, %v5347_v44  ;;  %v5349_v56 = vld [vmem:[#allocation120_spill] sm:$0xff]  ;;  %v2225_v50 = vld [vmem:[%s3066_s17 + $0x45] sm:$0xff] }
 0x2b5   : > { %v2154_v11 = vmul.f32 %v4140_v12, %v1994_v9  ;;  %v1021_v42 = vadd.f32 %v985_v48, %v4117_v41  ;;  %v1010_v58 = vmul.f32 %v3960_v45, %v5348_v1  ;;  %v754_v15 = vadd.f32 %v718_v8, %v4121_v30  ;;  %v5351_v48 = vld [vmem:[#allocation53_spill] sm:$0xff]  ;;  %v5352_v1 = vld [vmem:[#allocation122_spill] sm:$0xff] }
 0x2b6   : > { %v4246_v55 = vpop.permute.xlu0 %1825  ;;  %v1571_v59 = vmul.f32 %v4031_v5, %v5349_v56  ;;  %v1304_v22 = vmul.f32 %v3998_v61, %v5350_v29  ;;  %v4267_v0 = vadd.f32 %v713_v49, %v4049_v57  ;;  %v753_v41 = vadd.f32 %v717_v3, %v4125_v54  ;;  %v2224_v8 = vld [vmem:[%s3066_s17 + $0x3d] sm:$0xff] }
 0x2b7   : > { %5345 = vst [vmem:[#allocation8_spill] sm:$0xff] %v4246_v55  ;;  %v4262_v9 = vadd.f32 %v2154_v11, %v1897_v39  ;;  %v988_v44 = vmul.f32 %v3960_v45, %v5351_v48  ;;  %v1303_v30 = vmul.f32 %v3998_v61, %v5352_v1  ;;  %v1314_v56 = vadd.f32 %v1278_v51, %v1021_v42  ;;  %v5353_v29 = vld [vmem:[#allocation54_spill] sm:$0xff]  ;;  %v5354_v51 = vld [vmem:[#allocation55_spill] sm:$0xff] }
 0x2b8   : > { %v1047_v55 = vadd.f32 %v1011_v10, %v754_v15  ;;  %v1864_v39 = vmul.f32 %v4082_v40, %v3854_v27  ;;  %v1597_v11 = vmul.f32 %v4031_v5, %v3856_v53  ;;  %v978_v57 = vmul.f32 %v3960_v45, %v5353_v29  ;;  %v5355_v15 = vld [vmem:[#allocation88_spill] sm:$0xff] }
 0x2b9   : > { %v1046_v49 = vadd.f32 %v1010_v58, %v753_v41  ;;  %v1596_v54 = vmul.f32 %v4031_v5, %v3858_v31  ;;  %v4284_v3 = vadd.f32 %v703_v4, %v4053_v35  ;;  %v977_v10 = vmul.f32 %v3960_v45, %v5354_v51  ;;  %v5356_v58 = vld [vmem:[#allocation89_spill] sm:$0xff] }
 0x2ba   : > { %2286 = vperm.xlu2 %3005, %v2226_v14   ;;  %2281 = vperm.xlu1 %3004, %v2225_v50   ;;  %v1607_v42 = vadd.f32 %v1571_v59, %v1314_v56  ;;  %v1340_v27 = vadd.f32 %v1304_v22, %v1047_v55  ;;  %v1024_v53 = vadd.f32 %v988_v44, %v4130_v34  ;;  %v5357_v22 = vld [vmem:[#allocation90_spill] sm:$0xff]  ;;  %v5358_v56 = vld [vmem:[#allocation123_spill] sm:$0xff] }
 0x2bb   : > { %2276 = vperm.xlu0 %3003, %v2224_v8   ;;  %v1281_v48 = vmul.f32 %v3998_v61, %v5355_v15  ;;  %v1271_v41 = vmul.f32 %v3998_v61, %v5356_v58  ;;  %v1339_v31 = vadd.f32 %v1303_v30, %v1046_v49  ;;  %v1014_v34 = vadd.f32 %v978_v57, %v4133_v43  ;;  %v5359_v49 = vld [vmem:[#allocation124_spill] sm:$0xff] }
 0x2bc   : > { %v2009_v14 = vpop.permute.xlu2 %2008  ;;  %v1846_v35 = vpop.permute.xlu1 %1845  ;;  %v1900_v4 = vadd.f32 %v1864_v39, %v1607_v42  ;;  %v1633_v50 = vadd.f32 %v1597_v11, %v1340_v27  ;;  %v1270_v44 = vmul.f32 %v3998_v61, %v5357_v22  ;;  %v1574_v29 = vmul.f32 %v4031_v5, %v5358_v56  ;;  %v2229_v42 = vld [vmem:[%s3066_s17 + $0x65] sm:$0xff]  ;;  %v2228_v27 = vld [vmem:[%s3066_s17 + $0x5d] sm:$0xff]  ;;  %v5360_v57 = vld [vmem:[#allocation56_spill] sm:$0xff] }
 0x2bd   : > { %v2157_v1 = vmul.f32 %v4140_v12, %v2009_v14  ;;  %v1890_v55 = vmul.f32 %v4082_v40, %v1846_v35  ;;  %v1632_v8 = vadd.f32 %v1596_v54, %v1339_v31  ;;  %v1564_v39 = vmul.f32 %v4031_v5, %v5359_v49  ;;  %v5361_v54 = vld [vmem:[#allocation125_spill] sm:$0xff] }
 0x2be   : > { %v1841_v59 = vpop.permute.xlu0 %1840  ;;  %v1013_v43 = vadd.f32 %v977_v10, %v4143_v47  ;;  %v991_v15 = vmul.f32 %v3960_v45, %v5360_v57  ;;  %v1563_v58 = vmul.f32 %v4031_v5, %v5361_v54  ;;  %v2227_v14 = vld [vmem:[%s3066_s17 + $0x55] sm:$0xff]  ;;  %v1317_v35 = vadd.f32 %v1281_v48, %v1024_v53  ;;  %v5363_v53 = vld [vmem:[#allocation58_spill] sm:$0xff] }
 0x2bf   : > { %v1889_v30 = vmul.f32 %v4082_v40, %v1841_v59  ;;  %v4303_v11 = vadd.f32 %v2157_v1, %v1900_v4  ;;  %v4305_v51 = vadd.f32 %v1890_v55, %v1633_v50  ;;  %v1307_v59 = vadd.f32 %v1271_v41, %v1014_v34  ;;  %v5362_v1 = vld [vmem:[#allocation57_spill] sm:$0xff]  ;;  %v5364_v34 = vld [vmem:[#allocation91_spill] sm:$0xff]  ;;  %v5367_v54 = vld [vmem:[#allocation126_spill] sm:$0xff] }
 0x2c0   : > { %v1867_v4 = vmul.f32 %v4082_v40, %v3863_v38  ;;  %v1857_v50 = vmul.f32 %v4082_v40, %v3865_v26  ;;  %v981_v47 = vmul.f32 %v3960_v45, %v5362_v1  ;;  %v1306_v10 = vadd.f32 %v1270_v44, %v1013_v43  ;;  %v2231_v1 = vld [vmem:[%s3066_s17 + $0x75] sm:$0xff] }
 0x2c1   : > { %v4314_v31 = vadd.f32 %v1889_v30, %v1632_v8  ;;  %v1856_v55 = vmul.f32 %v4082_v40, %v3867_v24  ;;  %v4327_v22 = vadd.f32 %v4252_v17, %v4059_v52  ;;  %v980_v48 = vmul.f32 %v3960_v45, %v5363_v53  ;;  %v5365_v8 = vld [vmem:[#allocation92_spill] sm:$0xff] }
 0x2c2   : > { %2301 = vperm.xlu2 %3005, %v2229_v42   ;;  %2296 = vperm.xlu1 %3004, %v2228_v27   ;;  %v1610_v38 = vadd.f32 %v1574_v29, %v1317_v35  ;;  %v1600_v41 = vadd.f32 %v1564_v39, %v1307_v59  ;;  %v1027_v26 = vadd.f32 %v991_v15, %v4146_v7  ;;  %v5366_v27 = vld [vmem:[#allocation93_spill] sm:$0xff] }
 0x2c3   : > { %2291 = vperm.xlu0 %3003, %v2227_v14   ;;  %v1284_v44 = vmul.f32 %v3998_v61, %v5364_v34  ;;  %v1274_v24 = vmul.f32 %v3998_v61, %v5365_v8  ;;  %v1599_v30 = vadd.f32 %v1563_v58, %v1306_v10  ;;  %v1017_v7 = vadd.f32 %v981_v47, %v4151_v13  ;;  %v5368_v14 = vld [vmem:[#allocation127_spill] sm:$0xff] }
 0x2c4   : > { %v2024_v56 = vpop.permute.xlu2 %2023  ;;  %v1974_v52 = vpop.permute.xlu1 %1973  ;;  %v1903_v17 = vadd.f32 %v1867_v4, %v1610_v38  ;;  %v1893_v49 = vadd.f32 %v1857_v50, %v1600_v41  ;;  %v1273_v43 = vmul.f32 %v3998_v61, %v5366_v27  ;;  %v1577_v58 = vmul.f32 %v4031_v5, %v5367_v54  ;;  %v2232_v50 = vld [vmem:[%s3066_s17 + $0x7d] sm:$0xff]  ;;  %v5369_v47 = vld [vmem:[#allocation59_spill] sm:$0xff] }
 0x2c5   : > { %v2160_v42 = vmul.f32 %v4140_v12, %v2024_v56  ;;  %v2150_v29 = vmul.f32 %v4140_v12, %v1974_v52  ;;  %v1892_v57 = vadd.f32 %v1856_v55, %v1599_v30  ;;  %v1567_v35 = vmul.f32 %v4031_v5, %v5368_v14  ;;  %v5370_v55 = vld [vmem:[#allocation128_spill] sm:$0xff] }
 0x2c6   : > { %v1969_v39 = vpop.permute.xlu0 %1968  ;;  %v1016_v13 = vadd.f32 %v980_v48, %v4154_v23  ;;  %v994_v10 = vmul.f32 %v3960_v45, %v5369_v47  ;;  %v1566_v53 = vmul.f32 %v4031_v5, %v5370_v55  ;;  %v2230_v41 = vld [vmem:[%s3066_s17 + $0x6d] sm:$0xff]  ;;  %v1320_v34 = vadd.f32 %v1284_v44, %v1027_v26  ;;  %v5373_v26 = vld [vmem:[#allocation61_spill] sm:$0xff] }
 0x2c7   : > { %v2149_v15 = vmul.f32 %v4140_v12, %v1969_v39  ;;  %v4346_v59 = vadd.f32 %v2160_v42, %v1903_v17  ;;  %v4348_v4 = vadd.f32 %v2150_v29, %v1893_v49  ;;  %v1310_v8 = vadd.f32 %v1274_v24, %v1017_v7  ;;  %v5371_v52 = vld [vmem:[#allocation60_spill] sm:$0xff]  ;;  %v5372_v49 = vld [vmem:[#allocation39_spill] sm:$0xff]  ;;  %v5374_v29 = vld [vmem:[#allocation94_spill] sm:$0xff] }
 0x2c8   : > { %v1870_v30 = vmul.f32 %v4082_v40, %v3872_v25  ;;  %v1860_v56 = vmul.f32 %v4082_v40, %v3874_v46  ;;  %v984_v23 = vmul.f32 %v3960_v45, %v5371_v52  ;;  %v1309_v48 = vadd.f32 %v1273_v43, %v1016_v13  ;;  %v5375_v7 = vld [vmem:[#allocation95_spill] sm:$0xff]  ;;  %v5378_v55 = vld [vmem:[#allocation129_spill] sm:$0xff] }
 0x2c9   : > { %v4357_v38 = vadd.f32 %v2149_v15, %v1892_v57  ;;  %v1859_v17 = vmul.f32 %v4082_v40, %v3876_v36  ;;  %v4370_v42 = vmul.f32 %v3931_v32, %v5372_v49  ;;  %v983_v44 = vmul.f32 %v3960_v45, %v5373_v26  ;;  %v2234_v52 = vld [vmem:[%s3066_s17 + $0x8d] sm:$0xff] }
 0x2ca   : > { %2316 = vperm.xlu2 %3005, %v2232_v50   ;;  %2311 = vperm.xlu1 %3004, %v2231_v1   ;;  %v1613_v25 = vadd.f32 %v1577_v58, %v1320_v34  ;;  %v1603_v24 = vadd.f32 %v1567_v35, %v1310_v8  ;;  %v1030_v46 = vadd.f32 %v994_v10, %v4160_v2  ;;  %v5376_v2 = vld [vmem:[#allocation147_spill] sm:$0xff]  ;;  %v5377_v1 = vld [vmem:[#allocation96_spill] sm:$0xff] }
 0x2cb   : > { %2306 = vperm.xlu0 %3003, %v2230_v41   ;;  %v1287_v39 = vmul.f32 %v3998_v61, %v5374_v29  ;;  %v1277_v36 = vmul.f32 %v3998_v61, %v5375_v7  ;;  %v1602_v27 = vadd.f32 %v1566_v53, %v1309_v48  ;;  %v1020_v50 = vadd.f32 %v984_v23, %v5376_v2  ;;  %v5379_v41 = vld [vmem:[#allocation130_spill] sm:$0xff] }
 0x2cc   : > { %v2039_v43 = vpop.permute.xlu2 %2038  ;;  %v1989_v57 = vpop.permute.xlu1 %1988  ;;  %v1906_v15 = vadd.f32 %v1870_v30, %v1613_v25  ;;  %v1896_v54 = vadd.f32 %v1860_v56, %v1603_v24  ;;  %v1276_v13 = vmul.f32 %v3998_v61, %v5377_v1  ;;  %v1580_v53 = vmul.f32 %v4031_v5, %v5378_v55  ;;  %v2235_v56 = vld [vmem:[%s3066_s17 + $0x95] sm:$0xff]  ;;  %v5380_v48 = vld [vmem:[#allocation62_spill] sm:$0xff] }
 0x2cd   : > { %v2163_v14 = vmul.f32 %v4140_v12, %v2039_v43  ;;  %v2153_v58 = vmul.f32 %v4140_v12, %v1989_v57  ;;  %v1895_v47 = vadd.f32 %v1859_v17, %v1602_v27  ;;  %v1570_v34 = vmul.f32 %v4031_v5, %v5379_v41  ;;  %v5381_v17 = vld [vmem:[#allocation131_spill] sm:$0xff]  ;;  %v5382_v27 = vld [vmem:[#allocation156_spill] sm:$0xff]  ;;  %v5383_v57 = vld [vmem:[#allocation157_spill] sm:$0xff] }
 0x2ce   : > { %v1984_v35 = vpop.permute.xlu0 %1983  ;;  %v1019_v23 = vadd.f32 %v983_v44, %v4195_v28  ;;  %v997_v49 = vmul.f32 %v3960_v45, %v5380_v48  ;;  %v1569_v26 = vmul.f32 %v4031_v5, %v5381_v17  ;;  %v2233_v24 = vld [vmem:[%s3066_s17 + $0x85] sm:$0xff]  ;;  %v1323_v29 = vadd.f32 %v1287_v39, %v1030_v46  ;;  %v5387_v46 = vld [vmem:[#allocation64_spill] sm:$0xff] }
 0x2cf   : > { %v2152_v10 = vmul.f32 %v4140_v12, %v1984_v35  ;;  %v4389_v8 = vadd.f32 %v2163_v14, %v1906_v15  ;;  %v4391_v30 = vadd.f32 %v2153_v58, %v1896_v54  ;;  %v1313_v7 = vadd.f32 %v1277_v36, %v1020_v50  ;;  %v5384_v54 = vld [vmem:[#allocation63_spill] sm:$0xff]  ;;  %v5385_v14 = vld [vmem:[#allocation158_spill] sm:$0xff]  ;;  %v5386_v35 = vld [vmem:[#allocation40_spill] sm:$0xff] }
 0x2d0   : > { %v1873_v43 = vmul.f32 %v4082_v40, %v5382_v27  ;;  %v1863_v15 = vmul.f32 %v4082_v40, %v5383_v57  ;;  %v987_v28 = vmul.f32 %v3960_v45, %v5384_v54  ;;  %v1312_v44 = vadd.f32 %v1276_v13, %v1019_v23  ;;  %v5392_v57 = vld [vmem:[#allocation133_spill] sm:$0xff] }
 0x2d1   : > { %v4400_v25 = vadd.f32 %v2152_v10, %v1895_v47  ;;  %v1862_v58 = vmul.f32 %v4082_v40, %v5385_v14  ;;  %v4413_v2 = vmul.f32 %v3931_v32, %v5386_v35  ;;  %v986_v39 = vmul.f32 %v3960_v45, %v5387_v46  ;;  %v5388_v47 = vld [vmem:[#allocation97_spill] sm:$0xff]  ;;  %v5389_v10 = vld [vmem:[#allocation98_spill] sm:$0xff] }
 0x2d2   : > { %2331 = vperm.xlu2 %3005, %v2235_v56   ;;  %2326 = vperm.xlu1 %3004, %v2234_v52   ;;  %v1616_v36 = vadd.f32 %v1580_v53, %v1323_v29  ;;  %v1606_v50 = vadd.f32 %v1570_v34, %v1313_v7  ;;  %v1033_v1 = vadd.f32 %v997_v49, %v4198_v37  ;;  %v5390_v49 = vld [vmem:[#allocation99_spill] sm:$0xff]  ;;  %v5391_v7 = vld [vmem:[#allocation132_spill] sm:$0xff] }
 0x2d3   : > { %2321 = vperm.xlu0 %3003, %v2233_v24   ;;  %v1290_v13 = vmul.f32 %v3998_v61, %v5388_v47  ;;  %v1280_v55 = vmul.f32 %v3998_v61, %v5389_v10  ;;  %v1605_v41 = vadd.f32 %v1569_v26, %v1312_v44  ;;  %v1023_v37 = vadd.f32 %v987_v28, %v4206_v19  ;;  %v2238_v44 = vld [vmem:[%s3066_s17 + $0xad] sm:$0xff]  ;;  %v2237_v14 = vld [vmem:[%s3066_s17 + $0xa5] sm:$0xff]  ;;  %v5393_v28 = vld [vmem:[#allocation65_spill] sm:$0xff] }
 0x2d4   : > { %v2054_v56 = vpop.permute.xlu2 %2053  ;;  %v2004_v52 = vpop.permute.xlu1 %2003  ;;  %v1909_v23 = vadd.f32 %v1873_v43, %v1616_v36  ;;  %v1899_v48 = vadd.f32 %v1863_v15, %v1606_v50  ;;  %v1279_v24 = vmul.f32 %v3998_v61, %v5390_v49  ;;  %v1583_v27 = vmul.f32 %v4031_v5, %v5391_v7  ;;  %v2236_v50 = vld [vmem:[%s3066_s17 + $0x9d] sm:$0xff] }
 0x2d5   : > { %v2166_v17 = vmul.f32 %v4140_v12, %v2054_v56  ;;  %v2156_v53 = vmul.f32 %v4140_v12, %v2004_v52  ;;  %v1898_v29 = vadd.f32 %v1862_v58, %v1605_v41  ;;  %v1573_v43 = vmul.f32 %v4031_v5, %v5392_v57  ;;  %v5394_v58 = vld [vmem:[#allocation134_spill] sm:$0xff]  ;;  %v5395_v41 = vld [vmem:[#allocation159_spill] sm:$0xff]  ;;  %v5396_v52 = vld [vmem:[#allocation160_spill] sm:$0xff] }
 0x2d6   : > { %v1999_v34 = vpop.permute.xlu0 %1998  ;;  %v1022_v19 = vadd.f32 %v986_v39, %v4209_v6  ;;  %v1000_v35 = vmul.f32 %v3960_v45, %v5393_v28  ;;  %v1572_v46 = vmul.f32 %v4031_v5, %v5394_v58  ;;  %v1326_v47 = vadd.f32 %v1290_v13, %v1033_v1  ;;  %v5400_v1 = vld [vmem:[#allocation67_spill] sm:$0xff]  ;;  %v5402_v7 = vld [vmem:[#allocation101_spill] sm:$0xff] }
 0x2d7   : > { %v2155_v26 = vmul.f32 %v4140_v12, %v1999_v34  ;;  %v4432_v15 = vadd.f32 %v2166_v17, %v1909_v23  ;;  %v4434_v54 = vadd.f32 %v2156_v53, %v1899_v48  ;;  %v1316_v10 = vadd.f32 %v1280_v55, %v1023_v37  ;;  %v5397_v48 = vld [vmem:[#allocation66_spill] sm:$0xff]  ;;  %v5398_v17 = vld [vmem:[#allocation161_spill] sm:$0xff] }
 0x2d8   : > { %v1876_v56 = vmul.f32 %v4082_v40, %v5395_v41  ;;  %v1866_v23 = vmul.f32 %v4082_v40, %v5396_v52  ;;  %v990_v6 = vmul.f32 %v3960_v45, %v5397_v48  ;;  %v1315_v39 = vadd.f32 %v1279_v24, %v1022_v19  ;;  %v5399_v34 = vld [vmem:[#allocation41_spill] sm:$0xff]  ;;  %v5405_v48 = vld [vmem:[#allocation136_spill] sm:$0xff] }
 0x2d9   : > { %v4443_v36 = vadd.f32 %v2155_v26, %v1898_v29  ;;  %v1865_v53 = vmul.f32 %v4082_v40, %v5398_v17  ;;  %v4456_v49 = vmul.f32 %v3931_v32, %v5399_v34  ;;  %v989_v13 = vmul.f32 %v3960_v45, %v5400_v1  ;;  %v5401_v26 = vld [vmem:[#allocation100_spill] sm:$0xff]  ;;  %v2241_v17 = vld [vmem:[%s3066_s17 + $0xc5] sm:$0xff]  ;;  %v2240_v34 = vld [vmem:[%s3066_s17 + $0xbd] sm:$0xff] }
 0x2da   : > { %2346 = vperm.xlu2 %3005, %v2238_v44   ;;  %2341 = vperm.xlu1 %3004, %v2237_v14   ;;  %v1619_v55 = vadd.f32 %v1583_v27, %v1326_v47  ;;  %v1609_v37 = vadd.f32 %v1573_v43, %v1316_v10  ;;  %v1036_v29 = vadd.f32 %v1000_v35, %v4214_v62  ;;  %v5403_v35 = vld [vmem:[#allocation102_spill] sm:$0xff]  ;;  %v5404_v10 = vld [vmem:[#allocation135_spill] sm:$0xff] }
 0x2db   : > { %2336 = vperm.xlu0 %3003, %v2236_v50   ;;  %v1293_v24 = vmul.f32 %v3998_v61, %v5401_v26  ;;  %v1283_v57 = vmul.f32 %v3998_v61, %v5402_v7  ;;  %v1608_v44 = vadd.f32 %v1572_v46, %v1315_v39  ;;  %v1026_v62 = vadd.f32 %v990_v6, %v4217_v21  ;;  %v5406_v6 = vld [vmem:[#allocation68_spill] sm:$0xff] }
 0x2dc   : > { %v2069_v14 = vpop.permute.xlu2 %2068  ;;  %v2019_v19 = vpop.permute.xlu1 %2018  ;;  %v1912_v28 = vadd.f32 %v1876_v56, %v1619_v55  ;;  %v1902_v58 = vadd.f32 %v1866_v23, %v1609_v37  ;;  %v1282_v50 = vmul.f32 %v3998_v61, %v5403_v35  ;;  %v1586_v52 = vmul.f32 %v4031_v5, %v5404_v10  ;;  %v2239_v26 = vld [vmem:[%s3066_s17 + $0xb5] sm:$0xff]  ;;  %v5412_v35 = vld [vmem:[#allocation2_spill] sm:$0xff]  ;;  %v5414_v10 = vld [vmem:[#allocation103_spill] sm:$0xff] }
 0x2dd   : > { %v2169_v41 = vmul.f32 %v4140_v12, %v2069_v14  ;;  %v2159_v27 = vmul.f32 %v4140_v12, %v2019_v19  ;;  %v1901_v47 = vadd.f32 %v1865_v53, %v1608_v44  ;;  %v1576_v56 = vmul.f32 %v4031_v5, %v5405_v48  ;;  %v5407_v53 = vld [vmem:[#allocation137_spill] sm:$0xff]  ;;  %v5408_v14 = vld [vmem:[#allocation162_spill] sm:$0xff]  ;;  %v5415_v48 = vld [vmem:[#allocation104_spill] sm:$0xff] }
 0x2de   : > { %v2014_v43 = vpop.permute.xlu0 %2013  ;;  %v1025_v21 = vadd.f32 %v989_v13, %v4222_v63  ;;  %v1003_v1 = vmul.f32 %v3960_v45, %v5406_v6  ;;  %v1575_v55 = vmul.f32 %v4031_v5, %v5407_v53  ;;  %v1329_v7 = vadd.f32 %v1293_v24, %v1036_v29  ;;  %v5413_v29 = vld [vmem:[#allocation70_spill] sm:$0xff] }
 0x2df   : > { %v2158_v46 = vmul.f32 %v4140_v12, %v2014_v43  ;;  %v4475_v23 = vadd.f32 %v2169_v41, %v1912_v28  ;;  %v4477_v39 = vadd.f32 %v2159_v27, %v1902_v58  ;;  %v1319_v44 = vadd.f32 %v1283_v57, %v1026_v62  ;;  %v5409_v28 = vld [vmem:[#allocation163_spill] sm:$0xff]  ;;  %v5410_v41 = vld [vmem:[#allocation69_spill] sm:$0xff]  ;;  %v5411_v27 = vld [vmem:[#allocation164_spill] sm:$0xff] }
 0x2e0   : > { %v1879_v19 = vmul.f32 %v4082_v40, %v5408_v14  ;;  %v1869_v58 = vmul.f32 %v4082_v40, %v5409_v28  ;;  %v993_v63 = vmul.f32 %v3960_v45, %v5410_v41  ;;  %v1318_v13 = vadd.f32 %v1282_v50, %v1025_v21  ;;  %v5418_v41 = vld [vmem:[#allocation139_spill] sm:$0xff] }
 0x2e1   : > { %v4486_v37 = vadd.f32 %v2158_v46, %v1901_v47  ;;  %v1868_v43 = vmul.f32 %v4082_v40, %v5411_v27  ;;  %v4499_v47 = vadd.f32 %v4370_v42, %v5412_v35  ;;  %v992_v24 = vmul.f32 %v3960_v45, %v5413_v29  ;;  %v2244_v27 = vld [vmem:[%s3066_s17 + $0xdd] sm:$0xff]  ;;  %v2243_v35 = vld [vmem:[%s3066_s17 + $0xd5] sm:$0xff] }
 0x2e2   : > { %2361 = vperm.xlu2 %3005, %v2241_v17   ;;  %2356 = vperm.xlu1 %3004, %v2240_v34   ;;  %v1622_v57 = vadd.f32 %v1586_v52, %v1329_v7  ;;  %v1612_v62 = vadd.f32 %v1576_v56, %v1319_v44  ;;  %v1039_v46 = vadd.f32 %v1003_v1, %v4225_v33  ;;  %v5416_v1 = vld [vmem:[#allocation105_spill] sm:$0xff]  ;;  %v5417_v44 = vld [vmem:[#allocation138_spill] sm:$0xff] }
 0x2e3   : > { %2351 = vperm.xlu0 %3003, %v2239_v26   ;;  %v1296_v50 = vmul.f32 %v3998_v61, %v5414_v10  ;;  %v1286_v21 = vmul.f32 %v3998_v61, %v5415_v48  ;;  %v1611_v17 = vadd.f32 %v1575_v55, %v1318_v13  ;;  %v1029_v33 = vadd.f32 %v993_v63, %v4230_v60  ;;  %v5419_v63 = vld [vmem:[#allocation71_spill] sm:$0xff] }
 0x2e4   : > { %v2084_v34 = vpop.permute.xlu2 %2083  ;;  %v2034_v42 = vpop.permute.xlu1 %2033  ;;  %v1915_v6 = vadd.f32 %v1879_v19, %v1622_v57  ;;  %v1905_v53 = vadd.f32 %v1869_v58, %v1612_v62  ;;  %v1285_v26 = vmul.f32 %v3998_v61, %v5416_v1  ;;  %v1589_v28 = vmul.f32 %v4031_v5, %v5417_v44  ;;  %v2242_v10 = vld [vmem:[%s3066_s17 + $0xcd] sm:$0xff]  ;;  %v5427_v44 = vld [vmem:[#allocation106_spill] sm:$0xff] }
 0x2e5   : > { %v2172_v14 = vmul.f32 %v4140_v12, %v2084_v34  ;;  %v2162_v52 = vmul.f32 %v4140_v12, %v2034_v42  ;;  %v1904_v7 = vadd.f32 %v1868_v43, %v1611_v17  ;;  %v1579_v19 = vmul.f32 %v4031_v5, %v5418_v41  ;;  %v5420_v43 = vld [vmem:[#allocation140_spill] sm:$0xff]  ;;  %v5421_v34 = vld [vmem:[#allocation165_spill] sm:$0xff]  ;;  %v5425_v1 = vld [vmem:[#allocation3_spill] sm:$0xff] }
 0x2e6   : > { %v2029_v56 = vpop.permute.xlu0 %2028  ;;  %v1028_v60 = vadd.f32 %v992_v24, %v4233_v20  ;;  %v1006_v29 = vmul.f32 %v3960_v45, %v5419_v63  ;;  %v1578_v57 = vmul.f32 %v4031_v5, %v5420_v43  ;;  %v1332_v48 = vadd.f32 %v1296_v50, %v1039_v46  ;;  %v5426_v46 = vld [vmem:[#allocation73_spill] sm:$0xff] }
 0x2e7   : > { %v2161_v55 = vmul.f32 %v4140_v12, %v2029_v56  ;;  %v4518_v58 = vadd.f32 %v2172_v14, %v1915_v6  ;;  %v4520_v13 = vadd.f32 %v2162_v52, %v1905_v53  ;;  %v1322_v17 = vadd.f32 %v1286_v21, %v1029_v33  ;;  %v5422_v6 = vld [vmem:[#allocation166_spill] sm:$0xff]  ;;  %v5423_v14 = vld [vmem:[#allocation72_spill] sm:$0xff]  ;;  %v5424_v52 = vld [vmem:[#allocation167_spill] sm:$0xff] }
 0x2e8   : > { %v1882_v42 = vmul.f32 %v4082_v40, %v5421_v34  ;;  %v1872_v53 = vmul.f32 %v4082_v40, %v5422_v6  ;;  %v996_v20 = vmul.f32 %v3960_v45, %v5423_v14  ;;  %v1321_v24 = vadd.f32 %v1285_v26, %v1028_v60  ;;  %v5428_v26 = vld [vmem:[#allocation107_spill] sm:$0xff]  ;;  %v5431_v14 = vld [vmem:[#allocation142_spill] sm:$0xff] }
 0x2e9   : > { %v4529_v62 = vadd.f32 %v2161_v55, %v1904_v7  ;;  %v1871_v56 = vmul.f32 %v4082_v40, %v5424_v52  ;;  %v742_v7 = vadd.f32 %v4413_v2, %v5425_v1  ;;  %v995_v50 = vmul.f32 %v3960_v45, %v5426_v46  ;;  %v2247_v52 = vld [vmem:[%s3066_s17 + $0xf5] sm:$0xff]  ;;  %v2246_v1 = vld [vmem:[%s3066_s17 + $0xed] sm:$0xff] }
 0x2ea   : > { %2376 = vperm.xlu2 %3005, %v2244_v27   ;;  %2371 = vperm.xlu1 %3004, %v2243_v35   ;;  %v1625_v21 = vadd.f32 %v1589_v28, %v1332_v48  ;;  %v1615_v33 = vadd.f32 %v1579_v19, %v1322_v17  ;;  %v1042_v55 = vadd.f32 %v1006_v29, %v4267_v0  ;;  %v5429_v29 = vld [vmem:[#allocation108_spill] sm:$0xff]  ;;  %v5430_v17 = vld [vmem:[#allocation141_spill] sm:$0xff] }
 0x2eb   : > { %2366 = vperm.xlu0 %3003, %v2242_v10   ;;  %v1299_v41 = vmul.f32 %v3998_v61, %v5427_v44  ;;  %v1289_v60 = vmul.f32 %v3998_v61, %v5428_v26  ;;  %v1614_v63 = vadd.f32 %v1578_v57, %v1321_v24  ;;  %v1032_v0 = vadd.f32 %v996_v20, %v4284_v3  ;;  %v5432_v20 = vld [vmem:[#allocation74_spill] sm:$0xff] }
 0x2ec   : > { %v2099_v27 = vpop.permute.xlu2 %2098  ;;  %v2049_v35 = vpop.permute.xlu1 %2048  ;;  %v1918_v2 = vadd.f32 %v1882_v42, %v1625_v21  ;;  %v1908_v43 = vadd.f32 %v1872_v53, %v1615_v33  ;;  %v1288_v10 = vmul.f32 %v3998_v61, %v5429_v29  ;;  %v1592_v6 = vmul.f32 %v4031_v5, %v5430_v17  ;;  %v2245_v44 = vld [vmem:[%s3066_s17 + $0xe5] sm:$0xff]  ;;  %v5438_v29 = vld [vmem:[#allocation148_spill] sm:$0xff]  ;;  %v5440_v17 = vld [vmem:[#allocation109_spill] sm:$0xff] }
 0x2ed   : > { %v2175_v34 = vmul.f32 %v4140_v12, %v2099_v27  ;;  %v2165_v28 = vmul.f32 %v4140_v12, %v2049_v35  ;;  %v1907_v48 = vadd.f32 %v1871_v56, %v1614_v63  ;;  %v1582_v42 = vmul.f32 %v4031_v5, %v5431_v14  ;;  %v5433_v56 = vld [vmem:[#allocation143_spill] sm:$0xff]  ;;  %v5434_v27 = vld [vmem:[#allocation168_spill] sm:$0xff] }
 0x2ee   : > { %v2044_v19 = vpop.permute.xlu0 %2043  ;;  %v1031_v3 = vadd.f32 %v995_v50, %v4327_v22  ;;  %v1009_v46 = vmul.f32 %v3960_v45, %v5432_v20  ;;  %v1581_v21 = vmul.f32 %v4031_v5, %v5433_v56  ;;  %v1335_v26 = vadd.f32 %v1299_v41, %v1042_v55  ;;  %v5439_v55 = vld [vmem:[#allocation76_spill] sm:$0xff] }
 0x2ef   : > { %v2164_v57 = vmul.f32 %v4140_v12, %v2044_v19  ;;  %v4559_v53 = vadd.f32 %v2175_v34, %v1918_v2  ;;  %v4561_v24 = vadd.f32 %v2165_v28, %v1908_v43  ;;  %v1325_v63 = vadd.f32 %v1289_v60, %v1032_v0  ;;  %v5435_v2 = vld [vmem:[#allocation169_spill] sm:$0xff]  ;;  %v5436_v34 = vld [vmem:[#allocation75_spill] sm:$0xff]  ;;  %v5437_v28 = vld [vmem:[#allocation170_spill] sm:$0xff] }
 0x2f0   : > { %v1885_v35 = vmul.f32 %v4082_v40, %v5434_v27  ;;  %v1875_v43 = vmul.f32 %v4082_v40, %v5435_v2  ;;  %v999_v22 = vmul.f32 %v3960_v45, %v5436_v34  ;;  %v1324_v50 = vadd.f32 %v1288_v10, %v1031_v3  ;;  %v5441_v10 = vld [vmem:[#allocation110_spill] sm:$0xff]  ;;  %v5444_v34 = vld [vmem:[#allocation145_spill] sm:$0xff] }
 0x2f1   : > { %v4570_v33 = vadd.f32 %v2164_v57, %v1907_v48  ;;  %v1874_v19 = vmul.f32 %v4082_v40, %v5437_v28  ;;  %v741_v48 = vadd.f32 %v4456_v49, %v5438_v29  ;;  %v998_v41 = vmul.f32 %v3960_v45, %v5439_v55  ;;  %v2250_v28 = vld [vmem:[%s3066_s17 + $0x10d] sm:$0xff]  ;;  %v2249_v29 = vld [vmem:[%s3066_s17 + $0x105] sm:$0xff] }
 0x2f2   : > { %2391 = vperm.xlu2 %3005, %v2247_v52   ;;  %2386 = vperm.xlu1 %3004, %v2246_v1   ;;  %v1628_v60 = vadd.f32 %v1592_v6, %v1335_v26  ;;  %v1618_v0 = vadd.f32 %v1582_v42, %v1325_v63  ;;  %v1045_v57 = vadd.f32 %v1009_v46, %v4499_v47  ;;  %v5442_v46 = vld [vmem:[#allocation111_spill] sm:$0xff]  ;;  %v5445_v55 = vld [vmem:[#allocation42_spill] sm:$0xff] }
 0x2f3   : > { %2381 = vperm.xlu0 %3003, %v2245_v44   ;;  %v1302_v14 = vmul.f32 %v3998_v61, %v5440_v17  ;;  %v1292_v3 = vmul.f32 %v3998_v61, %v5441_v10  ;;  %v1617_v20 = vadd.f32 %v1581_v21, %v1324_v50  ;;  %v1035_v47 = vadd.f32 %v999_v22, %v742_v7  ;;  %v5443_v21 = vld [vmem:[#allocation144_spill] sm:$0xff]  ;;  %v2248_v17 = vld [vmem:[%s3066_s17 + $0xfd] sm:$0xff] }
 0x2f4   : > { %v2114_v52 = vpop.permute.xlu2 %2113  ;;  %v2064_v1 = vpop.permute.xlu1 %2063  ;;  %v1921_v49 = vadd.f32 %v1885_v35, %v1628_v60  ;;  %v1911_v56 = vadd.f32 %v1875_v43, %v1618_v0  ;;  %v1291_v44 = vmul.f32 %v3998_v61, %v5442_v46  ;;  %v1595_v2 = vmul.f32 %v4031_v5, %v5443_v21  ;;  %v5446_v60 = vld [vmem:[#allocation146_spill] sm:$0xff]  ;;  %v5454_v21 = vld [vmem:[#allocation4_spill] sm:$0xff] }
 0x2f5   : > { %v2178_v27 = vmul.f32 %v4140_v12, %v2114_v52  ;;  %v2168_v6 = vmul.f32 %v4140_v12, %v2064_v1  ;;  %v1910_v26 = vadd.f32 %v1874_v19, %v1617_v20  ;;  %v1585_v35 = vmul.f32 %v4031_v5, %v5444_v34  ;;  %v5447_v52 = vld [vmem:[#allocation172_spill] sm:$0xff]  ;;  %v5450_v46 = vld [vmem:[#allocation174_spill] sm:$0xff] }
 0x2f6   : > { %v2059_v42 = vpop.permute.xlu0 %2058  ;;  %v709_v7 = vmul.f32 %v3931_v32, %v5445_v55  ;;  %v1034_v22 = vadd.f32 %v998_v41, %v741_v48  ;;  %v1584_v19 = vmul.f32 %v4031_v5, %v5446_v60  ;;  %v1338_v10 = vadd.f32 %v1302_v14, %v1045_v57  ;;  %v5451_v41 = vld [vmem:[#allocation9_spill] sm:$0xff]  ;;  %v5455_v55 = vld [vmem:[#allocation78_spill] sm:$0xff] }
 0x2f7   : > { %v2167_v63 = vmul.f32 %v4140_v12, %v2059_v42  ;;  %v4599_v43 = vadd.f32 %v2178_v27, %v1921_v49  ;;  %v4601_v50 = vadd.f32 %v2168_v6, %v1911_v56  ;;  %v1328_v20 = vadd.f32 %v1292_v3, %v1035_v47  ;;  %v5448_v49 = vld [vmem:[#allocation173_spill] sm:$0xff]  ;;  %v5449_v27 = vld [vmem:[#allocation43_spill] sm:$0xff] }
 0x2f8   : > { %v1888_v1 = vmul.f32 %v4082_v40, %v5447_v52  ;;  %v1878_v56 = vmul.f32 %v4082_v40, %v5448_v49  ;;  %v708_v6 = vmul.f32 %v3931_v32, %v5449_v27  ;;  %v1327_v42 = vadd.f32 %v1291_v44, %v1034_v22  ;;  %v5453_v57 = vld [vmem:[#allocation77_spill] sm:$0xff]  ;;  %v5456_v44 = vld [vmem:[#allocation112_spill] sm:$0xff] }
 0x2f9   : > { %v4609_v0 = vadd.f32 %v2167_v63, %v1910_v26  ;;  %v1877_v48 = vmul.f32 %v4082_v40, %v5450_v46  ;;  %v5452_v26 = vld [vmem:[#allocation171_spill] sm:$0xff]  ;;  %v1002_v14 = vmul.f32 %v3960_v45, %v5453_v57  ;;  %v1631_v3 = vadd.f32 %v1595_v2, %v1338_v10 }
 0x2fa   : > { %2406 = vperm.xlu2 %3005, %v2250_v28   ;;  %2401 = vperm.xlu1 %3004, %v2249_v29   ;;  %v415_v63 = vmul.f32 %v5452_v26, %v5451_v41  ;;  %v1621_v47 = vadd.f32 %v1585_v35, %v1328_v20  ;;  %v745_v34 = vadd.f32 %v709_v7, %v5454_v21  ;;  %v2252_v26 = vld [vmem:[%s3066_s17 + $0x11d] sm:$0xff] }
 0x2fb   : > { %2396 = vperm.xlu0 %3003, %v2248_v17   ;;  %v1001_v32 = vmul.f32 %v3960_v45, %v5455_v55  ;;  %v1295_v22 = vmul.f32 %v3998_v61, %v5456_v44  ;;  %v1620_v60 = vadd.f32 %v1584_v19, %v1327_v42  ;;  %v1924_v52 = vadd.f32 %v1888_v1, %v1631_v3  ;;  %v5457_v17 = vld [vmem:[#allocation113_spill] sm:$0xff]  ;;  %v3017_v21 = vld [vmem:[%s5112_s1] ss:$0 sm:$0xff] }
 0x2fc   : > { %v2129_v28 = vpop.permute.xlu2 %2128  ;;  %v2079_v29 = vpop.permute.xlu1 %2078  ;;  %v1914_v49 = vadd.f32 %v1878_v56, %v1621_v47  ;;  %v744_v7 = vadd.f32 %v708_v6, %v415_v63  ;;  %v1294_v45 = vmul.f32 %v3998_v61, %v5457_v17  ;;  %v1038_v19 = vadd.f32 %v1002_v14, %v745_v34  ;;  %v5458_v42 = vld [vmem:[#allocation149_spill] sm:$0xff]  ;;  %v2253_v56 = vld [vmem:[%s3066_s17 + $0x125] sm:$0xff]  ;;  %v3016_v6 = vld [vmem:[%s5112_s1 + $0x1] ss:$0 sm:$0xff] }
 0x2fd   : > { %v2181_v27 = vmul.f32 %v4140_v12, %v2129_v28  ;;  %v2171_v2 = vmul.f32 %v4140_v12, %v2079_v29  ;;  %v1913_v10 = vadd.f32 %v1877_v48, %v1620_v60  ;;  %v1588_v46 = vmul.f32 %v4031_v5, %v5458_v42  ;;  %v5459_v63 = vld [vmem:[#allocation45_spill] sm:$0xff]  ;;  %v5460_v48 = vld [vmem:[#allocation150_spill] sm:$0xff] }
 0x2fe   : > { %v2074_v35 = vpop.permute.xlu0 %2073  ;;  %v712_v57 = vmul.f32 %v3016_v6, %v5459_v63  ;;  %v1037_v61 = vadd.f32 %v1001_v32, %v744_v7  ;;  %v1587_v3 = vmul.f32 %v4031_v5, %v5460_v48  ;;  %v2251_v47 = vld [vmem:[%s3066_s17 + $0x115] sm:$0xff]  ;;  %v5462_v34 = vld [vmem:[#allocation10_spill] sm:$0xff]  ;;  %v1331_v44 = vadd.f32 %v1295_v22, %v1038_v19  ;;  %v5467_v22 = vld [vmem:[#allocation11_spill] sm:$0xff] }
 0x2ff   : > { %v2170_v20 = vmul.f32 %v4140_v12, %v2074_v35  ;;  %v4636_v41 = vadd.f32 %v2181_v27, %v1924_v52  ;;  %v4638_v1 = vadd.f32 %v2171_v2, %v1914_v49  ;;  %v419_v55 = vmul.f32 %v3017_v21, %v5462_v34  ;;  %v5463_v60 = vld [vmem:[#allocation5_spill] sm:$0xff]  ;;  %v5464_v29 = vld [vmem:[#allocation46_spill] sm:$0xff]  ;;  %v5465_v32 = vld [vmem:[#allocation12_spill] sm:$0xff] }
 0x300   : > { %v1881_v28 = vmul.f32 %v4082_v40, %v5463_v60  ;;  %v711_v52 = vmul.f32 %v3016_v6, %v5464_v29  ;;  %v1330_v49 = vadd.f32 %v1294_v45, %v1037_v61  ;;  %v1880_v27 = vmul.f32 %v4082_v40, %v5465_v32  ;;  %v3018_v5 = vld [vmem:[%s5112_s1 + $0x2] ss:$0 sm:$0xff]  ;;  %v5466_v2 = vld [vmem:[#allocation80_spill] sm:$0xff] }
 0x301   : > { %v4648_v14 = vadd.f32 %v2170_v20, %v1913_v10  ;;  %v1005_v35 = vmul.f32 %v3018_v5, %v5466_v2  ;;  %v1624_v7 = vadd.f32 %v1588_v46, %v1331_v44  ;;  %v418_v17 = vmul.f32 %v3017_v21, %v5467_v22  ;;  %v5468_v20 = vld [vmem:[#allocation81_spill] sm:$0xff]  ;;  %v5471_v32 = vld [vmem:[#allocation152_spill] sm:$0xff] }
 0x302   : > { %2421 = vperm.xlu2 %3005, %v2253_v56   ;;  %2416 = vperm.xlu1 %3004, %v2252_v26   ;;  %v748_v10 = vadd.f32 %v712_v57, %v419_v55  ;;  %v1004_v19 = vmul.f32 %v3018_v5, %v5468_v20  ;;  %v1623_v42 = vadd.f32 %v1587_v3, %v1330_v49  ;;  %v3019_v56 = vld [vmem:[%s5112_s1 + $0x3] ss:$0 sm:$0xff]  ;;  %v5469_v26 = vld [vmem:[#allocation115_spill] sm:$0xff]  ;;  %v5470_v55 = vld [vmem:[#allocation116_spill] sm:$0xff] }
 0x303   : > { %5461 = vst [vmem:[#allocation15_spill] sm:$0xff] %v4648_v14  ;;  %2411 = vperm.xlu0 %3003, %v2251_v47   ;;  %v1298_v61 = vmul.f32 %v3019_v56, %v5469_v26  ;;  %v1917_v48 = vadd.f32 %v1881_v28, %v1624_v7  ;;  %v747_v57 = vadd.f32 %v711_v52, %v418_v17  ;;  %v3020_v49 = vld [vmem:[%s5112_s1 + $0x4] ss:$0 sm:$0xff]  ;;  %v5474_v52 = vld [vmem:[#allocation48_spill] sm:$0xff]  ;;  %v5478_v14 = vld [vmem:[#allocation7_spill] sm:$0xff] }
 0x304   : > { %v2144_v45 = vpop.permute.xlu2 %2143  ;;  %v2094_v63 = vpop.permute.xlu1 %2093  ;;  %v1297_v3 = vmul.f32 %v3019_v56, %v5470_v55  ;;  %v1916_v44 = vadd.f32 %v1880_v27, %v1623_v42  ;;  %v1041_v29 = vadd.f32 %v1005_v35, %v748_v10  ;;  %v1591_v2 = vmul.f32 %v3020_v49, %v5471_v32  ;;  %v5472_v28 = vld [vmem:[#allocation6_spill] sm:$0xff]  ;;  %v5475_v27 = vld [vmem:[#allocation153_spill] sm:$0xff]  ;;  %v2254_v35 = vld [vmem:[%s3066_s17 + $0x12d] sm:$0xff] }
 0x305   : > { %v2184_v46 = vmul.f32 %v4140_v12, %v2144_v45  ;;  %v2174_v47 = vmul.f32 %v4140_v12, %v2094_v63  ;;  %v2256_v20 = vld [vmem:[%s3066_s17 + $0x13d] sm:$0xff]  ;;  %v2255_v45 = vld [vmem:[%s3066_s17 + $0x135] sm:$0xff]  ;;  %v715_v17 = vmul.f32 %v3016_v6, %v5474_v52  ;;  %v1040_v63 = vadd.f32 %v1004_v19, %v747_v57 }
 0x306   : > { %v2089_v34 = vpop.permute.xlu0 %2088  ;;  %v1590_v42 = vmul.f32 %v3020_v49, %v5475_v27  ;;  %v5477_v10 = vld [vmem:[#allocation13_spill] sm:$0xff]  ;;  %v1334_v55 = vadd.f32 %v1298_v61, %v1041_v29  ;;  %v1884_v32 = vmul.f32 %v4082_v40, %v5478_v14  ;;  %v5480_v19 = vld [vmem:[#allocation44_spill] sm:$0xff]  ;;  %v5482_v61 = vld [vmem:[#allocation14_spill] sm:$0xff] }
 0x307   : > { %v2173_v60 = vmul.f32 %v4140_v12, %v2089_v34  ;;  %v4679_v7 = vadd.f32 %v2184_v46, %v5472_v28  ;;  %v4681_v22 = vadd.f32 %v2174_v47, %v1917_v48  ;;  %v422_v34 = vmul.f32 %v3017_v21, %v5477_v10  ;;  %v4696_v48 = vld [vmem:[%s5112_s1 + $0x7] ss:$0 sm:$0xff]  ;;  %v5479_v46 = vld [vmem:[#allocation49_spill] sm:$0xff]  ;;  %v5483_v27 = vld [vmem:[#allocation84_spill] sm:$0xff] }
 0x308   : > { %v714_v47 = vmul.f32 %v3016_v6, %v5479_v46  ;;  %v1333_v28 = vadd.f32 %v1297_v3, %v1040_v63  ;;  %v1883_v57 = vmul.f32 %v4082_v40, %v5480_v19  ;;  %v1627_v52 = vadd.f32 %v1591_v2, %v1334_v55  ;;  %v5484_v3 = vld [vmem:[#allocation118_spill] sm:$0xff] }
 0x309   : > { %5473 = vst [vmem:[#allocation18_spill] sm:$0xff] %v4681_v22  ;;  %v4687_v26 = vadd.f32 %v2173_v60, %v1916_v44  ;;  %v5481_v44 = vld [vmem:[#allocation83_spill] sm:$0xff]  ;;  %v421_v29 = vmul.f32 %v3017_v21, %v5482_v61  ;;  %v751_v14 = vadd.f32 %v715_v17, %v422_v34  ;;  %v1007_v10 = vmul.f32 %v3018_v5, %v5483_v27  ;;  %v5486_v34 = vld [vmem:[#allocation154_spill] sm:$0xff] }
 0x30a   : > { %2436 = vperm.xlu2 %3005, %v2256_v20   ;;  %2431 = vperm.xlu1 %3004, %v2255_v45   ;;  %v1008_v60 = vmul.f32 %v3018_v5, %v5481_v44  ;;  %v1301_v63 = vmul.f32 %v3019_v56, %v5484_v3  ;;  %v1920_v46 = vadd.f32 %v1884_v32, %v1627_v52  ;;  %v2516_v32 = vld [vmem:[%s3066_s17 + $0x36] sm:$0xff]  ;;  %v5487_v52 = vld [vmem:[#allocation155_spill] sm:$0xff] }
 0x30b   : > { %5476 = vst [vmem:[#allocation19_spill] sm:$0xff] %v4687_v26  ;;  %2426 = vperm.xlu0 %3003, %v2254_v35   ;;  %v1626_v26 = vadd.f32 %v1590_v42, %v1333_v28  ;;  %v750_v45 = vadd.f32 %v714_v47, %v421_v29  ;;  %v5485_v35 = vld [vmem:[#allocation119_spill] sm:$0xff]  ;;  %v1594_v55 = vmul.f32 %v3020_v49, %v5486_v34 }
 0x30c   : > { %v2272_v22 = vpop.permute.xlu2 %2271  ;;  %v2109_v6 = vpop.permute.xlu1 %2108  ;;  %v1300_v21 = vmul.f32 %v3019_v56, %v5485_v35  ;;  %v1044_v42 = vadd.f32 %v1008_v60, %v751_v14  ;;  %v1593_v61 = vmul.f32 %v3020_v49, %v5487_v52  ;;  %v2514_v47 = vld [vmem:[%s3066_s17 + $0x26] sm:$0xff]  ;;  %v2519_v35 = vld [vmem:[%s3066_s17 + $0x4e] sm:$0xff] }
 0x30d   : > { %v2444_v40 = vmul.f32 %v4696_v48, %v2272_v22  ;;  %v2177_v20 = vmul.f32 %v4140_v12, %v2109_v6  ;;  %v1919_v17 = vadd.f32 %v1883_v57, %v1626_v26  ;;  %v2515_v22 = vld [vmem:[%s3066_s17 + $0x2e] sm:$0xff]  ;;  %v1043_v44 = vadd.f32 %v1007_v10, %v750_v45 }
 0x30e   : > { %v2104_v2 = vpop.permute.xlu0 %2103  ;;  %v1337_v56 = vadd.f32 %v1301_v63, %v1044_v42 }
 0x30f   : > { %v2176_v5 = vmul.f32 %v4140_v12, %v2104_v2  ;;  %v4711_v28 = vadd.f32 %v2444_v40, %v4190_v18  ;;  %v4713_v19 = vadd.f32 %v2177_v20, %v1920_v46  ;;  %v3021_v12 = vld [vmem:[%s5112_s1 + $0x5] ss:$0 sm:$0xff]  ;;  %v1336_v57 = vadd.f32 %v1300_v21, %v1043_v44  ;;  %v5488_v18 = vld [vmem:[#allocation8_spill] sm:$0xff]  ;;  %v2518_v21 = vld [vmem:[%s3066_s17 + $0x46] sm:$0xff] }
 0x310   : > { %v1887_v26 = vmul.f32 %v3021_v12, %v4239_v16  ;;  %v1886_v60 = vmul.f32 %v3021_v12, %v5488_v18  ;;  %v1630_v29 = vadd.f32 %v1594_v55, %v1337_v56  ;;  %v3022_v16 = vld [vmem:[%s5112_s1 + $0x6] ss:$0 sm:$0xff]  ;;  %v2520_v12 = vld [vmem:[%s3066_s17 + $0x56] sm:$0xff] }
 0x311   : > { %v4718_v27 = vadd.f32 %v2176_v5, %v1919_v17  ;;  %v1629_v49 = vadd.f32 %v1593_v61, %v1336_v57  ;;  %v2517_v5 = vld [vmem:[%s3066_s17 + $0x3e] sm:$0xff]  ;;  %v2522_v61 = vld [vmem:[%s3066_s17 + $0x66] sm:$0xff] }
 0x312   : > { %2564 = vperm.xlu2 %3005, %v2516_v32   ;;  %2559 = vperm.xlu1 %3004, %v2515_v22   ;;  %v1923_v6 = vadd.f32 %v1887_v26, %v1630_v29 }
 0x313   : > { %2554 = vperm.xlu0 %3003, %v2514_v47   ;;  %v1922_v40 = vadd.f32 %v1886_v60, %v1629_v49  ;;  %v2521_v47 = vld [vmem:[%s3066_s17 + $0x5e] sm:$0xff] }
 0x314   : > { %v2287_v14 = vpop.permute.xlu2 %2286  ;;  %v2124_v10 = vpop.permute.xlu1 %2123  ;;  %v2525_v49 = vld [vmem:[%s3066_s17 + $0x7e] sm:$0xff] }
 0x315   : > { %v2447_v3 = vmul.f32 %v4696_v48, %v2287_v14  ;;  %v2180_v63 = vmul.f32 %v3022_v16, %v2124_v10  ;;  %v2524_v14 = vld [vmem:[%s3066_s17 + $0x76] sm:$0xff] }
 0x316   : > { %v2119_v46 = vpop.permute.xlu0 %2118 }
 0x317   : > { %v2179_v20 = vmul.f32 %v3022_v16, %v2119_v46  ;;  %v4731_v2 = vadd.f32 %v2447_v3, %v4262_v9  ;;  %v4733_v45 = vadd.f32 %v2180_v63, %v1923_v6  ;;  %v2523_v6 = vld [vmem:[%s3066_s17 + $0x6e] sm:$0xff] }
 0x319   : > { %v4737_v17 = vadd.f32 %v2179_v20, %v1922_v40  ;;  %v2528_v20 = vld [vmem:[%s3066_s17 + $0x96] sm:$0xff] }
 0x31a   : > { %2579 = vperm.xlu2 %3005, %v2519_v35   ;;  %2574 = vperm.xlu1 %3004, %v2518_v21   ;;  %v2527_v35 = vld [vmem:[%s3066_s17 + $0x8e] sm:$0xff] }
 0x31b   : > { %2569 = vperm.xlu0 %3003, %v2517_v5   ;;  %v2526_v5 = vld [vmem:[%s3066_s17 + $0x86] sm:$0xff] }
 0x31c   : > { %v2302_v42 = vpop.permute.xlu2 %2301  ;;  %v2139_v34 = vpop.permute.xlu1 %2138 }
 0x31d   : > { %v2450_v55 = vmul.f32 %v4696_v48, %v2302_v42  ;;  %v2183_v32 = vmul.f32 %v3022_v16, %v2139_v34 }
 0x31e   : > { %v2134_v9 = vpop.permute.xlu0 %2133 }
 0x31f   : > { %v2182_v22 = vmul.f32 %v3022_v16, %v2134_v9  ;;  %v4742_v44 = vadd.f32 %v2450_v55, %v4303_v11  ;;  %v4745_v52 = vadd.f32 %v2183_v32, %v4305_v51 }
 0x321   : > { %v4750_v56 = vadd.f32 %v2182_v22, %v4314_v31  ;;  %v2531_v22 = vld [vmem:[%s3066_s17 + $0xae] sm:$0xff] }
 0x322   : > { %2594 = vperm.xlu2 %3005, %v2522_v61   ;;  %2589 = vperm.xlu1 %3004, %v2521_v47   ;;  %v2530_v61 = vld [vmem:[%s3066_s17 + $0xa6] sm:$0xff] }
 0x323   : > { %2584 = vperm.xlu0 %3003, %v2520_v12   ;;  %v2529_v12 = vld [vmem:[%s3066_s17 + $0x9e] sm:$0xff] }
 0x324   : > { %v2317_v26 = vpop.permute.xlu2 %2316  ;;  %v2267_v57 = vpop.permute.xlu1 %2266 }
 0x325   : > { %v2453_v11 = vmul.f32 %v4696_v48, %v2317_v26  ;;  %v2443_v18 = vmul.f32 %v4696_v48, %v2267_v57 }
 0x326   : > { %v2262_v51 = vpop.permute.xlu0 %2261 }
 0x327   : > { %v2442_v60 = vmul.f32 %v4696_v48, %v2262_v51  ;;  %v4757_v29 = vadd.f32 %v2453_v11, %v4346_v59  ;;  %v4760_v31 = vadd.f32 %v2443_v18, %v4348_v4 }
 0x329   : > { %v4765_v10 = vadd.f32 %v2442_v60, %v4357_v38  ;;  %v2534_v60 = vld [vmem:[%s3066_s17 + $0xc6] sm:$0xff] }
 0x32a   : > { %2609 = vperm.xlu2 %3005, %v2525_v49   ;;  %2604 = vperm.xlu1 %3004, %v2524_v14   ;;  %v2533_v49 = vld [vmem:[%s3066_s17 + $0xbe] sm:$0xff] }
 0x32b   : > { %2599 = vperm.xlu0 %3003, %v2523_v6   ;;  %v2532_v6 = vld [vmem:[%s3066_s17 + $0xb6] sm:$0xff] }
 0x32c   : > { %v2332_v3 = vpop.permute.xlu2 %2331  ;;  %v2282_v16 = vpop.permute.xlu1 %2281 }
 0x32d   : > { %v2456_v59 = vmul.f32 %v4696_v48, %v2332_v3  ;;  %v2446_v63 = vmul.f32 %v4696_v48, %v2282_v16 }
 0x32e   : > { %v2277_v4 = vpop.permute.xlu0 %2276 }
 0x32f   : > { %v2445_v46 = vmul.f32 %v4696_v48, %v2277_v4  ;;  %v4772_v40 = vadd.f32 %v2456_v59, %v4389_v8  ;;  %v4775_v38 = vadd.f32 %v2446_v63, %v4391_v30 }
 0x331   : > { %v4780_v21 = vadd.f32 %v2445_v46, %v4400_v25  ;;  %v2537_v46 = vld [vmem:[%s3066_s17 + $0xde] sm:$0xff] }
 0x332   : > { %2624 = vperm.xlu2 %3005, %v2528_v20   ;;  %2619 = vperm.xlu1 %3004, %v2527_v35   ;;  %v2536_v20 = vld [vmem:[%s3066_s17 + $0xd6] sm:$0xff] }
 0x333   : > { %2614 = vperm.xlu0 %3003, %v2526_v5   ;;  %v2535_v5 = vld [vmem:[%s3066_s17 + $0xce] sm:$0xff] }
 0x334   : > { %v2347_v42 = vpop.permute.xlu2 %2346  ;;  %v2297_v34 = vpop.permute.xlu1 %2296 }
 0x335   : > { %v2459_v8 = vmul.f32 %v4696_v48, %v2347_v42  ;;  %v2449_v55 = vmul.f32 %v4696_v48, %v2297_v34 }
 0x336   : > { %v2292_v30 = vpop.permute.xlu0 %2291 }
 0x337   : > { %v2448_v32 = vmul.f32 %v4696_v48, %v2292_v30  ;;  %v4787_v9 = vadd.f32 %v2459_v8, %v4432_v15  ;;  %v4790_v25 = vadd.f32 %v2449_v55, %v4434_v54 }
 0x339   : > { %v4795_v47 = vadd.f32 %v2448_v32, %v4443_v36  ;;  %v2540_v32 = vld [vmem:[%s3066_s17 + $0xf6] sm:$0xff] }
 0x33a   : > { %2639 = vperm.xlu2 %3005, %v2531_v22   ;;  %2634 = vperm.xlu1 %3004, %v2530_v61   ;;  %v2539_v22 = vld [vmem:[%s3066_s17 + $0xee] sm:$0xff] }
 0x33b   : > { %2629 = vperm.xlu0 %3003, %v2529_v12   ;;  %v2538_v12 = vld [vmem:[%s3066_s17 + $0xe6] sm:$0xff] }
 0x33c   : > { %v2362_v26 = vpop.permute.xlu2 %2361  ;;  %v2312_v57 = vpop.permute.xlu1 %2311 }
 0x33d   : > { %v2462_v15 = vmul.f32 %v4696_v48, %v2362_v26  ;;  %v2452_v11 = vmul.f32 %v4696_v48, %v2312_v57 }
 0x33e   : > { %v2307_v54 = vpop.permute.xlu0 %2306 }
 0x33f   : > { %v2451_v18 = vmul.f32 %v4696_v48, %v2307_v54  ;;  %v4802_v51 = vadd.f32 %v2462_v15, %v4475_v23  ;;  %v4805_v36 = vadd.f32 %v2452_v11, %v4477_v39 }
 0x341   : > { %v4810_v14 = vadd.f32 %v2451_v18, %v4486_v37  ;;  %v2543_v18 = vld [vmem:[%s3066_s17 + $0x10e] sm:$0xff] }
 0x342   : > { %2654 = vperm.xlu2 %3005, %v2534_v60   ;;  %2649 = vperm.xlu1 %3004, %v2533_v49   ;;  %v2542_v60 = vld [vmem:[%s3066_s17 + $0x106] sm:$0xff] }
 0x343   : > { %2644 = vperm.xlu0 %3003, %v2532_v6   ;;  %v2541_v6 = vld [vmem:[%s3066_s17 + $0xfe] sm:$0xff] }
 0x344   : > { %v2377_v3 = vpop.permute.xlu2 %2376  ;;  %v2327_v16 = vpop.permute.xlu1 %2326 }
 0x345   : > { %v2465_v23 = vmul.f32 %v4696_v48, %v2377_v3  ;;  %v2455_v59 = vmul.f32 %v4696_v48, %v2327_v16 }
 0x346   : > { %v2322_v39 = vpop.permute.xlu0 %2321 }
 0x347   : > { %v2454_v63 = vmul.f32 %v4696_v48, %v2322_v39  ;;  %v4817_v4 = vadd.f32 %v2465_v23, %v4518_v58  ;;  %v4820_v37 = vadd.f32 %v2455_v59, %v4520_v13 }
 0x349   : > { %v4825_v35 = vadd.f32 %v2454_v63, %v4529_v62  ;;  %v2546_v63 = vld [vmem:[%s3066_s17 + $0x126] sm:$0xff] }
 0x34a   : > { %2669 = vperm.xlu2 %3005, %v2537_v46   ;;  %2664 = vperm.xlu1 %3004, %v2536_v20   ;;  %v2545_v46 = vld [vmem:[%s3066_s17 + $0x11e] sm:$0xff]  ;;  %v5489_v20 = vld [vmem:[#allocation15_spill] sm:$0xff] }
 0x34b   : > { %2659 = vperm.xlu0 %3003, %v2535_v5  }
 0x34c   : > { %v2392_v42 = vpop.permute.xlu2 %2391  ;;  %v2342_v34 = vpop.permute.xlu1 %2341 }
 0x34d   : > { %v2468_v58 = vmul.f32 %v4696_v48, %v2392_v42  ;;  %v2458_v8 = vmul.f32 %v4696_v48, %v2342_v34  ;;  %v2544_v42 = vld [vmem:[%s3066_s17 + $0x116] sm:$0xff] }
 0x34e   : > { %v2337_v13 = vpop.permute.xlu0 %2336 }
 0x34f   : > { %v2457_v55 = vmul.f32 %v4696_v48, %v2337_v13  ;;  %v4832_v30 = vadd.f32 %v2468_v58, %v4559_v53  ;;  %v4835_v62 = vadd.f32 %v2458_v8, %v4561_v24 }
 0x351   : > { %v4840_v61 = vadd.f32 %v2457_v55, %v4570_v33 }
 0x352   : > { %2684 = vperm.xlu2 %3005, %v2540_v32   ;;  %2679 = vperm.xlu1 %3004, %v2539_v22   ;;  %v5490_v32 = vld [vmem:[#allocation18_spill] sm:$0xff] }
 0x353   : > { %2674 = vperm.xlu0 %3003, %v2538_v12   ;;  %v2549_v12 = vld [vmem:[%s3066_s17 + $0x13e] sm:$0xff] }
 0x354   : > { %v2407_v26 = vpop.permute.xlu2 %2406  ;;  %v2357_v57 = vpop.permute.xlu1 %2356 }
 0x355   : > { %v2471_v53 = vmul.f32 %v4696_v48, %v2407_v26  ;;  %v2461_v15 = vmul.f32 %v4696_v48, %v2357_v57  ;;  %v2548_v26 = vld [vmem:[%s3066_s17 + $0x136] sm:$0xff]  ;;  %v5491_v57 = vld [vmem:[#allocation19_spill] sm:$0xff] }
 0x356   : > { %v2352_v24 = vpop.permute.xlu0 %2351 }
 0x357   : > { %v2460_v11 = vmul.f32 %v4696_v48, %v2352_v24  ;;  %v4847_v54 = vadd.f32 %v2471_v53, %v4599_v43  ;;  %v4850_v33 = vadd.f32 %v2461_v15, %v4601_v50  ;;  %v2547_v15 = vld [vmem:[%s3066_s17 + $0x12e] sm:$0xff]  ;;  %v4891_v24 = vld [vmem:[%s5112_s1 + $0x8] ss:$0 sm:$0xff]  ;;  %s2993_s17 = smul.u32 288, %s5493_s13 }
 0x359   : > { %v4855_v49 = vadd.f32 %v2460_v11, %v4609_v0  ;;  %s4913_s30 = scalar_lea.vmem %s5114_s3, %s2993_s17 }
 0x35a   : > { %2699 = vperm.xlu2 %3005, %v2543_v18   ;;  %2694 = vperm.xlu1 %3004, %v2542_v60   ;;  %v4896_v18 = vld [vmem:[%s5113_s2] ss:$0 sm:$0xff] }
 0x35b   : > { %2689 = vperm.xlu0 %3003, %v2541_v6  }
 0x35c   : > { %v2422_v3 = vpop.permute.xlu2 %2421  ;;  %v2372_v16 = vpop.permute.xlu1 %2371 }
 0x35d   : > { %v2474_v43 = vmul.f32 %v4696_v48, %v2422_v3  ;;  %v2464_v23 = vmul.f32 %v4696_v48, %v2372_v16 }
 0x35e   : > { %v2367_v50 = vpop.permute.xlu0 %2366 }
 0x35f   : > { %v2463_v59 = vmul.f32 %v4696_v48, %v2367_v50  ;;  %v4862_v39 = vadd.f32 %v2474_v43, %v4636_v41  ;;  %v4865_v0 = vadd.f32 %v2464_v23, %v4638_v1 }
 0x361   : > { %v4870_v5 = vadd.f32 %v2463_v59, %v5489_v20 }
 0x362   : > { %2714 = vperm.xlu2 %3005, %v2546_v63   ;;  %2709 = vperm.xlu1 %3004, %v2545_v46  }
 0x363   : > { %2704 = vperm.xlu0 %3003, %v2544_v42  }
 0x364   : > { %v2437_v34 = vpop.permute.xlu2 %2436  ;;  %v2387_v58 = vpop.permute.xlu1 %2386 }
 0x365   : > { %v2477_v41 = vmul.f32 %v4696_v48, %v2437_v34  ;;  %v2467_v8 = vmul.f32 %v4696_v48, %v2387_v58 }
 0x366   : > { %v2382_v1 = vpop.permute.xlu0 %2381 }
 0x367   : > { %v2466_v13 = vmul.f32 %v4696_v48, %v2382_v1  ;;  %v4877_v55 = vadd.f32 %v2477_v41, %v4679_v7  ;;  %v4880_v22 = vadd.f32 %v2467_v8, %v5490_v32 }
 0x369   : > { %v4885_v53 = vadd.f32 %v2466_v13, %v5491_v57 }
 0x36a   : > { %2729 = vperm.xlu2 %3005, %v2549_v12   ;;  %2724 = vperm.xlu1 %3004, %v2548_v26  }
 0x36b   : > { %2719 = vperm.xlu0 %3003, %v2547_v15  }
 0x36c   : > { %v2565_v7 = vpop.permute.xlu2 %2564  ;;  %v2402_v11 = vpop.permute.xlu1 %2401 }
 0x36d   : > { %v2737_v60 = vmul.f32 %v4891_v24, %v2565_v7  ;;  %v2470_v6 = vmul.f32 %v4696_v48, %v2402_v11 }
 0x36e   : > { %v2397_v3 = vpop.permute.xlu0 %2396 }
 0x36f   : > { %v2469_v16 = vmul.f32 %v4696_v48, %v2397_v3  ;;  %v2773_v43 = vadd.f32 %v2737_v60, %v4711_v28  ;;  %v4904_v23 = vadd.f32 %v2470_v6, %v4713_v19 }
 0x371   : > { %v4907_v50 = vadd.f32 %v2469_v16, %v4718_v27  ;;  %v2813_v59 = vadd.f32 %v4896_v18, %v2773_v43 }
 0x373   : > { %v2849_v63 = vmax.f32 %v2813_v59, 0.0 }
 0x374   : > { %v2580_v46 = vpop.permute.xlu2 %2579  ;;  %v2417_v20 = vpop.permute.xlu1 %2416 }
 0x375   : > { %2886 = vst.msk [vmem:[%s4913_s30 + $0x10] sm:$0xff] %vm2883_vm0, %v2849_v63  ;;  %v2740_v28 = vmul.f32 %v4891_v24, %v2580_v46  ;;  %v2473_v19 = vmul.f32 %v4696_v48, %v2417_v20 }
 0x376   : > { %v2412_v27 = vpop.permute.xlu0 %2411 }
 0x377   : > { %v2472_v42 = vmul.f32 %v4696_v48, %v2412_v27  ;;  %v2776_v34 = vadd.f32 %v2740_v28, %v4731_v2  ;;  %v4922_v58 = vadd.f32 %v2473_v19, %v4733_v45 }
 0x379   : > { %v4925_v41 = vadd.f32 %v2472_v42, %v4737_v17  ;;  %v2816_v8 = vadd.f32 %v4896_v18, %v2776_v34 }
 0x37b   : > { %v2852_v1 = vmax.f32 %v2816_v8, 0.0 }
 0x37c   : > { %v2595_v13 = vpop.permute.xlu2 %2594  ;;  %v2432_v32 = vpop.permute.xlu1 %2431 }
 0x37d   : > { %2889 = vst.msk [vmem:[%s4913_s30 + $0x28] sm:$0xff] %vm2883_vm0, %v2852_v1  ;;  %v2743_v12 = vmul.f32 %v4891_v24, %v2595_v13  ;;  %v2476_v26 = vmul.f32 %v4696_v48, %v2432_v32 }
 0x37e   : > { %v2427_v57 = vpop.permute.xlu0 %2426 }
 0x37f   : > { %v2475_v2 = vmul.f32 %v4696_v48, %v2427_v57  ;;  %v2779_v45 = vadd.f32 %v2743_v12, %v4742_v44  ;;  %v4935_v17 = vadd.f32 %v2476_v26, %v4745_v52 }
 0x381   : > { %v4938_v15 = vadd.f32 %v2475_v2, %v4750_v56  ;;  %v2819_v7 = vadd.f32 %v4896_v18, %v2779_v45 }
 0x383   : > { %v2855_v11 = vmax.f32 %v2819_v7, 0.0 }
 0x384   : > { %v2610_v60 = vpop.permute.xlu2 %2609  ;;  %v2560_v6 = vpop.permute.xlu1 %2559 }
 0x385   : > { %2892 = vst.msk [vmem:[%s4913_s30 + $0x40] sm:$0xff] %vm2883_vm0, %v2855_v11  ;;  %v2746_v3 = vmul.f32 %v4891_v24, %v2610_v60  ;;  %v2736_v48 = vmul.f32 %v4891_v24, %v2560_v6 }
 0x386   : > { %v2555_v16 = vpop.permute.xlu0 %2554 }
 0x387   : > { %v2735_v44 = vmul.f32 %v4891_v24, %v2555_v16  ;;  %v2782_v52 = vadd.f32 %v2746_v3, %v4757_v29  ;;  %v2772_v56 = vadd.f32 %v2736_v48, %v4760_v31 }
 0x389   : > { %v2771_v43 = vadd.f32 %v2735_v44, %v4765_v10  ;;  %v2822_v59 = vadd.f32 %v4896_v18, %v2782_v52  ;;  %v2812_v63 = vadd.f32 %v4896_v18, %v2772_v56 }
 0x38b   : > { %v2811_v46 = vadd.f32 %v4896_v18, %v2771_v43  ;;  %v2858_v20 = vmax.f32 %v2822_v59, 0.0  ;;  %v2848_v28 = vmax.f32 %v2812_v63, 0.0 }
 0x38c   : > { %v2625_v27 = vpop.permute.xlu2 %2624  ;;  %v2575_v42 = vpop.permute.xlu1 %2574 }
 0x38d   : > { %v2847_v19 = vmax.f32 %v2811_v46, 0.0  ;;  %2895 = vst.msk [vmem:[%s4913_s30 + $0x58] sm:$0xff] %vm2883_vm0, %v2858_v20  ;;  %v2749_v29 = vmul.f32 %v4891_v24, %v2625_v27  ;;  %v2739_v31 = vmul.f32 %v4891_v24, %v2575_v42 }
 0x38e   : > { %v2570_v34 = vpop.permute.xlu0 %2569  ;;  %2885 = vst.msk [vmem:[%s4913_s30 + $0x8] sm:$0xff] %vm2883_vm0, %v2848_v28 }
 0x38f   : > { %v2738_v10 = vmul.f32 %v4891_v24, %v2570_v34  ;;  %2884 = vst.msk [vmem:[%s4913_s30] sm:$0xff] %vm2883_vm0, %v2847_v19  ;;  %v2785_v8 = vadd.f32 %v2749_v29, %v4772_v40  ;;  %v2775_v1 = vadd.f32 %v2739_v31, %v4775_v38 }
 0x391   : > { %v2774_v13 = vadd.f32 %v2738_v10, %v4780_v21  ;;  %v2825_v32 = vadd.f32 %v4896_v18, %v2785_v8  ;;  %v2815_v12 = vadd.f32 %v4896_v18, %v2775_v1 }
 0x393   : > { %v2814_v26 = vadd.f32 %v4896_v18, %v2774_v13  ;;  %v2861_v57 = vmax.f32 %v2825_v32, 0.0  ;;  %v2851_v2 = vmax.f32 %v2815_v12, 0.0 }
 0x394   : > { %v2640_v7 = vpop.permute.xlu2 %2639  ;;  %v2590_v11 = vpop.permute.xlu1 %2589 }
 0x395   : > { %v2850_v45 = vmax.f32 %v2814_v26, 0.0  ;;  %2898 = vst.msk [vmem:[%s4913_s30 + $0x70] sm:$0xff] %vm2883_vm0, %v2861_v57  ;;  %v2752_v40 = vmul.f32 %v4891_v24, %v2640_v7  ;;  %v2742_v38 = vmul.f32 %v4891_v24, %v2590_v11 }
 0x396   : > { %v2585_v60 = vpop.permute.xlu0 %2584  ;;  %2888 = vst.msk [vmem:[%s4913_s30 + $0x20] sm:$0xff] %vm2883_vm0, %v2851_v2 }
 0x397   : > { %v2741_v21 = vmul.f32 %v4891_v24, %v2585_v60  ;;  %2887 = vst.msk [vmem:[%s4913_s30 + $0x18] sm:$0xff] %vm2883_vm0, %v2850_v45  ;;  %v2788_v6 = vadd.f32 %v2752_v40, %v4787_v9  ;;  %v2778_v3 = vadd.f32 %v2742_v38, %v4790_v25 }
 0x399   : > { %v2777_v48 = vadd.f32 %v2741_v21, %v4795_v47  ;;  %v2828_v16 = vadd.f32 %v4896_v18, %v2788_v6  ;;  %v2818_v44 = vadd.f32 %v4896_v18, %v2778_v3 }
 0x39b   : > { %v2817_v52 = vadd.f32 %v4896_v18, %v2777_v48  ;;  %v2864_v56 = vmax.f32 %v2828_v16, 0.0  ;;  %v2854_v43 = vmax.f32 %v2818_v44, 0.0 }
 0x39c   : > { %v2655_v63 = vpop.permute.xlu2 %2654  ;;  %v2605_v46 = vpop.permute.xlu1 %2604 }
 0x39d   : > { %v2853_v59 = vmax.f32 %v2817_v52, 0.0  ;;  %2901 = vst.msk [vmem:[%s4913_s30 + $0x88] sm:$0xff] %vm2883_vm0, %v2864_v56  ;;  %v2755_v9 = vmul.f32 %v4891_v24, %v2655_v63  ;;  %v2745_v25 = vmul.f32 %v4891_v24, %v2605_v46 }
 0x39e   : > { %v2600_v20 = vpop.permute.xlu0 %2599  ;;  %2891 = vst.msk [vmem:[%s4913_s30 + $0x38] sm:$0xff] %vm2883_vm0, %v2854_v43 }
 0x39f   : > { %v2744_v47 = vmul.f32 %v4891_v24, %v2600_v20  ;;  %2890 = vst.msk [vmem:[%s4913_s30 + $0x30] sm:$0xff] %vm2883_vm0, %v2853_v59  ;;  %v2791_v28 = vadd.f32 %v2755_v9, %v4802_v51  ;;  %v2781_v19 = vadd.f32 %v2745_v25, %v4805_v36 }
 0x3a1   : > { %v2780_v27 = vadd.f32 %v2744_v47, %v4810_v14  ;;  %v2831_v42 = vadd.f32 %v4896_v18, %v2791_v28  ;;  %v2821_v29 = vadd.f32 %v4896_v18, %v2781_v19 }
 0x3a3   : > { %v2820_v31 = vadd.f32 %v4896_v18, %v2780_v27  ;;  %v2867_v34 = vmax.f32 %v2831_v42, 0.0  ;;  %v2857_v10 = vmax.f32 %v2821_v29, 0.0 }
 0x3a4   : > { %v2670_v1 = vpop.permute.xlu2 %2669  ;;  %v2620_v13 = vpop.permute.xlu1 %2619 }
 0x3a5   : > { %v2856_v8 = vmax.f32 %v2820_v31, 0.0  ;;  %2904 = vst.msk [vmem:[%s4913_s30 + $0xa0] sm:$0xff] %vm2883_vm0, %v2867_v34  ;;  %v2758_v51 = vmul.f32 %v4891_v24, %v2670_v1  ;;  %v2748_v36 = vmul.f32 %v4891_v24, %v2620_v13 }
 0x3a6   : > { %v2615_v32 = vpop.permute.xlu0 %2614  ;;  %2894 = vst.msk [vmem:[%s4913_s30 + $0x50] sm:$0xff] %vm2883_vm0, %v2857_v10 }
 0x3a7   : > { %v2747_v14 = vmul.f32 %v4891_v24, %v2615_v32  ;;  %2893 = vst.msk [vmem:[%s4913_s30 + $0x48] sm:$0xff] %vm2883_vm0, %v2856_v8  ;;  %v2794_v12 = vadd.f32 %v2758_v51, %v4817_v4  ;;  %v2784_v26 = vadd.f32 %v2748_v36, %v4820_v37 }
 0x3a9   : > { %v2783_v57 = vadd.f32 %v2747_v14, %v4825_v35  ;;  %v2834_v2 = vadd.f32 %v4896_v18, %v2794_v12  ;;  %v2824_v45 = vadd.f32 %v4896_v18, %v2784_v26 }
 0x3ab   : > { %v2823_v7 = vadd.f32 %v4896_v18, %v2783_v57  ;;  %v2870_v11 = vmax.f32 %v2834_v2, 0.0  ;;  %v2860_v40 = vmax.f32 %v2824_v45, 0.0 }
 0x3ac   : > { %v2685_v60 = vpop.permute.xlu2 %2684  ;;  %v2635_v21 = vpop.permute.xlu1 %2634 }
 0x3ad   : > { %v2859_v38 = vmax.f32 %v2823_v7, 0.0  ;;  %2907 = vst.msk [vmem:[%s4913_s30 + $0xb8] sm:$0xff] %vm2883_vm0, %v2870_v11  ;;  %v2761_v4 = vmul.f32 %v4891_v24, %v2685_v60  ;;  %v2751_v37 = vmul.f32 %v4891_v24, %v2635_v21 }
 0x3ae   : > { %v2630_v6 = vpop.permute.xlu0 %2629  ;;  %2897 = vst.msk [vmem:[%s4913_s30 + $0x68] sm:$0xff] %vm2883_vm0, %v2860_v40 }
 0x3af   : > { %v2750_v35 = vmul.f32 %v4891_v24, %v2630_v6  ;;  %2896 = vst.msk [vmem:[%s4913_s30 + $0x60] sm:$0xff] %vm2883_vm0, %v2859_v38  ;;  %v2797_v3 = vadd.f32 %v2761_v4, %v4832_v30  ;;  %v2787_v48 = vadd.f32 %v2751_v37, %v4835_v62 }
 0x3b1   : > { %v2786_v16 = vadd.f32 %v2750_v35, %v4840_v61  ;;  %v2837_v44 = vadd.f32 %v4896_v18, %v2797_v3  ;;  %v2827_v52 = vadd.f32 %v4896_v18, %v2787_v48 }
 0x3b3   : > { %v2826_v56 = vadd.f32 %v4896_v18, %v2786_v16  ;;  %v2873_v43 = vmax.f32 %v2837_v44, 0.0  ;;  %v2863_v59 = vmax.f32 %v2827_v52, 0.0 }
 0x3b4   : > { %v2700_v46 = vpop.permute.xlu2 %2699  ;;  %v2650_v9 = vpop.permute.xlu1 %2649 }
 0x3b5   : > { %v2862_v63 = vmax.f32 %v2826_v56, 0.0  ;;  %2910 = vst.msk [vmem:[%s4913_s30 + $0xd0] sm:$0xff] %vm2883_vm0, %v2873_v43  ;;  %v2764_v30 = vmul.f32 %v4891_v24, %v2700_v46  ;;  %v2754_v62 = vmul.f32 %v4891_v24, %v2650_v9 }
 0x3b6   : > { %v2645_v25 = vpop.permute.xlu0 %2644  ;;  %2900 = vst.msk [vmem:[%s4913_s30 + $0x80] sm:$0xff] %vm2883_vm0, %v2863_v59 }
 0x3b7   : > { %v2753_v61 = vmul.f32 %v4891_v24, %v2645_v25  ;;  %2899 = vst.msk [vmem:[%s4913_s30 + $0x78] sm:$0xff] %vm2883_vm0, %v2862_v63  ;;  %v2800_v20 = vadd.f32 %v2764_v30, %v4847_v54  ;;  %v2790_v47 = vadd.f32 %v2754_v62, %v4850_v33 }
 0x3b9   : > { %v2789_v28 = vadd.f32 %v2753_v61, %v4855_v49  ;;  %v2840_v19 = vadd.f32 %v4896_v18, %v2800_v20  ;;  %v2830_v27 = vadd.f32 %v4896_v18, %v2790_v47 }
 0x3bb   : > { %v2829_v42 = vadd.f32 %v4896_v18, %v2789_v28  ;;  %v2876_v29 = vmax.f32 %v2840_v19, 0.0  ;;  %v2866_v31 = vmax.f32 %v2830_v27, 0.0 }
 0x3bc   : > { %v2715_v10 = vpop.permute.xlu2 %2714  ;;  %v2665_v8 = vpop.permute.xlu1 %2664 }
 0x3bd   : > { %v2865_v34 = vmax.f32 %v2829_v42, 0.0  ;;  %2913 = vst.msk [vmem:[%s4913_s30 + $0xe8] sm:$0xff] %vm2883_vm0, %v2876_v29  ;;  %v2767_v54 = vmul.f32 %v4891_v24, %v2715_v10  ;;  %v2757_v33 = vmul.f32 %v4891_v24, %v2665_v8 }
 0x3be   : > { %v2660_v1 = vpop.permute.xlu0 %2659  ;;  %2903 = vst.msk [vmem:[%s4913_s30 + $0x98] sm:$0xff] %vm2883_vm0, %v2866_v31 }
 0x3bf   : > { %v2756_v49 = vmul.f32 %v4891_v24, %v2660_v1  ;;  %2902 = vst.msk [vmem:[%s4913_s30 + $0x90] sm:$0xff] %vm2883_vm0, %v2865_v34  ;;  %v2803_v13 = vadd.f32 %v2767_v54, %v4862_v39  ;;  %v2793_v51 = vadd.f32 %v2757_v33, %v4865_v0 }
 0x3c1   : > { %v2792_v36 = vadd.f32 %v2756_v49, %v4870_v5  ;;  %v2843_v32 = vadd.f32 %v4896_v18, %v2803_v13  ;;  %v2833_v14 = vadd.f32 %v4896_v18, %v2793_v51 }
 0x3c3   : > { %v2832_v12 = vadd.f32 %v4896_v18, %v2792_v36  ;;  %v2879_v26 = vmax.f32 %v2843_v32, 0.0  ;;  %v2869_v57 = vmax.f32 %v2833_v14, 0.0 }
 0x3c4   : > { %v2730_v45 = vpop.permute.xlu2 %2729  ;;  %v2680_v7 = vpop.permute.xlu1 %2679 }
 0x3c5   : > { %v2868_v2 = vmax.f32 %v2832_v12, 0.0  ;;  %2916 = vst.msk [vmem:[%s4913_s30 + $0x100] sm:$0xff] %vm2883_vm0, %v2879_v26  ;;  %v2770_v39 = vmul.f32 %v4891_v24, %v2730_v45  ;;  %v2760_v0 = vmul.f32 %v4891_v24, %v2680_v7 }
 0x3c6   : > { %v2675_v11 = vpop.permute.xlu0 %2674  ;;  %2906 = vst.msk [vmem:[%s4913_s30 + $0xb0] sm:$0xff] %vm2883_vm0, %v2869_v57 }
 0x3c7   : > { %v2759_v5 = vmul.f32 %v4891_v24, %v2675_v11  ;;  %2905 = vst.msk [vmem:[%s4913_s30 + $0xa8] sm:$0xff] %vm2883_vm0, %v2868_v2  ;;  %v2806_v40 = vadd.f32 %v2770_v39, %v4877_v55  ;;  %v2796_v38 = vadd.f32 %v2760_v0, %v4880_v22 }
 0x3c9   : > { %v2795_v60 = vadd.f32 %v2759_v5, %v4885_v53  ;;  %v2846_v21 = vadd.f32 %v4896_v18, %v2806_v40  ;;  %v2836_v4 = vadd.f32 %v4896_v18, %v2796_v38 }
 0x3cb   : > { %v2835_v37 = vadd.f32 %v4896_v18, %v2795_v60  ;;  %v2882_v6 = vmax.f32 %v2846_v21, 0.0  ;;  %v2872_v35 = vmax.f32 %v2836_v4, 0.0 }
 0x3cc   : > { %v2695_v48 = vpop.permute.xlu1 %2694 }
 0x3cd   : > { %v2871_v3 = vmax.f32 %v2835_v37, 0.0  ;;  %2919 = vst.msk [vmem:[%s4913_s30 + $0x118] sm:$0xff] %vm2883_vm0, %v2882_v6  ;;  %v2763_v55 = vmul.f32 %v4891_v24, %v2695_v48 }
 0x3ce   : > { %v2690_v16 = vpop.permute.xlu0 %2689  ;;  %2909 = vst.msk [vmem:[%s4913_s30 + $0xc8] sm:$0xff] %vm2883_vm0, %v2872_v35 }
 0x3cf   : > { %v2762_v22 = vmul.f32 %v4891_v24, %v2690_v16  ;;  %2908 = vst.msk [vmem:[%s4913_s30 + $0xc0] sm:$0xff] %vm2883_vm0, %v2871_v3  ;;  %v2799_v53 = vadd.f32 %v2763_v55, %v4904_v23 }
 0x3d1   : > { %v2798_v44 = vadd.f32 %v2762_v22, %v4907_v50  ;;  %v2839_v52 = vadd.f32 %v4896_v18, %v2799_v53 }
 0x3d3   : > { %v2838_v56 = vadd.f32 %v4896_v18, %v2798_v44  ;;  %v2875_v43 = vmax.f32 %v2839_v52, 0.0 }
 0x3d4   : > { %v2710_v63 = vpop.permute.xlu1 %2709 }
 0x3d5   : > { %v2874_v59 = vmax.f32 %v2838_v56, 0.0  ;;  %2912 = vst.msk [vmem:[%s4913_s30 + $0xe0] sm:$0xff] %vm2883_vm0, %v2875_v43  ;;  %v2766_v46 = vmul.f32 %v4891_v24, %v2710_v63 }
 0x3d6   : > { %v2705_v9 = vpop.permute.xlu0 %2704 }
 0x3d7   : > { %2911 = vst.msk [vmem:[%s4913_s30 + $0xd8] sm:$0xff] %vm2883_vm0, %v2874_v59  ;;  %v2765_v23 = vmul.f32 %v4891_v24, %v2705_v9  ;;  %v2802_v50 = vadd.f32 %v2766_v46, %v4922_v58 }
 0x3d9   : > { %v2801_v30 = vadd.f32 %v2765_v23, %v4925_v41  ;;  %v2842_v62 = vadd.f32 %v4896_v18, %v2802_v50 }
 0x3db   : > { %v2841_v25 = vadd.f32 %v4896_v18, %v2801_v30  ;;  %v2878_v61 = vmax.f32 %v2842_v62, 0.0 }
 0x3dc   : > { %v2725_v47 = vpop.permute.xlu1 %2724 }
 0x3dd   : > { %v2877_v20 = vmax.f32 %v2841_v25, 0.0  ;;  %2915 = vst.msk [vmem:[%s4913_s30 + $0xf8] sm:$0xff] %vm2883_vm0, %v2878_v61  ;;  %v2769_v28 = vmul.f32 %v4891_v24, %v2725_v47 }
 0x3de   : > { %v2720_v19 = vpop.permute.xlu0 %2719 }
 0x3df   : > { %2914 = vst.msk [vmem:[%s4913_s30 + $0xf0] sm:$0xff] %vm2883_vm0, %v2877_v20  ;;  %v2768_v58 = vmul.f32 %v4891_v24, %v2720_v19  ;;  %v2805_v41 = vadd.f32 %v2769_v28, %v4935_v17 }
 0x3e1   : > { %v2804_v27 = vadd.f32 %v2768_v58, %v4938_v15  ;;  %v2845_v42 = vadd.f32 %v4896_v18, %v2805_v41 }
 0x3e3   : > { %v2844_v29 = vadd.f32 %v4896_v18, %v2804_v27  ;;  %v2881_v31 = vmax.f32 %v2845_v42, 0.0 }
 0x3e5   : > { %v2880_v34 = vmax.f32 %v2844_v29, 0.0  ;;  %2918 = vst.msk [vmem:[%s4913_s30 + $0x110] sm:$0xff] %vm2883_vm0, %v2881_v31 }
 0x3e7   : > { %2917 = vst.msk [vmem:[%s4913_s30 + $0x108] sm:$0xff] %vm2883_vm0, %v2880_v34 }
 0x3e8 PF: > { %s13_s12 = sadd.s32 1, %s3029_s12  }
 0x3e9   : > { %p10_p4 = scmp.ge.s32.totalorder %s13_s12, 4  }
 0x3eb   :  { %12 = sbr.rel (!%p10_p4) target bundleno = 1 (0x1), region = 70 }

// kernel: cnn_transformer_forward.15
= control target key start
LH: loop header
LB: loop body
LE: loop exit
PB: predicated region body
PF: predicated region fallthrough
CT: control target
= control target key end

     0   :  { %vm13_vm0 = vcmask 261120   ;;  %v94_v7 = vmov 16.0   ;;  %s121_s0 = inlined_call_operand.vmem [shape: f32[2,16,32], index: 0, kind: input, shape index: {}]   ;;  %s122_s1 = inlined_call_operand.hbm [shape: f32[2,32], index: 1, kind: output, shape index: {}]  }
   0x1   :  { %v9_v0 = vld [vmem:[%s121_s0] sm:$0xff]  ;;  %v10_v1 = vld [vmem:[%s121_s0 + $0x8] sm:$0xff]  ;;  %v11_v2 = vld [vmem:[%s121_s0 + $0x10] sm:$0xff]  ;;  %66 = vrcp.f32 %v94_v7 }
   0x2   :  { %v12_v3 = vld [vmem:[%s121_s0 + $0x18] sm:$0xff]  ;;  %v14_v4 = vsel %vm13_vm0, %v9_v0, 0.0  ;;  %v15_v5 = vsel %vm13_vm0, %v10_v1, 0.0  ;;  %v23_v6 = vsel %vm13_vm0, %v11_v2, 0.0 }
   0x3   :  { %6 = vsyncpa [#allocation3], 0  ;;  %v16_v8 = vadd.f32 %v15_v5, %v14_v4  ;;  %v24_v9 = vsel %vm13_vm0, %v12_v3, 0.0  ;;  %s95_s0 = smov [#allocation2]   ;;  %s55_s17 = sshll.u32 %s122_s1, 4  ;;  %vm43_vm2 = vcmask 1041409   ;;  %s56_s17 = int_to_ptr.hbm [resolvable:$true] %s55_s17 }
   0x4   :  { %v25_v10 = vadd.f32 %v24_v9, %v23_v6  ;;  %s53_s14 = sshll.u32 %s95_s0, 4  ;;  %vm46_vm3 = vcmask 254976   ;;  %s54_s14 = int_to_ptr.vmem [resolvable:$true] %s53_s14 }
   0x5   :  { %v17_v11 = vrot.slane %v16_v8, 4 }
   0x6   :  { %v26_v12 = vrot.slane %v25_v10, 4 }
   0x7   :  { %v18_v13 = vadd.f32 %v17_v11, %v16_v8  ;;  %v67_v14 = vpop.eup %66 }
   0x8   :  { %v27_v15 = vadd.f32 %v26_v12, %v25_v10  ;;  %v33_v17 = vmul.f32 16.0, %v67_v14  ;;  %vm37_vm1 = vweird.f32 %v67_v14 }
   0x9   :  { %v19_v16 = vrot.slane %v18_v13, 2 }
   0xa   :  { %v28_v18 = vrot.slane %v27_v15, 2  ;;  %v34_v20 = vsub.f32 1.0, %v33_v17 }
   0xb   :  { %v20_v19 = vadd.f32 %v19_v16, %v18_v13 }
   0xc   :  { %v29_v21 = vadd.f32 %v28_v18, %v27_v15  ;;  %v35_v23 = vmul.f32 %v67_v14, %v34_v20 }
   0xd   :  { %v21_v22 = vrot.slane %v20_v19, 1 }
   0xe   :  { %v30_v24 = vrot.slane %v29_v21, 1  ;;  %v36_v26 = vadd.f32 %v67_v14, %v35_v23 }
   0xf   :  { %v22_v25 = vadd.f32 %v21_v22, %v20_v19 }
  0x10   :  { %v31_v27 = vadd.f32 %v30_v24, %v29_v21  ;;  %v38_v28 = vsel %vm37_vm1, %v67_v14, %v36_v26 }
  0x11   :  { %v39_v29 = vmul.f32 %v38_v28, %v22_v25 }
  0x12   :  { %v40_v30 = vmul.f32 %v38_v28, %v31_v27 }
  0x14   :  { %v44_v31 = vsel %vm43_vm2, %v40_v30, %v39_v29 }
  0x15   :  { %47 = vst.msk [vmem:[#allocation2] sm:$0x3] %vm46_vm3, %v44_v31 }
  0x16   :  { %58 = dma.vmem_to_hbm [thread:$0]  %s54_s14, 32, %s56_s17, [#allocation3]  }
  0x17   :  { %92 = dma.done.wait [#allocation3], 32  }
  0x18   :  { %93 = vsyncadd [#allocation3], 4294967264 }
  0x19   :  { %63 = vsyncpa [#allocation3], 1 }

// kernel: cnn_transformer_forward.13
= control target key start
LH: loop header
LB: loop body
LE: loop exit
PB: predicated region body
PF: predicated region fallthrough
CT: control target
= control target key end

     0   :  { %s1664_s24 = smov 0   ;;  %s1916_s0 = inlined_call_operand.vmem [shape: f32[32,32], index: 0, kind: input, shape index: {}]   ;;  %s1917_s1 = inlined_call_operand.vmem [shape: f32[32,32], index: 1, kind: input, shape index: {}]   ;;  %s1918_s2 = inlined_call_operand.vmem [shape: f32[1,32], index: 2, kind: input, shape index: {}]   ;;  %s1919_s3 = inlined_call_operand.vmem [shape: f32[32,32], index: 3, kind: input, shape index: {}]   ;;  %s1920_s4 = inlined_call_operand.vmem [shape: f32[1,32], index: 4, kind: input, shape index: {}]   ;;  %s1921_s5 = inlined_call_operand.vmem [shape: f32[32,32], index: 5, kind: input, shape index: {}]   ;;  %s1922_s6 = inlined_call_operand.vmem [shape: f32[1,32], index: 6, kind: input, shape index: {}]   ;;  %s1923_s7 = inlined_call_operand.vmem [shape: f32[32,32], index: 7, kind: input, shape index: {}]   ;;  %s1924_s8 = inlined_call_operand.vmem [shape: f32[1,32], index: 8, kind: input, shape index: {}]   ;;  %s1925_s9 = inlined_call_operand.vmem [shape: f32[1,32], index: 9, kind: input, shape index: {}]   ;;  %s1926_s10 = inlined_call_operand.vmem [shape: f32[1,32], index: 10, kind: input, shape index: {}]   ;;  %s1927_s11 = inlined_call_operand.vmem [shape: f32[32,64], index: 11, kind: input, shape index: {}]   ;;  %s1928_s12 = inlined_call_operand.vmem [shape: f32[1,64], index: 12, kind: input, shape index: {}]   ;;  %s1929_s13 = inlined_call_operand.vmem [shape: f32[64,32], index: 13, kind: input, shape index: {}]   ;;  %s1930_s14 = inlined_call_operand.vmem [shape: f32[1,32], index: 14, kind: input, shape index: {}]   ;;  %s1931_s15 = inlined_call_operand.vmem [shape: f32[1,32], index: 15, kind: input, shape index: {}]   ;;  %s1932_s16 = inlined_call_operand.vmem [shape: f32[1,32], index: 16, kind: input, shape index: {}]   ;;  %s1933_s17 = inlined_call_operand.vmem [shape: f32[32,32], index: 17, kind: output, shape index: {}]  }
   0x1   :  { %1935 = sst [smem:[#allocation2_spill]] %s1916_s0 }
   0x2   :  { %1936 = sst [smem:[#allocation3_spill]] %s1917_s1 }
   0x3 LB: > { %s1426_s25 = sadd.s32 4294967295, %s1568_s24   ;;  %p1430_p0 = scmp.ge.s32.totalorder %s1568_s24, 1  ;;  %s1568_s24 = sphi %s1664_s24, %s27_s24  }
   0x4   : > { %p488_p1 = scmp.lt.s32.totalorder %s1568_s24, 3 }
   0x6   : > { %p489_p2 = pnand %p1430_p0, %p488_p1 }
   0x7   : > { %s1937_s28 = sld [smem:[#allocation3_spill]] (!%p489_p2)  ;;  %s1431_s30 = sshll.u32 (!%p489_p2), %s1426_s25, 1 }
   0x8   : > { %492 = sbr.rel (%p489_p2) target bundleno = 2164 (0x874), region = 88  ;;  %p541_p3 = scmp.lt.s32.totalorder (!%p489_p2), %s1431_s30, 3 }
   0x9   : > { %s1938_s27 = sld [smem:[#allocation2_spill]] (!%p489_p2)  ;;  %s1571_s0 = smov (!%p489_p2), 112  }
   0xa   : > { %s1572_s18 = smov (!%p489_p2), 104  }
   0xd   : > { %v557_v0 = vld [vmem:[%s1937_s28 + $0x18] sm:$0xff]  ;;  %v556_v1 = vld [vmem:[%s1937_s28 + $0x10] sm:$0xff]  ;;  %v555_v2 = vld [vmem:[%s1937_s28 + $0x8] sm:$0xff]  ;;  %s1940_s30 = smov (!%p541_p3, %s1431_s30), 3  ;;  %vm562_vm0 = vcmask 261120   ;;  %vm656_vm1 = vcmask 64512  }
   0xe   : > { %1479 = vmatpush.msra.mxu1 %v557_v0  ;;  %581 = vmatpush.msra.mxu0 %v557_v0  ;;  %v554_v3 = vld [vmem:[%s1937_s28] sm:$0xff]  ;;  %s1432_s21 = sshll.u32 %s1940_s30, 3  ;;  %v595_v4 = vld [vmem:[%s1919_s3 + $0x18] sm:$0xff]  ;;  %v594_v7 = vld [vmem:[%s1919_s3 + $0x10] sm:$0xff]  ;;  %vm692_vm2 = vcmask 130048   ;;  %vm1280_vm10 = vcmask 523264  }
   0xf   : > { %s544_s29 = scalar_lea.vmem %s1938_s27, %s1432_s21  ;;  %v593_v8 = vld [vmem:[%s1919_s3 + $0x8] sm:$0xff]  ;;  %v592_v9 = vld [vmem:[%s1919_s3] sm:$0xff]  ;;  %v626_v30 = vld [vmem:[%s1921_s5 + $0x18] sm:$0xff] }
  0x10   : > { %1480 = vmatpush.msra.mxu1 %v556_v1  ;;  %582 = vmatpush.msra.mxu0 %v556_v1  ;;  %v1695_v5 = vld [vmem:[%s544_s29 + $0x8] sm:$0xff]  ;;  %v1697_v6 = vld [vmem:[%s544_s29] sm:$0xff]  ;;  %s1570_s29 = smov 120   ;;  %v625_v31 = vld [vmem:[%s1921_s5 + $0x10] sm:$0xff] }
  0x11   : > { %v1511_v12 = vld [vmem:[%s1920_s4] ss:$0 sm:$0xff]  ;;  %643 = vmatpush.msra.mxu2 %v626_v30  ;;  %v624_v32 = vld [vmem:[%s1921_s5 + $0x8] sm:$0xff] }
  0x12   : > { %1481 = vmatpush.msra.mxu1 %v555_v2  ;;  %583 = vmatpush.msra.mxu0 %v555_v2  ;;  %v1510_v14 = vld [vmem:[%s1918_s2] ss:$0 sm:$0xff] }
  0x13   : > { %644 = vmatpush.msra.mxu2 %v625_v31  ;;  %v623_v33 = vld [vmem:[%s1921_s5] sm:$0xff] }
  0x14   : > { %1482 = vmatpush.msra.mxu1 %v554_v3  ;;  %584 = vmatpush.msra.mxu0 %v554_v3  ;;  %v1512_v46 = vld [vmem:[%s1922_s6] ss:$0 sm:$0xff] }
  0x15   : > { %1436 = vmatmul.msk.f32.vlgmr.msra.gmra.mxu1 %vm562_vm0, %v1695_v5  ;;  %1435 = vmatmul.msk.f32.vlgmr.msra.gmra.mxu0 %vm562_vm0, %v1697_v6  ;;  %v744_v50 = vld [vmem:[%s1923_s7] sm:$0xff] }
  0x16   : > { %612 = vmatpush.msrb.mxu1 %v595_v4  ;;  %645 = vmatpush.msra.mxu2 %v624_v32 }
  0x18   : > { %613 = vmatpush.msrb.mxu1 %v594_v7  ;;  %646 = vmatpush.msra.mxu2 %v623_v33 }
  0x19   : > { %1439 = vmatmul.msk.f32.vlgmr.msra.gmra.mxu2 %vm562_vm0, %v1697_v6 }
  0x1a   : > { %614 = vmatpush.msrb.mxu1 %v593_v8 }
  0x1c   : > { %615 = vmatpush.msrb.mxu1 %v592_v9 }
  0x1d   : > { %1437 = vmatmul.msk.f32.vlgmr.msrb.gmra.mxu1 %vm562_vm0, %v1697_v6 }
  0x21   : > { %1440 = vmatmul.msk.f32.gmra.mxu2 %vm562_vm0, %v1695_v5 }
  0x25   : > { %1438 = vmatmul.msk.f32.gmra.mxu1 %vm562_vm0, %v1695_v5 }
  0x92   : > { %v589_v10 = vpop.f32.mrf.mxu1  ;;  %v586_v13 = vpop.f32.mrf.mxu0 }
  0x93   : > { %v587_v17 = vadd.f32 %v1510_v14, %v586_v13  ;;  %v590_v20 = vadd.f32 %v1510_v14, %v589_v10 }
  0x95   : > { %v654_v19 = vmul.f32 0.35355338, %v587_v17  ;;  %v655_v21 = vmul.f32 0.35355338, %v590_v20 }
  0x9a   : > { %v617_v11 = vpop.f32.mrf.mxu1 }
  0x9b   : > { %v618_v18 = vadd.f32 %v1511_v12, %v617_v11 }
  0x9c   : > { %v648_v45 = vpop.f32.mrf.mxu2 }
  0x9d   : > { %v649_v48 = vadd.f32 %v1512_v46, %v648_v45 }
  0xa2   : > { %v620_v15 = vpop.f32.mrf.mxu1 }
  0xa3   : > { %v621_v16 = vadd.f32 %v1511_v12, %v620_v15 }
  0xa4   : > { %v651_v47 = vpop.f32.mrf.mxu2 }
  0xa5   : > { %751 = vrot.lane.b32.xlu2 %v621_v16, %s1570_s29  ;;  %1441 = vmatpush.xpose.msk.msra.mxu3 %vm656_vm1, %v621_v16  ;;  %v652_v49 = vadd.f32 %v1512_v46, %v651_v47 }
  0xa7   : > { %735 = vmatpush.msrb.mxu0 %v652_v49  ;;  %v1769_v51 = vpack.i.bf16 %v649_v48, %v652_v49 }
  0xa9   : > { %1442 = vmatpush.xpose.msk.msra.mxu3 %vm656_vm1, %v618_v18  ;;  %736 = vmatpush.msrb.mxu0 %v649_v48 }
  0xab   : > { %894 = vmatpush.msra.mxu0 %v744_v50 }
  0xac   : > { %1443 = vmatmul.msk.f32.vlgmr.msra.gmra.mxu3 %vm656_vm1, %v654_v19 }
  0xad   : > { %749 = vrot.lane.b32.xlu2 %v618_v18, %s1570_s29 }
  0xb4   : > { %1444 = vmatmul.msk.f32.gmra.mxu3 %vm656_vm1, %v655_v21 }
  0xb5   : > { %908 = vrot.lane.b32.xlu2 %v621_v16, %s1571_s0 }
  0xbd   : > { %906 = vrot.lane.b32.xlu2 %v618_v18, %s1571_s0 }
  0xc5   : > { %902 = vrot.lane.b32.xlu2 %v654_v19, %s1571_s0 }
  0xcd   : > { %1034 = vrot.lane.b32.xlu2 %v618_v18, %s1572_s18 }
  0xd5   : > { %1032 = vrot.lane.b32.xlu2 %v655_v21, %s1572_s18 }
  0xff   : > { %v752_v22 = vpop.permute.xlu2 %751 }
 0x100   : > { %1447 = vmatpush.xpose.msk.msra.mxu1 %vm656_vm1, %v752_v22 }
 0x107   : > { %v750_v23 = vpop.permute.xlu2 %749 }
 0x108   : > { %1448 = vmatpush.xpose.msk.msra.mxu1 %vm656_vm1, %v750_v23 }
 0x10f   : > { %v909_v24 = vpop.permute.xlu2 %908 }
 0x110   : > { %1457 = vmatpush.xpose.msk.msrb.mxu1 %vm656_vm1, %v909_v24 }
 0x117   : > { %v907_v25 = vpop.permute.xlu2 %906 }
 0x118   : > { %1458 = vmatpush.xpose.msk.msrb.mxu1 %vm656_vm1, %v907_v25 }
 0x11f   : > { %v903_v53 = vpop.permute.xlu2 %902 }
 0x127   : > { %v1035_v58 = vpop.permute.xlu2 %1034 }
 0x12f   : > { %v686_v26 = vpop.f32.mrf.mxu3  ;;  %v1033_v7 = vpop.permute.xlu2 %1032 }
 0x130   : > { %v693_v27 = vsel %vm692_vm2, %v686_v26, -inf }
 0x131   : > { %694 = vmax.xlane.f32.xlu0 %v693_v27 }
 0x137   : > { %v689_v28 = vpop.f32.mrf.mxu3 }
 0x138   : > { %v696_v29 = vsel %vm692_vm2, %v689_v28, -inf }
 0x139   : > { %697 = vmax.xlane.f32.xlu0 %v696_v29 }
 0x14d   : > { %745 = vrot.lane.b32.xlu0 %v654_v19, %s1570_s29 }
 0x155   : > { %1036 = vrot.lane.b32.xlu0 %v621_v16, %s1572_s18 }
 0x15d   : > { %1030 = vrot.lane.b32.xlu0 %v654_v19, %s1572_s18 }
 0x1a4   : > { %v695_v34 = vpop.xlane.xlu0 %694 }
 0x1a5   : > { %v699_v35 = vsub.f32 %v686_v26, %v695_v34 }
 0x1a7   : > { %v701_v36 = vmul.f32 1.442695, %v699_v35 }
 0x1a9   : > { %1520 = vpow2.f32 %v701_v36 }
 0x1ac   : > { %v698_v37 = vpop.xlane.xlu0 %697 }
 0x1ad   : > { %v700_v38 = vsub.f32 %v689_v28, %v698_v37 }
 0x1af   : > { %v1521_v39 = vpop.eup %1520  ;;  %v703_v40 = vmul.f32 1.442695, %v700_v38 }
 0x1b0   : > { %v705_v41 = vsel %vm692_vm2, %v1521_v39, 0.0 }
 0x1b1   : > { %1522 = vpow2.f32 %v703_v40  ;;  %706 = vadd.xlane.f32.xlu1 %v705_v41 }
 0x1b7   : > { %v1523_v42 = vpop.eup %1522 }
 0x1b8   : > { %v708_v43 = vsel %vm692_vm2, %v1523_v42, 0.0 }
 0x1b9   : > { %709 = vadd.xlane.f32.xlu1 %v708_v43 }
 0x1bf   : > { %v746_v44 = vpop.permute.xlu0 %745 }
 0x1c0   : > { %1449 = vmatmul.msk.f32.vlgmr.msra.gmra.mxu1 %vm656_vm1, %v746_v44 }
 0x1c7   : > { %v1037_v57 = vpop.permute.xlu0 %1036 }
 0x1cf   : > { %v1031_v3 = vpop.permute.xlu0 %1030 }
 0x1d2   : > { %747 = vrot.lane.b32.xlu1 %v655_v21, %s1570_s29 }
 0x1da   : > { %904 = vrot.lane.b32.xlu1 %v655_v21, %s1571_s0 }
 0x224   : > { %v707_v52 = vpop.xlane.xlu1 %706 }
 0x225   : > { %1524 = vrcp.f32 %v707_v52 }
 0x22b   : > { %v1525_v54 = vpop.eup %1524 }
 0x22c   : > { %v710_v55 = vpop.xlane.xlu1 %709  ;;  %v713_v56 = vmul.f32 %v1525_v54, %v1521_v39 }
 0x22d   : > { %1526 = vrcp.f32 %v710_v55 }
 0x22e   : > { %1445 = vmatmul.msk.f32.vlgmr.msrb.gmra.mxu0 %vm692_vm2, %v713_v56 }
 0x22f   : > { %1465 = vmatpush.xpose.msk.msrb.mxu0 %vm656_vm1, %v1037_v57 }
 0x233   : > { %v1527_v59 = vpop.eup %1526  ;;  %1466 = vmatpush.xpose.msk.msrb.mxu0 %vm656_vm1, %v1035_v58 }
 0x234   : > { %v714_v60 = vmul.f32 %v1527_v59, %v1523_v42 }
 0x236   : > { %1446 = vmatmul.msk.f32.gmra.mxu0 %vm692_vm2, %v714_v60 }
 0x23d   : > { %v778_v61 = vpop.f32.mrf.mxu1 }
 0x23e   : > { %v784_v62 = vsel %vm692_vm2, %v778_v61, -inf }
 0x23f   : > { %785 = vmax.xlane.f32.xlu1 %v784_v62 }
 0x244   : > { %v748_v63 = vpop.permute.xlu1 %747 }
 0x245   : > { %1450 = vmatmul.msk.f32.gmra.mxu1 %vm656_vm1, %v748_v63 }
 0x24c   : > { %v905_v0 = vpop.permute.xlu1 %904 }
 0x24d   : > { %1459 = vmatmul.msk.f32.vlgmr.msrb.gmra.mxu1 %vm656_vm1, %v903_v53 }
 0x255   : > { %1460 = vmatmul.msk.f32.gmra.mxu1 %vm656_vm1, %v905_v0 }
 0x2ab   : > { %v738_v1 = vpop.f32.mrf.mxu0 }
 0x2ac   : > { %1455 = vmatmul.msk.f32.vlgmr.msra.gmra.mxu0 %vm656_vm1, %v738_v1 }
 0x2b2   : > { %v786_v9 = vpop.xlane.xlu1 %785 }
 0x2b3   : > { %v741_v2 = vpop.f32.mrf.mxu0  ;;  %v790_v10 = vsub.f32 %v778_v61, %v786_v9 }
 0x2b4   : > { %1456 = vmatmul.msk.f32.gmra.mxu0 %vm656_vm1, %v741_v2 }
 0x2b5   : > { %v792_v13 = vmul.f32 1.442695, %v790_v10 }
 0x2b7   : > { %1528 = vpow2.f32 %v792_v13 }
 0x2bc   : > { %1467 = vmatmul.msk.f32.vlgmr.msrb.gmra.mxu0 %vm656_vm1, %v1031_v3 }
 0x2bd   : > { %v1529_v16 = vpop.eup %1528 }
 0x2be   : > { %v796_v17 = vsel %vm692_vm2, %v1529_v16, 0.0 }
 0x2c2   : > { %v781_v4 = vpop.f32.mrf.mxu1 }
 0x2c3   : > { %v787_v8 = vsel %vm692_vm2, %v781_v4, -inf }
 0x2c4   : > { %788 = vmax.xlane.f32.xlu0 %v787_v8  ;;  %1468 = vmatmul.msk.f32.gmra.mxu0 %vm656_vm1, %v1033_v7  ;;  %v843_v8 = vld [vmem:[%s1923_s7 + $0x8] sm:$0xff] }
 0x2c5   : > { %865 = vmatpush.msrb.mxu3 %v843_v8  ;;  %v1273_v8 = vld [vmem:[%s1929_s13 + $0x28] sm:$0xff] }
 0x2ca   : > { %v935_v11 = vpop.f32.mrf.mxu1 }
 0x2cb   : > { %v941_v12 = vsel %vm692_vm2, %v935_v11, -inf }
 0x2cc   : > { %942 = vmax.xlane.f32.xlu2 %v941_v12  ;;  %v998_v12 = vld [vmem:[%s1923_s7 + $0x10] sm:$0xff] }
 0x2cd   : > { %1020 = vmatpush.msra.mxu3 %v998_v12  ;;  %v1272_v12 = vld [vmem:[%s1929_s13 + $0x20] sm:$0xff] }
 0x2d2   : > { %v938_v14 = vpop.f32.mrf.mxu1 }
 0x2d3   : > { %v944_v15 = vsel %vm692_vm2, %v938_v14, -inf }
 0x2d4   : > { %945 = vmax.xlane.f32.xlu1 %v944_v15 }
 0x2dc   : > { %797 = vadd.xlane.f32.xlu1 %v796_v17 }
 0x329   : > { %v1787_v18 = vpop.f32.mrf.mxu0 }
 0x331   : > { %v1789_v19 = vpop.f32.mrf.mxu0 }
 0x337   : > { %v789_v20 = vpop.xlane.xlu0 %788 }
 0x338   : > { %v791_v21 = vsub.f32 %v781_v4, %v789_v20 }
 0x339   : > { %v1063_v22 = vpop.f32.mrf.mxu0 }
 0x33a   : > { %v794_v23 = vmul.f32 1.442695, %v791_v21  ;;  %v1069_v24 = vsel %vm692_vm2, %v1063_v22, -inf }
 0x33b   : > { %1070 = vmax.xlane.f32.xlu0 %v1069_v24 }
 0x33c   : > { %1530 = vpow2.f32 %v794_v23 }
 0x33f   : > { %v943_v25 = vpop.xlane.xlu2 %942 }
 0x340   : > { %v947_v26 = vsub.f32 %v935_v11, %v943_v25 }
 0x341   : > { %v1066_v31 = vpop.f32.mrf.mxu0 }
 0x342   : > { %v1531_v27 = vpop.eup %1530  ;;  %v949_v28 = vmul.f32 1.442695, %v947_v26  ;;  %v1072_v36 = vsel %vm692_vm2, %v1066_v31, -inf }
 0x343   : > { %v799_v29 = vsel %vm692_vm2, %v1531_v27, 0.0 }
 0x344   : > { %1532 = vpow2.f32 %v949_v28  ;;  %800 = vadd.xlane.f32.xlu2 %v799_v29 }
 0x347   : > { %v946_v30 = vpop.xlane.xlu1 %945 }
 0x348   : > { %v948_v32 = vsub.f32 %v938_v14, %v946_v30  ;;  %v1126_v14 = vld [vmem:[%s1923_s7 + $0x18] sm:$0xff]  ;;  %v1513_v30 = vld [vmem:[%s1924_s8] ss:$0 sm:$0xff] }
 0x34a   : > { %v1533_v33 = vpop.eup %1532  ;;  %v951_v34 = vmul.f32 1.442695, %v948_v32 }
 0x34b   : > { %v953_v35 = vsel %vm692_vm2, %v1533_v33, 0.0 }
 0x34c   : > { %1534 = vpow2.f32 %v951_v34  ;;  %954 = vadd.xlane.f32.xlu1 %v953_v35  ;;  %1073 = vmax.xlane.f32.xlu2 %v1072_v36 }
 0x34f   : > { %1496 = vrot.lane.b32.xlu0 %v1769_v51, %s1570_s29  ;;  %v798_v44 = vpop.xlane.xlu1 %797 }
 0x352   : > { %v1535_v37 = vpop.eup %1534 }
 0x353   : > { %v956_v38 = vsel %vm692_vm2, %v1535_v37, 0.0 }
 0x354   : > { %957 = vadd.xlane.f32.xlu1 %v956_v38 }
 0x364   : > { %1501 = vrot.lane.b32.xlu2 %v1769_v51, %s1571_s0 }
 0x36d   : > { %1506 = vrot.lane.b32.xlu1 %v1769_v51, %s1572_s18  ;;  %s550_s18 = scalar_lea.vmem %s1933_s17, %s1432_s21 }
 0x3ae   : > { %v1071_v39 = vpop.xlane.xlu0 %1070 }
 0x3af   : > { %v1075_v40 = vsub.f32 %v1063_v22, %v1071_v39 }
 0x3b1   : > { %v1077_v41 = vmul.f32 1.442695, %v1075_v40 }
 0x3b3   : > { %1536 = vpow2.f32 %v1077_v41 }
 0x3b4   : > { %1538 = vrcp.f32 %v798_v44 }
 0x3b7   : > { %v801_v42 = vpop.xlane.xlu2 %800 }
 0x3b8   : > { %1540 = vrcp.f32 %v801_v42 }
 0x3b9   : > { %v1537_v43 = vpop.eup %1536 }
 0x3ba   : > { %v1081_v45 = vsel %vm692_vm2, %v1537_v43, 0.0  ;;  %v1539_v49 = vpop.eup %1538 }
 0x3bb   : > { %1082 = vadd.xlane.f32.xlu0 %v1081_v45  ;;  %v804_v53 = vmul.f32 %v1539_v49, %v1529_v16 }
 0x3be   : > { %v1541_v57 = vpop.eup %1540 }
 0x3bf   : > { %v1074_v46 = vpop.xlane.xlu2 %1073  ;;  %v955_v54 = vpop.xlane.xlu1 %954  ;;  %v805_v61 = vmul.f32 %v1541_v57, %v1531_v27  ;;  %v1232_v57 = vld [vmem:[%s1927_s11 + $0x18] sm:$0xff] }
 0x3c0   : > { %v1076_v47 = vsub.f32 %v1066_v31, %v1074_v46 }
 0x3c1   : > { %v1497_v48 = vpop.permute.xlu0 %1496 }
 0x3c2   : > { %v1079_v50 = vmul.f32 1.442695, %v1076_v47  ;;  %v1498_v52 = vunpack.i.l.bf16 %v1497_v48  ;;  %v1499_v51 = vunpack.i.h.bf16 %v1497_v48 }
 0x3c4   : > { %1542 = vpow2.f32 %v1079_v50  ;;  %834 = vmatpush.msrb.mxu2 %v1498_v52 }
 0x3c5   : > { %1544 = vrcp.f32 %v955_v54 }
 0x3c6   : > { %835 = vmatpush.msrb.mxu2 %v1499_v51 }
 0x3c7   : > { %v1502_v55 = vpop.permute.xlu2 %1501  ;;  %1451 = vmatmul.msk.f32.vlgmr.msrb.gmra.mxu2 %vm692_vm2, %v804_v53  ;;  %v958_v62 = vpop.xlane.xlu1 %957 }
 0x3c8   : > { %v1503_v56 = vunpack.i.l.bf16 %v1502_v55  ;;  %v1504_v59 = vunpack.i.h.bf16 %v1502_v55  ;;  %1546 = vrcp.f32 %v958_v62 }
 0x3ca   : > { %v1543_v58 = vpop.eup %1542  ;;  %989 = vmatpush.msra.mxu2 %v1503_v56 }
 0x3cb   : > { %v1084_v60 = vsel %vm692_vm2, %v1543_v58, 0.0  ;;  %v1545_v63 = vpop.eup %1544 }
 0x3cc   : > { %1085 = vadd.xlane.f32.xlu2 %v1084_v60  ;;  %990 = vmatpush.msra.mxu2 %v1504_v59  ;;  %v961_v0 = vmul.f32 %v1545_v63, %v1533_v33  ;;  %v1230_v59 = vld [vmem:[%s1927_s11 + $0x8] sm:$0xff]  ;;  %v1229_v60 = vld [vmem:[%s1927_s11] sm:$0xff] }
 0x3ce   : > { %v1547_v1 = vpop.eup %1546  ;;  %1148 = vmatpush.msrb.mxu2 %v1126_v14 }
 0x3cf   : > { %1452 = vmatmul.msk.f32.gmra.mxu2 %vm692_vm2, %v805_v61  ;;  %v962_v2 = vmul.f32 %v1547_v1, %v1535_v37 }
 0x3d7   : > { %1461 = vmatmul.msk.f32.vlgmr.msra.gmra.mxu2 %vm692_vm2, %v961_v0 }
 0x3df   : > { %v1507_v3 = vpop.permute.xlu1 %1506  ;;  %1462 = vmatmul.msk.f32.gmra.mxu2 %vm692_vm2, %v962_v2 }
 0x3e0   : > { %v1508_v4 = vunpack.i.l.bf16 %v1507_v3  ;;  %v1509_v7 = vunpack.i.h.bf16 %v1507_v3  ;;  %v1275_v3 = vld [vmem:[%s1929_s13 + $0x38] sm:$0xff] }
 0x3e1   : > { %1295 = vmatpush.msra.mxu0 %v1275_v3 }
 0x3e2   : > { %1117 = vmatpush.msra.mxu1 %v1508_v4  ;;  %v1274_v4 = vld [vmem:[%s1929_s13 + $0x30] sm:$0xff] }
 0x3e3   : > { %1296 = vmatpush.msra.mxu0 %v1274_v4 }
 0x3e4   : > { %1118 = vmatpush.msra.mxu1 %v1509_v7 }
 0x3e5   : > { %1297 = vmatpush.msra.mxu0 %v1273_v8 }
 0x3e7   : > { %1298 = vmatpush.msra.mxu0 %v1272_v12  ;;  %v1519_v12 = vld [vmem:[%s1932_s16] ss:$0 sm:$0xff] }
 0x42e   : > { %v1083_v9 = vpop.xlane.xlu0 %1082 }
 0x42f   : > { %1548 = vrcp.f32 %v1083_v9 }
 0x435   : > { %v1549_v10 = vpop.eup %1548 }
 0x436   : > { %v1089_v11 = vmul.f32 %v1549_v10, %v1537_v43  ;;  %v1573_v43 = vmov 32.0  }
 0x438   : > { %1469 = vmatmul.msk.f32.vlgmr.msra.gmra.mxu1 %vm692_vm2, %v1089_v11 }
 0x43f   : > { %v1086_v13 = vpop.xlane.xlu2 %1085 }
 0x440   : > { %1550 = vrcp.f32 %v1086_v13 }
 0x441   : > { %1552 = vrcp.f32 %v1573_v43  ;;  %v1517_v43 = vld [vmem:[%s1930_s14] ss:$0 sm:$0xff] }
 0x446   : > { %v1551_v15 = vpop.eup %1550 }
 0x447   : > { %v1090_v16 = vmul.f32 %v1551_v15, %v1543_v58  ;;  %v1553_v44 = vpop.eup %1552  ;;  %v1231_v58 = vld [vmem:[%s1927_s11 + $0x10] sm:$0xff]  ;;  %v1271_v15 = vld [vmem:[%s1929_s13 + $0x18] sm:$0xff] }
 0x448   : > { %v1173_v45 = vmul.f32 32.0, %v1553_v44  ;;  %vm1177_vm3 = vweird.f32 %v1553_v44  ;;  %1299 = vmatpush.msra.mxu0 %v1271_v15 }
 0x449   : > { %1470 = vmatmul.msk.f32.gmra.mxu1 %vm692_vm2, %v1090_v16  ;;  %v1514_v16 = vld [vmem:[%s1925_s9] ss:$0 sm:$0xff] }
 0x44a   : > { %v837_v17 = vpop.f32.mrf.mxu2 }
 0x44b   : > { %1453 = vmatmul.msk.f32.vlgmr.msrb.gmra.mxu3 %vm656_vm1, %v837_v17 }
 0x44c   : > { %1255 = vmatpush.msrb.mxu3 %v1232_v57 }
 0x44e   : > { %1256 = vmatpush.msrb.mxu3 %v1231_v58 }
 0x450   : > { %1257 = vmatpush.msrb.mxu3 %v1230_v59 }
 0x452   : > { %v840_v20 = vpop.f32.mrf.mxu2  ;;  %1258 = vmatpush.msrb.mxu3 %v1229_v60 }
 0x453   : > { %1454 = vmatmul.msk.f32.gmra.mxu3 %vm656_vm1, %v840_v20 }
 0x45a   : > { %v992_v21 = vpop.f32.mrf.mxu2 }
 0x45b   : > { %1463 = vmatmul.msk.f32.vlgmr.msra.gmra.mxu3 %vm656_vm1, %v992_v21  ;;  %v1515_v21 = vld [vmem:[%s1926_s10] ss:$0 sm:$0xff] }
 0x462   : > { %v995_v22 = vpop.f32.mrf.mxu2 }
 0x463   : > { %1464 = vmatmul.msk.f32.gmra.mxu3 %vm656_vm1, %v995_v22 }
 0x4b5   : > { %v1120_v23 = vpop.f32.mrf.mxu1 }
 0x4b6   : > { %1471 = vmatmul.msk.f32.vlgmr.msrb.gmra.mxu2 %vm656_vm1, %v1120_v23 }
 0x4c6   : > { %v1123_v24 = vpop.f32.mrf.mxu1 }
 0x4c7   : > { %1472 = vmatmul.msk.f32.gmra.mxu2 %vm656_vm1, %v1123_v24 }
 0x4ce   : > { %v867_v25 = vpop.f32.mrf.mxu3 }
 0x4cf   : > { %v897_v28 = vadd.f32 %v1787_v18, %v867_v25 }
 0x4d6   : > { %v870_v26 = vpop.f32.mrf.mxu3 }
 0x4d7   : > { %v900_v37 = vadd.f32 %v1789_v19, %v870_v26 }
 0x4de   : > { %v1022_v27 = vpop.f32.mrf.mxu3 }
 0x4df   : > { %v1028_v29 = vadd.f32 %v1022_v27, %v897_v28 }
 0x4e6   : > { %v1025_v36 = vpop.f32.mrf.mxu3 }
 0x4e7   : > { %v1029_v38 = vadd.f32 %v1025_v36, %v900_v37  ;;  %v1268_v36 = vld [vmem:[%s1929_s13] sm:$0xff] }
 0x4e8   : > { %v1516_v37 = vld [vmem:[%s1928_s12] ss:$0 sm:$0xff] }
 0x539   : > { %v1150_v31 = vpop.f32.mrf.mxu2 }
 0x53a   : > { %v1156_v32 = vadd.f32 %v1150_v31, %v1028_v29 }
 0x53c   : > { %v1162_v33 = vadd.f32 %v1513_v30, %v1156_v32 }
 0x53e   : > { %v1164_v34 = vadd.f32 %v1162_v33, %v1697_v6  ;;  %v1174_v6 = vsub.f32 1.0, %v1173_v45 }
 0x540   : > { %v1166_v35 = vsel %vm562_vm0, %v1164_v34, 0.0  ;;  %v1175_v46 = vmul.f32 %v1553_v44, %v1174_v6 }
 0x541   : > { %1167 = vadd.xlane.f32.xlu1 %v1166_v35  ;;  %v1269_v35 = vld [vmem:[%s1929_s13 + $0x8] sm:$0xff] }
 0x542   : > { %v1176_v47 = vadd.f32 %v1553_v44, %v1175_v46 }
 0x544   : > { %v1834_v48 = vsel %vm1177_vm3, %v1553_v44, %v1176_v47 }
 0x54a   : > { %v1153_v39 = vpop.f32.mrf.mxu2 }
 0x54b   : > { %v1157_v40 = vadd.f32 %v1153_v39, %v1029_v38 }
 0x54d   : > { %v1163_v18 = vadd.f32 %v1513_v30, %v1157_v40 }
 0x54f   : > { %v1165_v41 = vadd.f32 %v1163_v18, %v1695_v5 }
 0x551   : > { %v1169_v42 = vsel %vm562_vm0, %v1165_v41, 0.0 }
 0x552   : > { %1170 = vadd.xlane.f32.xlu0 %v1169_v42 }
 0x5b4   : > { %v1168_v19 = vpop.xlane.xlu1 %1167 }
 0x5b5   : > { %v1179_v49 = vmul.f32 %v1834_v48, %v1168_v19 }
 0x5b7   : > { %v1181_v50 = vsub.f32 %v1164_v34, %v1179_v49  ;;  %v1270_v34 = vld [vmem:[%s1929_s13 + $0x10] sm:$0xff] }
 0x5b8   : > { %1300 = vmatpush.msra.mxu0 %v1270_v34 }
 0x5b9   : > { %v1183_v52 = vmul.f32 %v1181_v50, %v1181_v50 }
 0x5ba   : > { %1301 = vmatpush.msra.mxu0 %v1269_v35 }
 0x5bb   : > { %v1185_v5 = vsel %vm562_vm0, %v1183_v52, 0.0 }
 0x5bc   : > { %1186 = vadd.xlane.f32.xlu0 %v1185_v5  ;;  %1302 = vmatpush.msra.mxu0 %v1268_v36 }
 0x5c5   : > { %v1171_v51 = vpop.xlane.xlu0 %1170 }
 0x5c6   : > { %v1180_v53 = vmul.f32 %v1834_v48, %v1171_v51 }
 0x5c8   : > { %v1182_v54 = vsub.f32 %v1165_v41, %v1180_v53 }
 0x5ca   : > { %v1184_v55 = vmul.f32 %v1182_v54, %v1182_v54 }
 0x5cc   : > { %v1188_v56 = vsel %vm562_vm0, %v1184_v55, 0.0 }
 0x5cd   : > { %1189 = vadd.xlane.f32.xlu2 %v1188_v56 }
 0x62f   : > { %v1187_v61 = vpop.xlane.xlu0 %1186 }
 0x630   : > { %v1191_v62 = vmul.f32 %v1187_v61, %v1834_v48 }
 0x632   : > { %v1193_v63 = vadd.f32 1e-05, %v1191_v62 }
 0x634   : > { %1554 = vrsqrt.f32 %v1193_v63  ;;  %vm1201_vm5 = vweird.f32 %v1193_v63 }
 0x63a   : > { %v1555_v0 = vpop.eup %1554 }
 0x63b   : > { %v1196_v1 = vmul.f32 %v1555_v0, %v1193_v63  ;;  %vm1202_vm4 = vweird.f32 %v1555_v0 }
 0x63c   : > { %vm1203_vm6 = vmor %vm1201_vm5, %vm1202_vm4 }
 0x63d   : > { %v1197_v2 = vmul.f32 %v1555_v0, %v1196_v1 }
 0x63f   : > { %v1198_v7 = vmul.f32 0.5, %v1197_v2 }
 0x640   : > { %v1190_v9 = vpop.xlane.xlu2 %1189 }
 0x641   : > { %v1199_v10 = vsub.f32 1.5, %v1198_v7  ;;  %v1192_v11 = vmul.f32 %v1190_v9, %v1834_v48 }
 0x643   : > { %v1200_v13 = vmul.f32 %v1555_v0, %v1199_v10  ;;  %v1194_v14 = vadd.f32 1e-05, %v1192_v11  ;;  %v1518_v10 = vld [vmem:[%s1931_s15] ss:$0 sm:$0xff] }
 0x645   : > { %v1204_v17 = vsel %vm1203_vm6, %v1555_v0, %v1200_v13  ;;  %1556 = vrsqrt.f32 %v1194_v14  ;;  %vm1211_vm8 = vweird.f32 %v1194_v14 }
 0x646   : > { %v1215_v20 = vmul.f32 %v1204_v17, %v1181_v50 }
 0x648   : > { %v1221_v22 = vmul.f32 %v1514_v16, %v1215_v20 }
 0x64a   : > { %v1227_v23 = vadd.f32 %v1515_v21, %v1221_v22 }
 0x64b   : > { %v1557_v24 = vpop.eup %1556 }
 0x64c   : > { %v1206_v25 = vmul.f32 %v1557_v24, %v1194_v14  ;;  %1473 = vmatmul.msk.f32.vlgmr.msrb.gmra.mxu3 %vm562_vm0, %v1227_v23  ;;  %vm1212_vm7 = vweird.f32 %v1557_v24 }
 0x64d   : > { %vm1213_vm9 = vmor %vm1211_vm8, %vm1212_vm7 }
 0x64e   : > { %v1207_v26 = vmul.f32 %v1557_v24, %v1206_v25 }
 0x650   : > { %v1208_v27 = vmul.f32 0.5, %v1207_v26 }
 0x652   : > { %v1209_v28 = vsub.f32 1.5, %v1208_v27 }
 0x654   : > { %v1210_v29 = vmul.f32 %v1557_v24, %v1209_v28 }
 0x656   : > { %v1214_v30 = vsel %vm1213_vm9, %v1557_v24, %v1210_v29 }
 0x657   : > { %v1216_v31 = vmul.f32 %v1214_v30, %v1182_v54 }
 0x659   : > { %v1222_v32 = vmul.f32 %v1514_v16, %v1216_v31 }
 0x65b   : > { %v1228_v33 = vadd.f32 %v1515_v21, %v1222_v32 }
 0x65d   : > { %1474 = vmatmul.msk.f32.gmra.mxu3 %vm562_vm0, %v1228_v33 }
 0x6cf   : > { %v1260_v38 = vpop.f32.mrf.mxu3 }
 0x6d0   : > { %v1261_v39 = vadd.f32 %v1516_v37, %v1260_v38 }
 0x6d2   : > { %v1266_v40 = vmax.f32 %v1261_v39, 0.0 }
 0x6d4   : > { %1475 = vmatmul.msk.f32.vlgmr.msra.gmra.mxu0 %vm1280_vm10, %v1266_v40 }
 0x6e0   : > { %v1263_v18 = vpop.f32.mrf.mxu3 }
 0x6e1   : > { %v1264_v41 = vadd.f32 %v1516_v37, %v1263_v18 }
 0x6e3   : > { %v1267_v42 = vmax.f32 %v1264_v41, 0.0 }
 0x6e5   : > { %1476 = vmatmul.msk.f32.gmra.mxu0 %vm1280_vm10, %v1267_v42 }
 0x751   : > { %v1304_v44 = vpop.f32.mrf.mxu0 }
 0x752   : > { %v1305_v45 = vadd.f32 %v1517_v43, %v1304_v44 }
 0x754   : > { %v1310_v6 = vadd.f32 %v1305_v45, %v1227_v23 }
 0x756   : > { %v1312_v46 = vsel %vm562_vm0, %v1310_v6, 0.0 }
 0x757   : > { %1313 = vadd.xlane.f32.xlu0 %v1312_v46 }
 0x762   : > { %v1307_v47 = vpop.f32.mrf.mxu0 }
 0x763   : > { %v1308_v19 = vadd.f32 %v1517_v43, %v1307_v47 }
 0x765   : > { %v1311_v49 = vadd.f32 %v1308_v19, %v1228_v33 }
 0x767   : > { %v1315_v50 = vsel %vm562_vm0, %v1311_v49, 0.0 }
 0x768   : > { %1316 = vadd.xlane.f32.xlu2 %v1315_v50 }
 0x7ca   : > { %v1314_v52 = vpop.xlane.xlu0 %1313 }
 0x7cb   : > { %v1318_v5 = vmul.f32 %v1314_v52, %v1834_v48 }
 0x7cd   : > { %v1320_v51 = vsub.f32 %v1310_v6, %v1318_v5 }
 0x7cf   : > { %v1322_v53 = vmul.f32 %v1320_v51, %v1320_v51 }
 0x7d1   : > { %v1324_v54 = vsel %vm562_vm0, %v1322_v53, 0.0 }
 0x7d2   : > { %1325 = vadd.xlane.f32.xlu0 %v1324_v54 }
 0x7db   : > { %v1317_v55 = vpop.xlane.xlu2 %1316 }
 0x7dc   : > { %v1319_v56 = vmul.f32 %v1317_v55, %v1834_v48 }
 0x7de   : > { %v1321_v57 = vsub.f32 %v1311_v49, %v1319_v56 }
 0x7e0   : > { %v1323_v58 = vmul.f32 %v1321_v57, %v1321_v57 }
 0x7e2   : > { %v1327_v59 = vsel %vm562_vm0, %v1323_v58, 0.0 }
 0x7e3   : > { %1328 = vadd.xlane.f32.xlu1 %v1327_v59 }
 0x845   : > { %v1326_v60 = vpop.xlane.xlu0 %1325 }
 0x846   : > { %v1330_v61 = vmul.f32 %v1326_v60, %v1834_v48 }
 0x848   : > { %v1332_v62 = vadd.f32 1e-05, %v1330_v61 }
 0x84a   : > { %1558 = vrsqrt.f32 %v1332_v62  ;;  %vm1340_vm12 = vweird.f32 %v1332_v62 }
 0x850   : > { %v1559_v63 = vpop.eup %1558 }
 0x851   : > { %v1335_v0 = vmul.f32 %v1559_v63, %v1332_v62  ;;  %vm1341_vm11 = vweird.f32 %v1559_v63 }
 0x852   : > { %vm1342_vm13 = vmor %vm1340_vm12, %vm1341_vm11 }
 0x853   : > { %v1336_v1 = vmul.f32 %v1559_v63, %v1335_v0 }
 0x855   : > { %v1337_v2 = vmul.f32 0.5, %v1336_v1 }
 0x856   : > { %v1329_v3 = vpop.xlane.xlu1 %1328 }
 0x857   : > { %v1338_v4 = vsub.f32 1.5, %v1337_v2  ;;  %v1331_v7 = vmul.f32 %v1329_v3, %v1834_v48 }
 0x859   : > { %v1339_v8 = vmul.f32 %v1559_v63, %v1338_v4  ;;  %v1333_v9 = vadd.f32 1e-05, %v1331_v7 }
 0x85b   : > { %v1343_v11 = vsel %vm1342_vm13, %v1559_v63, %v1339_v8  ;;  %1560 = vrsqrt.f32 %v1333_v9  ;;  %vm1350_vm15 = vweird.f32 %v1333_v9 }
 0x85c   : > { %v1354_v13 = vmul.f32 %v1343_v11, %v1320_v51 }
 0x85e   : > { %v1360_v14 = vmul.f32 %v1518_v10, %v1354_v13 }
 0x860   : > { %v1366_v48 = vadd.f32 %v1519_v12, %v1360_v14 }
 0x861   : > { %v1561_v15 = vpop.eup %1560 }
 0x862   : > { %1368 = vst.msk [vmem:[%s550_s18] sm:$0xff] %vm562_vm0, %v1366_v48  ;;  %v1345_v16 = vmul.f32 %v1561_v15, %v1333_v9  ;;  %vm1351_vm14 = vweird.f32 %v1561_v15 }
 0x863   : > { %vm1352_vm1 = vmor %vm1350_vm15, %vm1351_vm14 }
 0x864   : > { %v1346_v17 = vmul.f32 %v1561_v15, %v1345_v16 }
 0x866   : > { %v1347_v20 = vmul.f32 0.5, %v1346_v17 }
 0x868   : > { %v1348_v21 = vsub.f32 1.5, %v1347_v20 }
 0x86a   : > { %v1349_v22 = vmul.f32 %v1561_v15, %v1348_v21 }
 0x86c   : > { %v1353_v23 = vsel %vm1352_vm1, %v1561_v15, %v1349_v22 }
 0x86d   : > { %v1355_v24 = vmul.f32 %v1353_v23, %v1321_v57 }
 0x86f   : > { %v1361_v25 = vmul.f32 %v1518_v10, %v1355_v24 }
 0x871   : > { %v1367_v26 = vadd.f32 %v1519_v12, %v1361_v25 }
 0x873   : > { %1369 = vst.msk [vmem:[%s550_s18 + $0x8] sm:$0xff] %vm562_vm0, %v1367_v26 }
 0x874 PF: > { %s27_s24 = sadd.s32 1, %s1568_s24  }
 0x875   : > { %p24_p4 = scmp.ge.s32.totalorder %s27_s24, 4  }
 0x877   :  { %26 = sbr.rel (!%p24_p4) target bundleno = 3 (0x3), region = 118 }

</bundles_post_ra>
